<compile_context>
chip_gen: v5e
topology: v5e:2x2
jax: 0.10.0
libtpu: 0.0.40
codegen_flags: <defaults>
</compile_context>

<pallas_src>
import math
from functools import partial

import jax
import jax.numpy as jnp
from jax.experimental import pallas as pl
from jax.experimental.pallas import tpu as pltpu

NUM_LEVELS = 3


# ----------------------------------------------------------------------------
# In-kernel helpers
# ----------------------------------------------------------------------------

def _layernorm(x, g, b, eps=1e-5):
    x = x.astype(jnp.float32)
    mean = jnp.mean(x, axis=-1, keepdims=True)
    var = jnp.mean((x - mean) ** 2, axis=-1, keepdims=True)
    return (x - mean) * jax.lax.rsqrt(var + eps) * g + b


# ----------------------------------------------------------------------------
# Fully fused decoder stack + prediction heads: one pallas_call, grid=(NL+1,)
# ----------------------------------------------------------------------------

def _kmax_kernel(init_ref, qe_ref, memk_ref, memv_ref, xbias_ref, sbias_ref, hmask_ref,
                 wm_ref, w64_ref, lb_ref, hw32_ref, hw128_ref, hb_ref, mf_ref,
                 logits_ref, masks_ref, state_ref,
                 *, B, Q, E, nheads, dff, eps):
    p = pl.program_id(0)
    dh = E // nheads
    scale = 1.0 / math.sqrt(dh)

    @pl.when(p == 0)
    def _():
        state_ref[...] = init_ref[...]

    hmask = hmask_ref[...]                                   # (nheads, E) 0/1 column masks
    head_masks = [hmask[h:h + 1, :] for h in range(nheads)]  # (1, E) each

    def mha(q, k, v, bias):
        # Per-head full-width masked matmuls (no lane slicing / concat); batch folded into
        # one (B*Q, B*Lk) score tile via the block-diagonal additive bias.
        qs = q * scale
        out = jnp.zeros((q.shape[0], E), jnp.float32)
        for h in range(nheads):
            mh = head_masks[h]
            s = jax.lax.dot_general(qs * mh, k, (((1,), (1,)), ((), ())),
                                    preferred_element_type=jnp.float32) + bias
            s = s - jnp.max(s, axis=-1, keepdims=True)
            e = jnp.exp(s)
            pr = e * pl.reciprocal(jnp.sum(e, axis=-1, keepdims=True), approx=True)
            out = out + jnp.dot(pr, v * mh, preferred_element_type=jnp.float32)
        return out

    @pl.when(p > 0)
    def _():
        lvl = (p - 1) % NUM_LEVELS                           # memory level for this layer
        W = wm_ref[0]                                        # (8E + dff, E) packed matrices
        W64 = w64_ref[0]                                     # (40, dff): f_w1 rows 0:E, f_b1 row E
        Bv = lb_ref[0]                                       # (16, E) packed biases / LN params
        state = state_ref[...]                               # (B*Q, E), VMEM-resident
        qe = qe_ref[...]

        def mat(r, n=E):
            return W[r:r + n, :]

        def brow(r):
            return Bv[r:r + 1, :]

        # ---- cross-attention (post-norm), level selected in-kernel ----
        memk = memk_ref[lvl]                                 # (B*Lmax, E)  src + pos
        memv = memv_ref[lvl]                                 # (B*Lmax, E)  src
        q_in = state + qe
        q = jnp.dot(q_in, mat(0), preferred_element_type=jnp.float32) + brow(0)
        k = jnp.dot(memk, mat(E), preferred_element_type=jnp.float32) + brow(1)
        v = jnp.dot(memv, mat(2 * E), preferred_element_type=jnp.float32) + brow(2)
        a = mha(q, k, v, xbias_ref[lvl])
        a = jnp.dot(a, mat(3 * E), preferred_element_type=jnp.float32) + brow(3)
        state = _layernorm(state + a, brow(4), brow(5), eps)

        # ---- self-attention (post-norm) ----
        qk_in = state + qe
        q = jnp.dot(qk_in, mat(4 * E), preferred_element_type=jnp.float32) + brow(6)
        k = jnp.dot(qk_in, mat(5 * E), preferred_element_type=jnp.float32) + brow(7)
        v = jnp.dot(state, mat(6 * E), preferred_element_type=jnp.float32) + brow(8)
        a = mha(q, k, v, sbias_ref[...])
        a = jnp.dot(a, mat(7 * E), preferred_element_type=jnp.float32) + brow(9)
        state = _layernorm(state + a, brow(10), brow(11), eps)

        # ---- FFN (post-norm) ----
        h = jnp.dot(state, W64[0:E, :], preferred_element_type=jnp.float32) + W64[E:E + 1, :]
        h = jnp.maximum(h, 0.0)
        h = jnp.dot(h, mat(8 * E, dff), preferred_element_type=jnp.float32) + brow(12)
        state = _layernorm(state + h, brow(13), brow(14), eps)

        state_ref[...] = state

    # ---- fused forward_prediction_heads on the resident state (every grid step) ----
    state = state_ref[...]
    hb = hb_ref[...]                                         # (8, E) head biases / LN
    dec = _layernorm(state, hb[0:1, :], hb[1:2, :], eps)     # decoder_norm
    hw128 = hw128_ref[...]                                   # (40, 128): class W rows 0:E, bias row E
    logits_ref[0] = (jnp.dot(dec, hw128[0:E, :], preferred_element_type=jnp.float32)
                     + hw128[E:E + 1, :])                    # lane-dense (128) store
    hw32 = hw32_ref[...]                                     # (3E, E) mask-MLP matrices
    h = jnp.maximum(jnp.dot(dec, hw32[0:E, :],
                            preferred_element_type=jnp.float32) + hb[2:3, :], 0.0)
    h = jnp.maximum(jnp.dot(h, hw32[E:2 * E, :],
                            preferred_element_type=jnp.float32) + hb[3:4, :], 0.0)
    me = jnp.dot(h, hw32[2 * E:3 * E, :], preferred_element_type=jnp.float32) + hb[4:5, :]
    for b in range(B):                                       # einsum('bqc,bchw->bqhw'), HW flat
        masks_ref[0, b] = jnp.dot(me[b * Q:(b + 1) * Q, :], mf_ref[b],
                                  preferred_element_type=jnp.float32)


def kmax_fused(init_out, qe, memk, memv, xbias, sbias, hmask,
               wm, w64, lb, hw32, hw128, hb, mf_flat, *,
               B, Q, E, nheads, dff, num_layers, eps=1e-5):
    BQ = B * Q
    NP = num_layers + 1
    NCP = hw128.shape[-1]
    HW = mf_flat.shape[-1]

    def const(arr):
        n = arr.ndim
        return pl.BlockSpec(arr.shape, lambda p, _n=n: (0,) * _n)

    def per_layer(arr):
        nd = arr.ndim
        # step p>=1 uses layer p-1; p=0 maps to a valid (unused) block.
        return pl.BlockSpec(
            (1,) + arr.shape[1:],
            lambda p, _nd=nd: ((p + num_layers - 1) % num_layers,) + (0,) * (_nd - 1))

    in_specs = [
        const(init_out), const(qe),
        const(memk), const(memv), const(xbias), const(sbias), const(hmask),
        per_layer(wm), per_layer(w64), per_layer(lb),
        const(hw32), const(hw128), const(hb), const(mf_flat),
    ]

    return pl.pallas_call(
        partial(_kmax_kernel, B=B, Q=Q, E=E, nheads=nheads, dff=dff, eps=eps),
        grid=(NP,),
        in_specs=in_specs,
        out_specs=[
            pl.BlockSpec((1, BQ, NCP), lambda p: (p, 0, 0)),
            pl.BlockSpec((1, B, Q, HW), lambda p: (p, 0, 0, 0)),
        ],
        out_shape=[
            jax.ShapeDtypeStruct((NP, BQ, NCP), jnp.float32),
            jax.ShapeDtypeStruct((NP, B, Q, HW), jnp.float32),
        ],
        scratch_shapes=[pltpu.VMEM((BQ, E), jnp.float32)],
        compiler_params=pltpu.CompilerParams(dimension_semantics=("arbitrary",)),
    )(init_out, qe, memk, memv, xbias, sbias, hmask, wm, w64, lb, hw32, hw128, hb, mf_flat)


# ----------------------------------------------------------------------------
# Plain-JAX glue: position embedding, input projection, bias tables, forward
# ----------------------------------------------------------------------------

def position_embedding_sine(B, H, W, num_pos_feats, temperature=10000.0):
    """PositionEmbeddingSine(normalize=True), returned channels-last (B, H*W, 2*npf)."""
    scale = 2.0 * math.pi
    eps = 1e-6
    ones = jnp.ones((B, H, W), jnp.float32)
    y_embed = jnp.cumsum(ones, axis=1)
    x_embed = jnp.cumsum(ones, axis=2)
    y_embed = y_embed / (y_embed[:, -1:, :] + eps) * scale
    x_embed = x_embed / (x_embed[:, :, -1:] + eps) * scale
    dim_t = jnp.arange(num_pos_feats, dtype=jnp.float32)
    dim_t = temperature ** (2.0 * jnp.floor(dim_t / 2.0) / num_pos_feats)
    pos_x = x_embed[:, :, :, None] / dim_t
    pos_y = y_embed[:, :, :, None] / dim_t
    pos_x = jnp.stack([jnp.sin(pos_x[..., 0::2]), jnp.cos(pos_x[..., 1::2])],
                      axis=4).reshape(B, H, W, -1)
    pos_y = jnp.stack([jnp.sin(pos_y[..., 0::2]), jnp.cos(pos_y[..., 1::2])],
                      axis=4).reshape(B, H, W, -1)
    pos = jnp.concatenate([pos_y, pos_x], axis=3)            # (B, H, W, 2*npf)
    return pos.reshape(B, H * W, 2 * num_pos_feats)


def kmax_decoder_forward(params, x_list, mask_features):
    E = params["hidden_dim"]
    nheads = params["nheads"]
    NL = params["dec_layers"]
    Q = params["num_queries"]
    dff = params["dim_feedforward"]
    B = x_list[0].shape[0]

    # per-level: sine position embedding + 1x1-conv projection + level embed (plain JAX)
    srcs, poss, lens = [], [], []
    for i in range(NUM_LEVELS):
        _, Cin, Hi, Wi = x_list[i].shape
        L = Hi * Wi
        lens.append(L)
        poss.append(position_embedding_sine(B, Hi, Wi, E // 2))               # (B, L, E)
        x_flat = jnp.transpose(x_list[i], (0, 2, 3, 1)).reshape(B, L, Cin)
        srcs.append(jnp.dot(x_flat, params["input_proj_w"][i])
                    + params["input_proj_b"][i]
                    + params["level_embed"][i][None, None, :])                # (B, L, E)

    # pad levels to Lmax; precompute K=src+pos, V=src, block-diag+key-pad attention biases
    Lmax = max(lens)
    qids = jnp.arange(B * Q) // Q                      # batch id per query row
    kb = jnp.arange(B * Lmax) // Lmax                  # batch id per key col
    kj = jnp.arange(B * Lmax) % Lmax                   # within-level position per key col
    memk_l, memv_l, xbias_l = [], [], []
    for lvl in range(NUM_LEVELS):
        L = lens[lvl]
        padw = ((0, 0), (0, Lmax - L), (0, 0))
        memk_l.append(jnp.pad(srcs[lvl] + poss[lvl], padw).reshape(B * Lmax, E))
        memv_l.append(jnp.pad(srcs[lvl], padw).reshape(B * Lmax, E))
        ok = (qids[:, None] == kb[None, :]) & (kj[None, :] < L)
        xbias_l.append(jnp.where(ok, 0.0, -1e30).astype(jnp.float32))
    memk = jnp.stack(memk_l)                           # (3, B*Lmax, E)
    memv = jnp.stack(memv_l)                           # (3, B*Lmax, E)
    xbias = jnp.stack(xbias_l)                         # (3, B*Q, B*Lmax)

    sbias = jnp.where(qids[:, None] == qids[None, :], 0.0, -1e30).astype(jnp.float32)

    dh = E // nheads
    hmask = (jnp.arange(E)[None, :] // dh
             == jnp.arange(nheads)[:, None]).astype(jnp.float32)   # (nheads, E)

    qe = jnp.broadcast_to(params["query_embed"][None], (B, Q, E)).reshape(B * Q, E)
    init_out = jnp.broadcast_to(params["query_feat"][None], (B, Q, E)).reshape(B * Q, E)

    Bm, Cm, Hm, Wm = mask_features.shape
    mf_flat = mask_features.reshape(B, Cm, Hm * Wm)

    # whole decoder-layer loop + all prediction heads in one fused kernel
    logits_pad, masks_flat = kmax_fused(
        init_out, qe, memk, memv, xbias, sbias, hmask,
        params["wm"], params["w64"], params["lbias"],
        params["hw32"], params["hw128"], params["hbias"], mf_flat,
        B=B, Q=Q, E=E, nheads=nheads, dff=dff, num_layers=NL)

    NC1 = params["num_classes_p1"]
    logits = logits_pad.reshape(NL + 1, B, Q, -1)[..., :NC1]
    masks = masks_flat.reshape(NL + 1, B, Q, Hm, Wm)

    return {
        "pred_logits": logits[-1],
        "pred_masks": masks[-1],
        "aux_outputs": [{"pred_logits": logits[i], "pred_masks": masks[i]}
                        for i in range(NL)],
    }


# ----------------------------------------------------------------------------
# Deterministic synthetic parameters, packed into per-layer slabs
# ----------------------------------------------------------------------------

def init_params(key, hidden, nheads, dec_layers, dff, Q, num_classes, mask_dim, in_channels):
    assert mask_dim == hidden, "head slab packing assumes mask_dim == hidden_dim"
    keys = iter(jax.random.split(key, 512))
    nxt = lambda: next(keys)

    def xavier(fan_in, fan_out):
        a = math.sqrt(6.0 / (fan_in + fan_out))
        return jax.random.uniform(nxt(), (fan_in, fan_out), jnp.float32, -a, a)

    zeros = lambda *s: jnp.zeros(s, jnp.float32)
    ones = lambda *s: jnp.ones(s, jnp.float32)

    pad8 = lambda n: ((n + 7) // 8) * 8
    w64_rows = pad8(hidden + 1)

    wm_layers, w64_layers, lb_layers = [], [], []
    for _ in range(dec_layers):
        c_wq, c_wk = xavier(hidden, hidden), xavier(hidden, hidden)
        c_wv, c_wo = xavier(hidden, hidden), xavier(hidden, hidden)
        s_wq, s_wk = xavier(hidden, hidden), xavier(hidden, hidden)
        s_wv, s_wo = xavier(hidden, hidden), xavier(hidden, hidden)
        f_w1, f_w2 = xavier(hidden, dff), xavier(dff, hidden)
        # slab of all E-column matrices: rows [0:8E] attn projections, [8E:8E+dff] f_w2
        wm_layers.append(jnp.concatenate(
            [c_wq, c_wk, c_wv, c_wo, s_wq, s_wk, s_wv, s_wo, f_w2], axis=0))
        # slab of dff-column params: f_w1 rows 0:E, f_b1 (zeros) row E, pad to mult of 8
        w64_layers.append(jnp.concatenate(
            [f_w1, zeros(1, dff), zeros(w64_rows - hidden - 1, dff)], axis=0))
        # bias / LN slab (16 rows): cross bq,bk,bv,bo,ln_g,ln_b; self ditto; f_b2,f_ln_g,f_ln_b; pad
        lb_rows = ([zeros(1, hidden)] * 4 + [ones(1, hidden), zeros(1, hidden)]) * 2
        lb_rows += [zeros(1, hidden), ones(1, hidden), zeros(1, hidden), zeros(1, hidden)]
        lb_layers.append(jnp.concatenate(lb_rows, axis=0))

    NC1 = num_classes + 1
    nc_pad = ((NC1 + 127) // 128) * 128                 # lane-dense class-head output
    class_w = xavier(hidden, NC1)
    hw128 = jnp.concatenate(
        [jnp.pad(class_w, ((0, 0), (0, nc_pad - NC1))),
         zeros(1, nc_pad),                              # class bias (padded)
         zeros(w64_rows - hidden - 1, nc_pad)], axis=0)
    hw32 = jnp.concatenate([xavier(hidden, hidden), xavier(hidden, hidden),
                            xavier(hidden, mask_dim)], axis=0)          # (3*hidden, hidden)
    hbias = jnp.concatenate([ones(1, hidden), zeros(1, hidden),         # decoder_norm g, b
                             zeros(1, hidden), zeros(1, hidden),        # mask MLP b1, b2
                             zeros(1, mask_dim), zeros(3, hidden)], axis=0)   # b3 + pad

    return {
        "hidden_dim": hidden, "nheads": nheads, "dec_layers": dec_layers,
        "dim_feedforward": dff, "num_queries": Q, "num_classes_p1": NC1,
        "input_proj_w": [xavier(c, hidden) for c in in_channels],
        "input_proj_b": [zeros(1, hidden) for _ in in_channels],
        "level_embed": jax.random.normal(nxt(), (NUM_LEVELS, hidden), jnp.float32),
        "query_embed": jax.random.normal(nxt(), (Q, hidden), jnp.float32),
        "query_feat": jax.random.normal(nxt(), (Q, hidden), jnp.float32),
        "wm": jnp.stack(wm_layers),        # (NL, 8E+dff, E)
        "w64": jnp.stack(w64_layers),      # (NL, 40, dff)
        "lbias": jnp.stack(lb_layers),     # (NL, 16, E)
        "hw32": hw32, "hw128": hw128, "hbias": hbias,
    }


# ----------------------------------------------------------------------------
# Main
# ----------------------------------------------------------------------------

if __name__ == "__main__":
    key = jax.random.PRNGKey(0)
    k_param, k_x0, k_x1, k_x2, k_mf = jax.random.split(key, 5)

    # module config (small)
    hidden_dim, nheads, dec_layers = 32, 4, 3
    dim_feedforward, num_queries = 64, 8
    class_num, mask_dim = 5, 32
    in_channels = [8, 16, 32]
    B = 2

    params = init_params(k_param, hidden_dim, nheads, dec_layers, dim_feedforward,
                         num_queries, class_num, mask_dim, in_channels)

    # NCHW inputs (PyTorch convention)
    x = [
        jax.random.normal(k_x0, (B, in_channels[0], 8, 8), jnp.float32),
        jax.random.normal(k_x1, (B, in_channels[1], 4, 4), jnp.float32),
        jax.random.normal(k_x2, (B, in_channels[2], 4, 4), jnp.float32),
    ]
    mask_features = jax.random.normal(k_mf, (B, mask_dim, 16, 16), jnp.float32)

    @jax.jit
    def run(x0, x1, x2, mf):
        return kmax_decoder_forward(params, [x0, x1, x2], mf)

    out = run(x[0], x[1], x[2], mask_features)
    jax.block_until_ready(out["pred_logits"])
    jax.block_until_ready(out["pred_masks"])

    assert out["pred_logits"].shape == (B, num_queries, class_num + 1)
    assert out["pred_masks"].shape == (B, num_queries, 16, 16)
    assert len(out["aux_outputs"]) == dec_layers
    print("KERNEL_OK")
</pallas_src>

<mosaic_0001>
module attributes {stable_mosaic.version = 11 : i64} {
  func.func @_kmax_kernel(%arg0: i32, %arg1: memref<16x32xf32, #tpu.memory_space<vmem>>, %arg2: memref<16x32xf32, #tpu.memory_space<vmem>>, %arg3: memref<3x128x32xf32, #tpu.memory_space<vmem>>, %arg4: memref<3x128x32xf32, #tpu.memory_space<vmem>>, %arg5: memref<3x16x128xf32, #tpu.memory_space<vmem>>, %arg6: memref<16x16xf32, #tpu.memory_space<vmem>>, %arg7: memref<4x32xf32, #tpu.memory_space<vmem>>, %arg8: memref<1x320x32xf32, #tpu.memory_space<vmem>>, %arg9: memref<1x40x64xf32, #tpu.memory_space<vmem>>, %arg10: memref<1x16x32xf32, #tpu.memory_space<vmem>>, %arg11: memref<96x32xf32, #tpu.memory_space<vmem>>, %arg12: memref<40x128xf32, #tpu.memory_space<vmem>>, %arg13: memref<8x32xf32, #tpu.memory_space<vmem>>, %arg14: memref<2x32x256xf32, #tpu.memory_space<vmem>>, %arg15: memref<1x16x128xf32, #tpu.memory_space<vmem>>, %arg16: memref<1x2x8x256xf32, #tpu.memory_space<vmem>>, %arg17: memref<16x32xf32, #tpu.memory_space<vmem>>) attributes {dimension_semantics = [#tpu.dimension_semantics<arbitrary>], iteration_bounds = array<i64: 4>, scalar_prefetch = 0 : i64, scratch_operands = 1 : i64, tpu.core_type = #tpu.core_type<tc>, window_params = [{pipeline_mode = #tpu.pipeline_mode<synchronous>, transform_indices = @transform_0, window_bounds = array<i64: 16, 32>}, {pipeline_mode = #tpu.pipeline_mode<synchronous>, transform_indices = @transform_1, window_bounds = array<i64: 16, 32>}, {pipeline_mode = #tpu.pipeline_mode<synchronous>, transform_indices = @transform_2, window_bounds = array<i64: 3, 128, 32>}, {pipeline_mode = #tpu.pipeline_mode<synchronous>, transform_indices = @transform_3, window_bounds = array<i64: 3, 128, 32>}, {pipeline_mode = #tpu.pipeline_mode<synchronous>, transform_indices = @transform_4, window_bounds = array<i64: 3, 16, 128>}, {pipeline_mode = #tpu.pipeline_mode<synchronous>, transform_indices = @transform_5, window_bounds = array<i64: 16, 16>}, {pipeline_mode = #tpu.pipeline_mode<synchronous>, transform_indices = @transform_6, window_bounds = array<i64: 4, 32>}, {transform_indices = @transform_7, window_bounds = array<i64: 1, 320, 32>}, {transform_indices = @transform_8, window_bounds = array<i64: 1, 40, 64>}, {transform_indices = @transform_9, window_bounds = array<i64: 1, 16, 32>}, {pipeline_mode = #tpu.pipeline_mode<synchronous>, transform_indices = @transform_10, window_bounds = array<i64: 96, 32>}, {pipeline_mode = #tpu.pipeline_mode<synchronous>, transform_indices = @transform_11, window_bounds = array<i64: 40, 128>}, {pipeline_mode = #tpu.pipeline_mode<synchronous>, transform_indices = @transform_12, window_bounds = array<i64: 8, 32>}, {pipeline_mode = #tpu.pipeline_mode<synchronous>, transform_indices = @transform_13, window_bounds = array<i64: 2, 32, 256>}, {transform_indices = @transform_14, window_bounds = array<i64: 1, 16, 128>}, {transform_indices = @transform_15, window_bounds = array<i64: 1, 2, 8, 256>}]} {
    %c0_i32 = arith.constant 0 : i32
    %0 = arith.cmpi eq, %arg0, %c0_i32 : i32
    %1 = arith.extui %0 : i1 to i32
    %c0_i32_0 = arith.constant 0 : i32
    %2 = arith.cmpi ne, %1, %c0_i32_0 : i32
    scf.if %2 {
      %c0_40 = arith.constant 0 : index
      %c0_41 = arith.constant 0 : index
      %80 = vector.load %arg1[%c0_40, %c0_41] : memref<16x32xf32, #tpu.memory_space<vmem>>, vector<16x32xf32>
      %c0_42 = arith.constant 0 : index
      %c0_43 = arith.constant 0 : index
      %81 = vector.load %arg17[%c0_42, %c0_43] : memref<16x32xf32, #tpu.memory_space<vmem>>, vector<16x32xf32>
      tpu.vector_store %arg17[%c0_42, %c0_43], %80 {strides = array<i32>} : memref<16x32xf32, #tpu.memory_space<vmem>>, vector<16x32xf32>,
    } else {
    }
    %c0 = arith.constant 0 : index
    %c0_1 = arith.constant 0 : index
    %3 = vector.load %arg7[%c0, %c0_1] : memref<4x32xf32, #tpu.memory_space<vmem>>, vector<4x32xf32>
    %4 = vector.extract_strided_slice %3 {offsets = [0, 0], sizes = [1, 32], strides = [1, 1]} : vector<4x32xf32> to vector<1x32xf32>
    %5 = vector.extract_strided_slice %3 {offsets = [1, 0], sizes = [1, 32], strides = [1, 1]} : vector<4x32xf32> to vector<1x32xf32>
    %6 = vector.extract_strided_slice %3 {offsets = [2, 0], sizes = [1, 32], strides = [1, 1]} : vector<4x32xf32> to vector<1x32xf32>
    %7 = vector.extract_strided_slice %3 {offsets = [3, 0], sizes = [1, 32], strides = [1, 1]} : vector<4x32xf32> to vector<1x32xf32>
    %c0_i32_2 = arith.constant 0 : i32
    %8 = arith.cmpi sgt, %arg0, %c0_i32_2 : i32
    %9 = arith.extui %8 : i1 to i32
    %c0_i32_3 = arith.constant 0 : i32
    %10 = arith.cmpi ne, %9, %c0_i32_3 : i32
    scf.if %10 {
      %c1_i32 = arith.constant 1 : i32
      %80 = arith.subi %arg0, %c1_i32 : i32
      %c3_i32 = arith.constant 3 : i32
      %c0_i32_40 = arith.constant 0 : i32
      %81 = arith.cmpi eq, %c3_i32, %c0_i32_40 : i32
      %c1_i32_41 = arith.constant 1 : i32
      %82 = arith.select %81, %c1_i32_41, %c3_i32 : i32
      %83 = arith.remsi %80, %82 : i32
      %c0_i32_42 = arith.constant 0 : i32
      %84 = arith.cmpi ne, %83, %c0_i32_42 : i32
      %c0_i32_43 = arith.constant 0 : i32
      %85 = arith.cmpi slt, %83, %c0_i32_43 : i32
      %c0_i32_44 = arith.constant 0 : i32
      %86 = arith.cmpi slt, %82, %c0_i32_44 : i32
      %87 = arith.xori %85, %86 : i1
      %88 = arith.andi %87, %84 : i1
      %89 = arith.addi %83, %82 : i32
      %90 = arith.select %88, %89, %83 : i32
      %c0_45 = arith.constant 0 : index
      %c0_46 = arith.constant 0 : index
      %c0_47 = arith.constant 0 : index
      %91 = vector.load %arg8[%c0_45, %c0_46, %c0_47] : memref<1x320x32xf32, #tpu.memory_space<vmem>>, vector<1x320x32xf32>
      %92 = vector.shape_cast %91 : vector<1x320x32xf32> to vector<320x32xf32>
      %c0_48 = arith.constant 0 : index
      %c0_49 = arith.constant 0 : index
      %c0_50 = arith.constant 0 : index
      %93 = vector.load %arg9[%c0_48, %c0_49, %c0_50] : memref<1x40x64xf32, #tpu.memory_space<vmem>>, vector<1x40x64xf32>
      %94 = vector.shape_cast %93 : vector<1x40x64xf32> to vector<40x64xf32>
      %c0_51 = arith.constant 0 : index
      %c0_52 = arith.constant 0 : index
      %c0_53 = arith.constant 0 : index
      %95 = vector.load %arg10[%c0_51, %c0_52, %c0_53] : memref<1x16x32xf32, #tpu.memory_space<vmem>>, vector<1x16x32xf32>
      %96 = vector.shape_cast %95 : vector<1x16x32xf32> to vector<16x32xf32>
      %c0_54 = arith.constant 0 : index
      %c0_55 = arith.constant 0 : index
      %97 = vector.load %arg17[%c0_54, %c0_55] : memref<16x32xf32, #tpu.memory_space<vmem>>, vector<16x32xf32>
      %c0_56 = arith.constant 0 : index
      %c0_57 = arith.constant 0 : index
      %98 = vector.load %arg2[%c0_56, %c0_57] : memref<16x32xf32, #tpu.memory_space<vmem>>, vector<16x32xf32>
      %99 = arith.index_cast %90 : i32 to index
      %c0_58 = arith.constant 0 : index
      %c0_59 = arith.constant 0 : index
      %100 = vector.load %arg3[%99, %c0_58, %c0_59] : memref<3x128x32xf32, #tpu.memory_space<vmem>>, vector<1x128x32xf32>
      %101 = vector.shape_cast %100 : vector<1x128x32xf32> to vector<128x32xf32>
      %102 = arith.index_cast %90 : i32 to index
      %c0_60 = arith.constant 0 : index
      %c0_61 = arith.constant 0 : index
      %103 = vector.load %arg4[%102, %c0_60, %c0_61] : memref<3x128x32xf32, #tpu.memory_space<vmem>>, vector<1x128x32xf32>
      %104 = vector.shape_cast %103 : vector<1x128x32xf32> to vector<128x32xf32>
      %105 = arith.addf %97, %98 : vector<16x32xf32>
      %106 = vector.extract_strided_slice %92 {offsets = [0, 0], sizes = [32, 32], strides = [1, 1]} : vector<320x32xf32> to vector<32x32xf32>
      %cst_62 = arith.constant dense<0.000000e+00> : vector<16x32xf32>
      %107 = tpu.matmul %105, %106, %cst_62 {dimension_numbers = #tpu.dot_dimension_numbers<[1], [0], [0], [1], [0, 0, 1, 1], [], []>} : vector<16x32xf32>, vector<32x32xf32>, vector<16x32xf32> -> vector<16x32xf32>
      %108 = vector.extract_strided_slice %96 {offsets = [0, 0], sizes = [1, 32], strides = [1, 1]} : vector<16x32xf32> to vector<1x32xf32>
      %109 = vector.broadcast %108 : vector<1x32xf32> to vector<16x32xf32>
      %110 = arith.addf %107, %109 : vector<16x32xf32>
      %111 = vector.extract_strided_slice %92 {offsets = [32, 0], sizes = [32, 32], strides = [1, 1]} : vector<320x32xf32> to vector<32x32xf32>
      %cst_63 = arith.constant dense<0.000000e+00> : vector<128x32xf32>
      %112 = tpu.matmul %101, %111, %cst_63 {dimension_numbers = #tpu.dot_dimension_numbers<[1], [0], [0], [1], [0, 0, 1, 1], [], []>} : vector<128x32xf32>, vector<32x32xf32>, vector<128x32xf32> -> vector<128x32xf32>
      %113 = vector.extract_strided_slice %96 {offsets = [1, 0], sizes = [1, 32], strides = [1, 1]} : vector<16x32xf32> to vector<1x32xf32>
      %114 = vector.broadcast %113 : vector<1x32xf32> to vector<128x32xf32>
      %115 = arith.addf %112, %114 : vector<128x32xf32>
      %116 = vector.extract_strided_slice %92 {offsets = [64, 0], sizes = [32, 32], strides = [1, 1]} : vector<320x32xf32> to vector<32x32xf32>
      %cst_64 = arith.constant dense<0.000000e+00> : vector<128x32xf32>
      %117 = tpu.matmul %104, %116, %cst_64 {dimension_numbers = #tpu.dot_dimension_numbers<[1], [0], [0], [1], [0, 0, 1, 1], [], []>} : vector<128x32xf32>, vector<32x32xf32>, vector<128x32xf32> -> vector<128x32xf32>
      %118 = vector.extract_strided_slice %96 {offsets = [2, 0], sizes = [1, 32], strides = [1, 1]} : vector<16x32xf32> to vector<1x32xf32>
      %119 = vector.broadcast %118 : vector<1x32xf32> to vector<128x32xf32>
      %120 = arith.addf %117, %119 : vector<128x32xf32>
      %121 = arith.index_cast %90 : i32 to index
      %c0_65 = arith.constant 0 : index
      %c0_66 = arith.constant 0 : index
      %122 = vector.load %arg5[%121, %c0_65, %c0_66] : memref<3x16x128xf32, #tpu.memory_space<vmem>>, vector<1x16x128xf32>
      %123 = vector.shape_cast %122 : vector<1x16x128xf32> to vector<16x128xf32>
      %cst_67 = arith.constant 0.353553385 : f32
      %124 = vector.broadcast %cst_67 : f32 to vector<16x32xf32>
      %125 = arith.mulf %110, %124 : vector<16x32xf32>
      %cst_68 = arith.constant 0.000000e+00 : f32
      %126 = vector.broadcast %cst_68 : f32 to vector<16x32xf32>
      %127 = vector.broadcast %4 : vector<1x32xf32> to vector<16x32xf32>
      %128 = arith.mulf %125, %127 : vector<16x32xf32>
      %cst_69 = arith.constant dense<0.000000e+00> : vector<16x128xf32>
      %129 = tpu.matmul %128, %115, %cst_69 {dimension_numbers = #tpu.dot_dimension_numbers<[1], [1], [0], [0], [0, 0, 1, 0], [], []>} : vector<16x32xf32>, vector<128x32xf32>, vector<16x128xf32> -> vector<16x128xf32>
      %130 = arith.addf %129, %123 : vector<16x128xf32>
      %cst_70 = arith.constant dense<0xFF800000> : vector<16xf32>
      %131 = vector.multi_reduction <maximumf>, %130, %cst_70 [1] : vector<16x128xf32> to vector<16xf32>
      %132 = vector.shape_cast %131 : vector<16xf32> to vector<16x1xf32>
      %133 = vector.broadcast %132 : vector<16x1xf32> to vector<16x128xf32>
      %134 = arith.subf %130, %133 : vector<16x128xf32>
      %135 = math.exp %134 : vector<16x128xf32>
      %cst_71 = arith.constant dense<0.000000e+00> : vector<16xf32>
      %136 = vector.multi_reduction <add>, %135, %cst_71 [1] : vector<16x128xf32> to vector<16xf32>
      %137 = vector.shape_cast %136 : vector<16xf32> to vector<16x1xf32>
      %138 = tpu.reciprocal %137 {approx = true} : vector<16x1xf32> -> vector<16x1xf32>
      %139 = vector.broadcast %138 : vector<16x1xf32> to vector<16x128xf32>
      %140 = arith.mulf %135, %139 : vector<16x128xf32>
      %141 = vector.broadcast %4 : vector<1x32xf32> to vector<128x32xf32>
      %142 = arith.mulf %120, %141 : vector<128x32xf32>
      %cst_72 = arith.constant dense<0.000000e+00> : vector<16x32xf32>
      %143 = tpu.matmul %140, %142, %cst_72 {dimension_numbers = #tpu.dot_dimension_numbers<[1], [0], [0], [1], [0, 0, 1, 1], [], []>} : vector<16x128xf32>, vector<128x32xf32>, vector<16x32xf32> -> vector<16x32xf32>
      %144 = arith.addf %126, %143 : vector<16x32xf32>
      %145 = vector.broadcast %5 : vector<1x32xf32> to vector<16x32xf32>
      %146 = arith.mulf %125, %145 : vector<16x32xf32>
      %cst_73 = arith.constant dense<0.000000e+00> : vector<16x128xf32>
      %147 = tpu.matmul %146, %115, %cst_73 {dimension_numbers = #tpu.dot_dimension_numbers<[1], [1], [0], [0], [0, 0, 1, 0], [], []>} : vector<16x32xf32>, vector<128x32xf32>, vector<16x128xf32> -> vector<16x128xf32>
      %148 = arith.addf %147, %123 : vector<16x128xf32>
      %cst_74 = arith.constant dense<0xFF800000> : vector<16xf32>
      %149 = vector.multi_reduction <maximumf>, %148, %cst_74 [1] : vector<16x128xf32> to vector<16xf32>
      %150 = vector.shape_cast %149 : vector<16xf32> to vector<16x1xf32>
      %151 = vector.broadcast %150 : vector<16x1xf32> to vector<16x128xf32>
      %152 = arith.subf %148, %151 : vector<16x128xf32>
      %153 = math.exp %152 : vector<16x128xf32>
      %cst_75 = arith.constant dense<0.000000e+00> : vector<16xf32>
      %154 = vector.multi_reduction <add>, %153, %cst_75 [1] : vector<16x128xf32> to vector<16xf32>
      %155 = vector.shape_cast %154 : vector<16xf32> to vector<16x1xf32>
      %156 = tpu.reciprocal %155 {approx = true} : vector<16x1xf32> -> vector<16x1xf32>
      %157 = vector.broadcast %156 : vector<16x1xf32> to vector<16x128xf32>
      %158 = arith.mulf %153, %157 : vector<16x128xf32>
      %159 = vector.broadcast %5 : vector<1x32xf32> to vector<128x32xf32>
      %160 = arith.mulf %120, %159 : vector<128x32xf32>
      %cst_76 = arith.constant dense<0.000000e+00> : vector<16x32xf32>
      %161 = tpu.matmul %158, %160, %cst_76 {dimension_numbers = #tpu.dot_dimension_numbers<[1], [0], [0], [1], [0, 0, 1, 1], [], []>} : vector<16x128xf32>, vector<128x32xf32>, vector<16x32xf32> -> vector<16x32xf32>
      %162 = arith.addf %144, %161 : vector<16x32xf32>
      %163 = vector.broadcast %6 : vector<1x32xf32> to vector<16x32xf32>
      %164 = arith.mulf %125, %163 : vector<16x32xf32>
      %cst_77 = arith.constant dense<0.000000e+00> : vector<16x128xf32>
      %165 = tpu.matmul %164, %115, %cst_77 {dimension_numbers = #tpu.dot_dimension_numbers<[1], [1], [0], [0], [0, 0, 1, 0], [], []>} : vector<16x32xf32>, vector<128x32xf32>, vector<16x128xf32> -> vector<16x128xf32>
      %166 = arith.addf %165, %123 : vector<16x128xf32>
      %cst_78 = arith.constant dense<0xFF800000> : vector<16xf32>
      %167 = vector.multi_reduction <maximumf>, %166, %cst_78 [1] : vector<16x128xf32> to vector<16xf32>
      %168 = vector.shape_cast %167 : vector<16xf32> to vector<16x1xf32>
      %169 = vector.broadcast %168 : vector<16x1xf32> to vector<16x128xf32>
      %170 = arith.subf %166, %169 : vector<16x128xf32>
      %171 = math.exp %170 : vector<16x128xf32>
      %cst_79 = arith.constant dense<0.000000e+00> : vector<16xf32>
      %172 = vector.multi_reduction <add>, %171, %cst_79 [1] : vector<16x128xf32> to vector<16xf32>
      %173 = vector.shape_cast %172 : vector<16xf32> to vector<16x1xf32>
      %174 = tpu.reciprocal %173 {approx = true} : vector<16x1xf32> -> vector<16x1xf32>
      %175 = vector.broadcast %174 : vector<16x1xf32> to vector<16x128xf32>
      %176 = arith.mulf %171, %175 : vector<16x128xf32>
      %177 = vector.broadcast %6 : vector<1x32xf32> to vector<128x32xf32>
      %178 = arith.mulf %120, %177 : vector<128x32xf32>
      %cst_80 = arith.constant dense<0.000000e+00> : vector<16x32xf32>
      %179 = tpu.matmul %176, %178, %cst_80 {dimension_numbers = #tpu.dot_dimension_numbers<[1], [0], [0], [1], [0, 0, 1, 1], [], []>} : vector<16x128xf32>, vector<128x32xf32>, vector<16x32xf32> -> vector<16x32xf32>
      %180 = arith.addf %162, %179 : vector<16x32xf32>
      %181 = vector.broadcast %7 : vector<1x32xf32> to vector<16x32xf32>
      %182 = arith.mulf %125, %181 : vector<16x32xf32>
      %cst_81 = arith.constant dense<0.000000e+00> : vector<16x128xf32>
      %183 = tpu.matmul %182, %115, %cst_81 {dimension_numbers = #tpu.dot_dimension_numbers<[1], [1], [0], [0], [0, 0, 1, 0], [], []>} : vector<16x32xf32>, vector<128x32xf32>, vector<16x128xf32> -> vector<16x128xf32>
      %184 = arith.addf %183, %123 : vector<16x128xf32>
      %cst_82 = arith.constant dense<0xFF800000> : vector<16xf32>
      %185 = vector.multi_reduction <maximumf>, %184, %cst_82 [1] : vector<16x128xf32> to vector<16xf32>
      %186 = vector.shape_cast %185 : vector<16xf32> to vector<16x1xf32>
      %187 = vector.broadcast %186 : vector<16x1xf32> to vector<16x128xf32>
      %188 = arith.subf %184, %187 : vector<16x128xf32>
      %189 = math.exp %188 : vector<16x128xf32>
      %cst_83 = arith.constant dense<0.000000e+00> : vector<16xf32>
      %190 = vector.multi_reduction <add>, %189, %cst_83 [1] : vector<16x128xf32> to vector<16xf32>
      %191 = vector.shape_cast %190 : vector<16xf32> to vector<16x1xf32>
      %192 = tpu.reciprocal %191 {approx = true} : vector<16x1xf32> -> vector<16x1xf32>
      %193 = vector.broadcast %192 : vector<16x1xf32> to vector<16x128xf32>
      %194 = arith.mulf %189, %193 : vector<16x128xf32>
      %195 = vector.broadcast %7 : vector<1x32xf32> to vector<128x32xf32>
      %196 = arith.mulf %120, %195 : vector<128x32xf32>
      %cst_84 = arith.constant dense<0.000000e+00> : vector<16x32xf32>
      %197 = tpu.matmul %194, %196, %cst_84 {dimension_numbers = #tpu.dot_dimension_numbers<[1], [0], [0], [1], [0, 0, 1, 1], [], []>} : vector<16x128xf32>, vector<128x32xf32>, vector<16x32xf32> -> vector<16x32xf32>
      %198 = arith.addf %180, %197 : vector<16x32xf32>
      %199 = vector.extract_strided_slice %92 {offsets = [96, 0], sizes = [32, 32], strides = [1, 1]} : vector<320x32xf32> to vector<32x32xf32>
      %cst_85 = arith.constant dense<0.000000e+00> : vector<16x32xf32>
      %200 = tpu.matmul %198, %199, %cst_85 {dimension_numbers = #tpu.dot_dimension_numbers<[1], [0], [0], [1], [0, 0, 1, 1], [], []>} : vector<16x32xf32>, vector<32x32xf32>, vector<16x32xf32> -> vector<16x32xf32>
      %201 = vector.extract_strided_slice %96 {offsets = [3, 0], sizes = [1, 32], strides = [1, 1]} : vector<16x32xf32> to vector<1x32xf32>
      %202 = vector.broadcast %201 : vector<1x32xf32> to vector<16x32xf32>
      %203 = arith.addf %200, %202 : vector<16x32xf32>
      %204 = arith.addf %97, %203 : vector<16x32xf32>
      %205 = vector.extract_strided_slice %96 {offsets = [4, 0], sizes = [1, 32], strides = [1, 1]} : vector<16x32xf32> to vector<1x32xf32>
      %206 = vector.extract_strided_slice %96 {offsets = [5, 0], sizes = [1, 32], strides = [1, 1]} : vector<16x32xf32> to vector<1x32xf32>
      %cst_86 = arith.constant dense<0.000000e+00> : vector<16xf32>
      %207 = vector.multi_reduction <add>, %204, %cst_86 [1] : vector<16x32xf32> to vector<16xf32>
      %208 = vector.shape_cast %207 : vector<16xf32> to vector<16x1xf32>
      %cst_87 = arith.constant 3.200000e+01 : f32
      %209 = vector.broadcast %cst_87 : f32 to vector<16x1xf32>
      %210 = arith.divf %208, %209 : vector<16x1xf32>
      %211 = vector.broadcast %210 : vector<16x1xf32> to vector<16x32xf32>
      %212 = arith.subf %204, %211 : vector<16x32xf32>
      %213 = arith.mulf %212, %212 : vector<16x32xf32>
      %cst_88 = arith.constant dense<0.000000e+00> : vector<16xf32>
      %214 = vector.multi_reduction <add>, %213, %cst_88 [1] : vector<16x32xf32> to vector<16xf32>
      %215 = vector.shape_cast %214 : vector<16xf32> to vector<16x1xf32>
      %cst_89 = arith.constant 3.200000e+01 : f32
      %216 = vector.broadcast %cst_89 : f32 to vector<16x1xf32>
      %217 = arith.divf %215, %216 : vector<16x1xf32>
      %218 = vector.broadcast %210 : vector<16x1xf32> to vector<16x32xf32>
      %219 = arith.subf %204, %218 : vector<16x32xf32>
      %cst_90 = arith.constant 9.99999974E-6 : f32
      %220 = vector.broadcast %cst_90 : f32 to vector<16x1xf32>
      %221 = arith.addf %217, %220 : vector<16x1xf32>
      %222 = math.rsqrt %221 : vector<16x1xf32>
      %223 = vector.broadcast %222 : vector<16x1xf32> to vector<16x32xf32>
      %224 = arith.mulf %219, %223 : vector<16x32xf32>
      %225 = vector.broadcast %205 : vector<1x32xf32> to vector<16x32xf32>
      %226 = arith.mulf %224, %225 : vector<16x32xf32>
      %227 = vector.broadcast %206 : vector<1x32xf32> to vector<16x32xf32>
      %228 = arith.addf %226, %227 : vector<16x32xf32>
      %229 = arith.addf %228, %98 : vector<16x32xf32>
      %230 = vector.extract_strided_slice %92 {offsets = [128, 0], sizes = [32, 32], strides = [1, 1]} : vector<320x32xf32> to vector<32x32xf32>
      %cst_91 = arith.constant dense<0.000000e+00> : vector<16x32xf32>
      %231 = tpu.matmul %229, %230, %cst_91 {dimension_numbers = #tpu.dot_dimension_numbers<[1], [0], [0], [1], [0, 0, 1, 1], [], []>} : vector<16x32xf32>, vector<32x32xf32>, vector<16x32xf32> -> vector<16x32xf32>
      %232 = vector.extract_strided_slice %96 {offsets = [6, 0], sizes = [1, 32], strides = [1, 1]} : vector<16x32xf32> to vector<1x32xf32>
      %233 = vector.broadcast %232 : vector<1x32xf32> to vector<16x32xf32>
      %234 = arith.addf %231, %233 : vector<16x32xf32>
      %235 = vector.extract_strided_slice %92 {offsets = [160, 0], sizes = [32, 32], strides = [1, 1]} : vector<320x32xf32> to vector<32x32xf32>
      %cst_92 = arith.constant dense<0.000000e+00> : vector<16x32xf32>
      %236 = tpu.matmul %229, %235, %cst_92 {dimension_numbers = #tpu.dot_dimension_numbers<[1], [0], [0], [1], [0, 0, 1, 1], [], []>} : vector<16x32xf32>, vector<32x32xf32>, vector<16x32xf32> -> vector<16x32xf32>
      %237 = vector.extract_strided_slice %96 {offsets = [7, 0], sizes = [1, 32], strides = [1, 1]} : vector<16x32xf32> to vector<1x32xf32>
      %238 = vector.broadcast %237 : vector<1x32xf32> to vector<16x32xf32>
      %239 = arith.addf %236, %238 : vector<16x32xf32>
      %240 = vector.extract_strided_slice %92 {offsets = [192, 0], sizes = [32, 32], strides = [1, 1]} : vector<320x32xf32> to vector<32x32xf32>
      %cst_93 = arith.constant dense<0.000000e+00> : vector<16x32xf32>
      %241 = tpu.matmul %228, %240, %cst_93 {dimension_numbers = #tpu.dot_dimension_numbers<[1], [0], [0], [1], [0, 0, 1, 1], [], []>} : vector<16x32xf32>, vector<32x32xf32>, vector<16x32xf32> -> vector<16x32xf32>
      %242 = vector.extract_strided_slice %96 {offsets = [8, 0], sizes = [1, 32], strides = [1, 1]} : vector<16x32xf32> to vector<1x32xf32>
      %243 = vector.broadcast %242 : vector<1x32xf32> to vector<16x32xf32>
      %244 = arith.addf %241, %243 : vector<16x32xf32>
      %c0_94 = arith.constant 0 : index
      %c0_95 = arith.constant 0 : index
      %245 = vector.load %arg6[%c0_94, %c0_95] : memref<16x16xf32, #tpu.memory_space<vmem>>, vector<16x16xf32>
      %cst_96 = arith.constant 0.353553385 : f32
      %246 = vector.broadcast %cst_96 : f32 to vector<16x32xf32>
      %247 = arith.mulf %234, %246 : vector<16x32xf32>
      %cst_97 = arith.constant 0.000000e+00 : f32
      %248 = vector.broadcast %cst_97 : f32 to vector<16x32xf32>
      %249 = vector.broadcast %4 : vector<1x32xf32> to vector<16x32xf32>
      %250 = arith.mulf %247, %249 : vector<16x32xf32>
      %cst_98 = arith.constant dense<0.000000e+00> : vector<16x16xf32>
      %251 = tpu.matmul %250, %239, %cst_98 {dimension_numbers = #tpu.dot_dimension_numbers<[1], [1], [0], [0], [0, 0, 1, 0], [], []>} : vector<16x32xf32>, vector<16x32xf32>, vector<16x16xf32> -> vector<16x16xf32>
      %252 = arith.addf %251, %245 : vector<16x16xf32>
      %cst_99 = arith.constant dense<0xFF800000> : vector<16xf32>
      %253 = vector.multi_reduction <maximumf>, %252, %cst_99 [1] : vector<16x16xf32> to vector<16xf32>
      %254 = vector.shape_cast %253 : vector<16xf32> to vector<16x1xf32>
      %255 = vector.broadcast %254 : vector<16x1xf32> to vector<16x16xf32>
      %256 = arith.subf %252, %255 : vector<16x16xf32>
      %257 = math.exp %256 : vector<16x16xf32>
      %cst_100 = arith.constant dense<0.000000e+00> : vector<16xf32>
      %258 = vector.multi_reduction <add>, %257, %cst_100 [1] : vector<16x16xf32> to vector<16xf32>
      %259 = vector.shape_cast %258 : vector<16xf32> to vector<16x1xf32>
      %260 = tpu.reciprocal %259 {approx = true} : vector<16x1xf32> -> vector<16x1xf32>
      %261 = vector.broadcast %260 : vector<16x1xf32> to vector<16x16xf32>
      %262 = arith.mulf %257, %261 : vector<16x16xf32>
      %263 = vector.broadcast %4 : vector<1x32xf32> to vector<16x32xf32>
      %264 = arith.mulf %244, %263 : vector<16x32xf32>
      %cst_101 = arith.constant dense<0.000000e+00> : vector<16x32xf32>
      %265 = tpu.matmul %262, %264, %cst_101 {dimension_numbers = #tpu.dot_dimension_numbers<[1], [0], [0], [1], [0, 0, 1, 1], [], []>} : vector<16x16xf32>, vector<16x32xf32>, vector<16x32xf32> -> vector<16x32xf32>
      %266 = arith.addf %248, %265 : vector<16x32xf32>
      %267 = vector.broadcast %5 : vector<1x32xf32> to vector<16x32xf32>
      %268 = arith.mulf %247, %267 : vector<16x32xf32>
      %cst_102 = arith.constant dense<0.000000e+00> : vector<16x16xf32>
      %269 = tpu.matmul %268, %239, %cst_102 {dimension_numbers = #tpu.dot_dimension_numbers<[1], [1], [0], [0], [0, 0, 1, 0], [], []>} : vector<16x32xf32>, vector<16x32xf32>, vector<16x16xf32> -> vector<16x16xf32>
      %270 = arith.addf %269, %245 : vector<16x16xf32>
      %cst_103 = arith.constant dense<0xFF800000> : vector<16xf32>
      %271 = vector.multi_reduction <maximumf>, %270, %cst_103 [1] : vector<16x16xf32> to vector<16xf32>
      %272 = vector.shape_cast %271 : vector<16xf32> to vector<16x1xf32>
      %273 = vector.broadcast %272 : vector<16x1xf32> to vector<16x16xf32>
      %274 = arith.subf %270, %273 : vector<16x16xf32>
      %275 = math.exp %274 : vector<16x16xf32>
      %cst_104 = arith.constant dense<0.000000e+00> : vector<16xf32>
      %276 = vector.multi_reduction <add>, %275, %cst_104 [1] : vector<16x16xf32> to vector<16xf32>
      %277 = vector.shape_cast %276 : vector<16xf32> to vector<16x1xf32>
      %278 = tpu.reciprocal %277 {approx = true} : vector<16x1xf32> -> vector<16x1xf32>
      %279 = vector.broadcast %278 : vector<16x1xf32> to vector<16x16xf32>
      %280 = arith.mulf %275, %279 : vector<16x16xf32>
      %281 = vector.broadcast %5 : vector<1x32xf32> to vector<16x32xf32>
      %282 = arith.mulf %244, %281 : vector<16x32xf32>
      %cst_105 = arith.constant dense<0.000000e+00> : vector<16x32xf32>
      %283 = tpu.matmul %280, %282, %cst_105 {dimension_numbers = #tpu.dot_dimension_numbers<[1], [0], [0], [1], [0, 0, 1, 1], [], []>} : vector<16x16xf32>, vector<16x32xf32>, vector<16x32xf32> -> vector<16x32xf32>
      %284 = arith.addf %266, %283 : vector<16x32xf32>
      %285 = vector.broadcast %6 : vector<1x32xf32> to vector<16x32xf32>
      %286 = arith.mulf %247, %285 : vector<16x32xf32>
      %cst_106 = arith.constant dense<0.000000e+00> : vector<16x16xf32>
      %287 = tpu.matmul %286, %239, %cst_106 {dimension_numbers = #tpu.dot_dimension_numbers<[1], [1], [0], [0], [0, 0, 1, 0], [], []>} : vector<16x32xf32>, vector<16x32xf32>, vector<16x16xf32> -> vector<16x16xf32>
      %288 = arith.addf %287, %245 : vector<16x16xf32>
      %cst_107 = arith.constant dense<0xFF800000> : vector<16xf32>
      %289 = vector.multi_reduction <maximumf>, %288, %cst_107 [1] : vector<16x16xf32> to vector<16xf32>
      %290 = vector.shape_cast %289 : vector<16xf32> to vector<16x1xf32>
      %291 = vector.broadcast %290 : vector<16x1xf32> to vector<16x16xf32>
      %292 = arith.subf %288, %291 : vector<16x16xf32>
      %293 = math.exp %292 : vector<16x16xf32>
      %cst_108 = arith.constant dense<0.000000e+00> : vector<16xf32>
      %294 = vector.multi_reduction <add>, %293, %cst_108 [1] : vector<16x16xf32> to vector<16xf32>
      %295 = vector.shape_cast %294 : vector<16xf32> to vector<16x1xf32>
      %296 = tpu.reciprocal %295 {approx = true} : vector<16x1xf32> -> vector<16x1xf32>
      %297 = vector.broadcast %296 : vector<16x1xf32> to vector<16x16xf32>
      %298 = arith.mulf %293, %297 : vector<16x16xf32>
      %299 = vector.broadcast %6 : vector<1x32xf32> to vector<16x32xf32>
      %300 = arith.mulf %244, %299 : vector<16x32xf32>
      %cst_109 = arith.constant dense<0.000000e+00> : vector<16x32xf32>
      %301 = tpu.matmul %298, %300, %cst_109 {dimension_numbers = #tpu.dot_dimension_numbers<[1], [0], [0], [1], [0, 0, 1, 1], [], []>} : vector<16x16xf32>, vector<16x32xf32>, vector<16x32xf32> -> vector<16x32xf32>
      %302 = arith.addf %284, %301 : vector<16x32xf32>
      %303 = vector.broadcast %7 : vector<1x32xf32> to vector<16x32xf32>
      %304 = arith.mulf %247, %303 : vector<16x32xf32>
      %cst_110 = arith.constant dense<0.000000e+00> : vector<16x16xf32>
      %305 = tpu.matmul %304, %239, %cst_110 {dimension_numbers = #tpu.dot_dimension_numbers<[1], [1], [0], [0], [0, 0, 1, 0], [], []>} : vector<16x32xf32>, vector<16x32xf32>, vector<16x16xf32> -> vector<16x16xf32>
      %306 = arith.addf %305, %245 : vector<16x16xf32>
      %cst_111 = arith.constant dense<0xFF800000> : vector<16xf32>
      %307 = vector.multi_reduction <maximumf>, %306, %cst_111 [1] : vector<16x16xf32> to vector<16xf32>
      %308 = vector.shape_cast %307 : vector<16xf32> to vector<16x1xf32>
      %309 = vector.broadcast %308 : vector<16x1xf32> to vector<16x16xf32>
      %310 = arith.subf %306, %309 : vector<16x16xf32>
      %311 = math.exp %310 : vector<16x16xf32>
      %cst_112 = arith.constant dense<0.000000e+00> : vector<16xf32>
      %312 = vector.multi_reduction <add>, %311, %cst_112 [1] : vector<16x16xf32> to vector<16xf32>
      %313 = vector.shape_cast %312 : vector<16xf32> to vector<16x1xf32>
      %314 = tpu.reciprocal %313 {approx = true} : vector<16x1xf32> -> vector<16x1xf32>
      %315 = vector.broadcast %314 : vector<16x1xf32> to vector<16x16xf32>
      %316 = arith.mulf %311, %315 : vector<16x16xf32>
      %317 = vector.broadcast %7 : vector<1x32xf32> to vector<16x32xf32>
      %318 = arith.mulf %244, %317 : vector<16x32xf32>
      %cst_113 = arith.constant dense<0.000000e+00> : vector<16x32xf32>
      %319 = tpu.matmul %316, %318, %cst_113 {dimension_numbers = #tpu.dot_dimension_numbers<[1], [0], [0], [1], [0, 0, 1, 1], [], []>} : vector<16x16xf32>, vector<16x32xf32>, vector<16x32xf32> -> vector<16x32xf32>
      %320 = arith.addf %302, %319 : vector<16x32xf32>
      %321 = vector.extract_strided_slice %92 {offsets = [224, 0], sizes = [32, 32], strides = [1, 1]} : vector<320x32xf32> to vector<32x32xf32>
      %cst_114 = arith.constant dense<0.000000e+00> : vector<16x32xf32>
      %322 = tpu.matmul %320, %321, %cst_114 {dimension_numbers = #tpu.dot_dimension_numbers<[1], [0], [0], [1], [0, 0, 1, 1], [], []>} : vector<16x32xf32>, vector<32x32xf32>, vector<16x32xf32> -> vector<16x32xf32>
      %323 = vector.extract_strided_slice %96 {offsets = [9, 0], sizes = [1, 32], strides = [1, 1]} : vector<16x32xf32> to vector<1x32xf32>
      %324 = vector.broadcast %323 : vector<1x32xf32> to vector<16x32xf32>
      %325 = arith.addf %322, %324 : vector<16x32xf32>
      %326 = arith.addf %228, %325 : vector<16x32xf32>
      %327 = vector.extract_strided_slice %96 {offsets = [10, 0], sizes = [1, 32], strides = [1, 1]} : vector<16x32xf32> to vector<1x32xf32>
      %328 = vector.extract_strided_slice %96 {offsets = [11, 0], sizes = [1, 32], strides = [1, 1]} : vector<16x32xf32> to vector<1x32xf32>
      %cst_115 = arith.constant dense<0.000000e+00> : vector<16xf32>
      %329 = vector.multi_reduction <add>, %326, %cst_115 [1] : vector<16x32xf32> to vector<16xf32>
      %330 = vector.shape_cast %329 : vector<16xf32> to vector<16x1xf32>
      %cst_116 = arith.constant 3.200000e+01 : f32
      %331 = vector.broadcast %cst_116 : f32 to vector<16x1xf32>
      %332 = arith.divf %330, %331 : vector<16x1xf32>
      %333 = vector.broadcast %332 : vector<16x1xf32> to vector<16x32xf32>
      %334 = arith.subf %326, %333 : vector<16x32xf32>
      %335 = arith.mulf %334, %334 : vector<16x32xf32>
      %cst_117 = arith.constant dense<0.000000e+00> : vector<16xf32>
      %336 = vector.multi_reduction <add>, %335, %cst_117 [1] : vector<16x32xf32> to vector<16xf32>
      %337 = vector.shape_cast %336 : vector<16xf32> to vector<16x1xf32>
      %cst_118 = arith.constant 3.200000e+01 : f32
      %338 = vector.broadcast %cst_118 : f32 to vector<16x1xf32>
      %339 = arith.divf %337, %338 : vector<16x1xf32>
      %340 = vector.broadcast %332 : vector<16x1xf32> to vector<16x32xf32>
      %341 = arith.subf %326, %340 : vector<16x32xf32>
      %cst_119 = arith.constant 9.99999974E-6 : f32
      %342 = vector.broadcast %cst_119 : f32 to vector<16x1xf32>
      %343 = arith.addf %339, %342 : vector<16x1xf32>
      %344 = math.rsqrt %343 : vector<16x1xf32>
      %345 = vector.broadcast %344 : vector<16x1xf32> to vector<16x32xf32>
      %346 = arith.mulf %341, %345 : vector<16x32xf32>
      %347 = vector.broadcast %327 : vector<1x32xf32> to vector<16x32xf32>
      %348 = arith.mulf %346, %347 : vector<16x32xf32>
      %349 = vector.broadcast %328 : vector<1x32xf32> to vector<16x32xf32>
      %350 = arith.addf %348, %349 : vector<16x32xf32>
      %351 = vector.extract_strided_slice %94 {offsets = [0, 0], sizes = [32, 64], strides = [1, 1]} : vector<40x64xf32> to vector<32x64xf32>
      %cst_120 = arith.constant dense<0.000000e+00> : vector<16x64xf32>
      %352 = tpu.matmul %350, %351, %cst_120 {dimension_numbers = #tpu.dot_dimension_numbers<[1], [0], [0], [1], [0, 0, 1, 1], [], []>} : vector<16x32xf32>, vector<32x64xf32>, vector<16x64xf32> -> vector<16x64xf32>
      %353 = vector.extract_strided_slice %94 {offsets = [32, 0], sizes = [1, 64], strides = [1, 1]} : vector<40x64xf32> to vector<1x64xf32>
      %354 = vector.broadcast %353 : vector<1x64xf32> to vector<16x64xf32>
      %355 = arith.addf %352, %354 : vector<16x64xf32>
      %cst_121 = arith.constant 0.000000e+00 : f32
      %356 = vector.broadcast %cst_121 : f32 to vector<16x64xf32>
      %357 = arith.maximumf %355, %356 : vector<16x64xf32>
      %358 = vector.extract_strided_slice %92 {offsets = [256, 0], sizes = [64, 32], strides = [1, 1]} : vector<320x32xf32> to vector<64x32xf32>
      %cst_122 = arith.constant dense<0.000000e+00> : vector<16x32xf32>
      %359 = tpu.matmul %357, %358, %cst_122 {dimension_numbers = #tpu.dot_dimension_numbers<[1], [0], [0], [1], [0, 0, 1, 1], [], []>} : vector<16x64xf32>, vector<64x32xf32>, vector<16x32xf32> -> vector<16x32xf32>
      %360 = vector.extract_strided_slice %96 {offsets = [12, 0], sizes = [1, 32], strides = [1, 1]} : vector<16x32xf32> to vector<1x32xf32>
      %361 = vector.broadcast %360 : vector<1x32xf32> to vector<16x32xf32>
      %362 = arith.addf %359, %361 : vector<16x32xf32>
      %363 = arith.addf %350, %362 : vector<16x32xf32>
      %364 = vector.extract_strided_slice %96 {offsets = [13, 0], sizes = [1, 32], strides = [1, 1]} : vector<16x32xf32> to vector<1x32xf32>
      %365 = vector.extract_strided_slice %96 {offsets = [14, 0], sizes = [1, 32], strides = [1, 1]} : vector<16x32xf32> to vector<1x32xf32>
      %cst_123 = arith.constant dense<0.000000e+00> : vector<16xf32>
      %366 = vector.multi_reduction <add>, %363, %cst_123 [1] : vector<16x32xf32> to vector<16xf32>
      %367 = vector.shape_cast %366 : vector<16xf32> to vector<16x1xf32>
      %cst_124 = arith.constant 3.200000e+01 : f32
      %368 = vector.broadcast %cst_124 : f32 to vector<16x1xf32>
      %369 = arith.divf %367, %368 : vector<16x1xf32>
      %370 = vector.broadcast %369 : vector<16x1xf32> to vector<16x32xf32>
      %371 = arith.subf %363, %370 : vector<16x32xf32>
      %372 = arith.mulf %371, %371 : vector<16x32xf32>
      %cst_125 = arith.constant dense<0.000000e+00> : vector<16xf32>
      %373 = vector.multi_reduction <add>, %372, %cst_125 [1] : vector<16x32xf32> to vector<16xf32>
      %374 = vector.shape_cast %373 : vector<16xf32> to vector<16x1xf32>
      %cst_126 = arith.constant 3.200000e+01 : f32
      %375 = vector.broadcast %cst_126 : f32 to vector<16x1xf32>
      %376 = arith.divf %374, %375 : vector<16x1xf32>
      %377 = vector.broadcast %369 : vector<16x1xf32> to vector<16x32xf32>
      %378 = arith.subf %363, %377 : vector<16x32xf32>
      %cst_127 = arith.constant 9.99999974E-6 : f32
      %379 = vector.broadcast %cst_127 : f32 to vector<16x1xf32>
      %380 = arith.addf %376, %379 : vector<16x1xf32>
      %381 = math.rsqrt %380 : vector<16x1xf32>
      %382 = vector.broadcast %381 : vector<16x1xf32> to vector<16x32xf32>
      %383 = arith.mulf %378, %382 : vector<16x32xf32>
      %384 = vector.broadcast %364 : vector<1x32xf32> to vector<16x32xf32>
      %385 = arith.mulf %383, %384 : vector<16x32xf32>
      %386 = vector.broadcast %365 : vector<1x32xf32> to vector<16x32xf32>
      %387 = arith.addf %385, %386 : vector<16x32xf32>
      %c0_128 = arith.constant 0 : index
      %c0_129 = arith.constant 0 : index
      %388 = vector.load %arg17[%c0_128, %c0_129] : memref<16x32xf32, #tpu.memory_space<vmem>>, vector<16x32xf32>
      tpu.vector_store %arg17[%c0_128, %c0_129], %387 {strides = array<i32>} : memref<16x32xf32, #tpu.memory_space<vmem>>, vector<16x32xf32>,
    } else {
    }
    %c0_4 = arith.constant 0 : index
    %c0_5 = arith.constant 0 : index
    %11 = vector.load %arg17[%c0_4, %c0_5] : memref<16x32xf32, #tpu.memory_space<vmem>>, vector<16x32xf32>
    %c0_6 = arith.constant 0 : index
    %c0_7 = arith.constant 0 : index
    %12 = vector.load %arg13[%c0_6, %c0_7] : memref<8x32xf32, #tpu.memory_space<vmem>>, vector<8x32xf32>
    %13 = vector.extract_strided_slice %12 {offsets = [0, 0], sizes = [1, 32], strides = [1, 1]} : vector<8x32xf32> to vector<1x32xf32>
    %14 = vector.extract_strided_slice %12 {offsets = [1, 0], sizes = [1, 32], strides = [1, 1]} : vector<8x32xf32> to vector<1x32xf32>
    %cst = arith.constant dense<0.000000e+00> : vector<16xf32>
    %15 = vector.multi_reduction <add>, %11, %cst [1] : vector<16x32xf32> to vector<16xf32>
    %16 = vector.shape_cast %15 : vector<16xf32> to vector<16x1xf32>
    %cst_8 = arith.constant 3.200000e+01 : f32
    %17 = vector.broadcast %cst_8 : f32 to vector<16x1xf32>
    %18 = arith.divf %16, %17 : vector<16x1xf32>
    %19 = vector.broadcast %18 : vector<16x1xf32> to vector<16x32xf32>
    %20 = arith.subf %11, %19 : vector<16x32xf32>
    %21 = arith.mulf %20, %20 : vector<16x32xf32>
    %cst_9 = arith.constant dense<0.000000e+00> : vector<16xf32>
    %22 = vector.multi_reduction <add>, %21, %cst_9 [1] : vector<16x32xf32> to vector<16xf32>
    %23 = vector.shape_cast %22 : vector<16xf32> to vector<16x1xf32>
    %cst_10 = arith.constant 3.200000e+01 : f32
    %24 = vector.broadcast %cst_10 : f32 to vector<16x1xf32>
    %25 = arith.divf %23, %24 : vector<16x1xf32>
    %26 = vector.broadcast %18 : vector<16x1xf32> to vector<16x32xf32>
    %27 = arith.subf %11, %26 : vector<16x32xf32>
    %cst_11 = arith.constant 9.99999974E-6 : f32
    %28 = vector.broadcast %cst_11 : f32 to vector<16x1xf32>
    %29 = arith.addf %25, %28 : vector<16x1xf32>
    %30 = math.rsqrt %29 : vector<16x1xf32>
    %31 = vector.broadcast %30 : vector<16x1xf32> to vector<16x32xf32>
    %32 = arith.mulf %27, %31 : vector<16x32xf32>
    %33 = vector.broadcast %13 : vector<1x32xf32> to vector<16x32xf32>
    %34 = arith.mulf %32, %33 : vector<16x32xf32>
    %35 = vector.broadcast %14 : vector<1x32xf32> to vector<16x32xf32>
    %36 = arith.addf %34, %35 : vector<16x32xf32>
    %c0_12 = arith.constant 0 : index
    %c0_13 = arith.constant 0 : index
    %37 = vector.load %arg12[%c0_12, %c0_13] : memref<40x128xf32, #tpu.memory_space<vmem>>, vector<40x128xf32>
    %38 = vector.extract_strided_slice %37 {offsets = [0, 0], sizes = [32, 128], strides = [1, 1]} : vector<40x128xf32> to vector<32x128xf32>
    %cst_14 = arith.constant dense<0.000000e+00> : vector<16x128xf32>
    %39 = tpu.matmul %36, %38, %cst_14 {dimension_numbers = #tpu.dot_dimension_numbers<[1], [0], [0], [1], [0, 0, 1, 1], [], []>} : vector<16x32xf32>, vector<32x128xf32>, vector<16x128xf32> -> vector<16x128xf32>
    %40 = vector.extract_strided_slice %37 {offsets = [32, 0], sizes = [1, 128], strides = [1, 1]} : vector<40x128xf32> to vector<1x128xf32>
    %41 = vector.broadcast %40 : vector<1x128xf32> to vector<16x128xf32>
    %42 = arith.addf %39, %41 : vector<16x128xf32>
    %c0_15 = arith.constant 0 : index
    %c0_16 = arith.constant 0 : index
    %c0_17 = arith.constant 0 : index
    %43 = vector.load %arg15[%c0_15, %c0_16, %c0_17] : memref<1x16x128xf32, #tpu.memory_space<vmem>>, vector<1x16x128xf32>
    %44 = vector.shape_cast %43 : vector<1x16x128xf32> to vector<16x128xf32>
    %45 = vector.shape_cast %42 : vector<16x128xf32> to vector<1x16x128xf32>
    tpu.vector_store %arg15[%c0_15, %c0_16, %c0_17], %45 {strides = array<i32>} : memref<1x16x128xf32, #tpu.memory_space<vmem>>, vector<1x16x128xf32>,
    %c0_18 = arith.constant 0 : index
    %c0_19 = arith.constant 0 : index
    %46 = vector.load %arg11[%c0_18, %c0_19] : memref<96x32xf32, #tpu.memory_space<vmem>>, vector<96x32xf32>
    %47 = vector.extract_strided_slice %46 {offsets = [0, 0], sizes = [32, 32], strides = [1, 1]} : vector<96x32xf32> to vector<32x32xf32>
    %cst_20 = arith.constant dense<0.000000e+00> : vector<16x32xf32>
    %48 = tpu.matmul %36, %47, %cst_20 {dimension_numbers = #tpu.dot_dimension_numbers<[1], [0], [0], [1], [0, 0, 1, 1], [], []>} : vector<16x32xf32>, vector<32x32xf32>, vector<16x32xf32> -> vector<16x32xf32>
    %49 = vector.extract_strided_slice %12 {offsets = [2, 0], sizes = [1, 32], strides = [1, 1]} : vector<8x32xf32> to vector<1x32xf32>
    %50 = vector.broadcast %49 : vector<1x32xf32> to vector<16x32xf32>
    %51 = arith.addf %48, %50 : vector<16x32xf32>
    %cst_21 = arith.constant 0.000000e+00 : f32
    %52 = vector.broadcast %cst_21 : f32 to vector<16x32xf32>
    %53 = arith.maximumf %51, %52 : vector<16x32xf32>
    %54 = vector.extract_strided_slice %46 {offsets = [32, 0], sizes = [32, 32], strides = [1, 1]} : vector<96x32xf32> to vector<32x32xf32>
    %cst_22 = arith.constant dense<0.000000e+00> : vector<16x32xf32>
    %55 = tpu.matmul %53, %54, %cst_22 {dimension_numbers = #tpu.dot_dimension_numbers<[1], [0], [0], [1], [0, 0, 1, 1], [], []>} : vector<16x32xf32>, vector<32x32xf32>, vector<16x32xf32> -> vector<16x32xf32>
    %56 = vector.extract_strided_slice %12 {offsets = [3, 0], sizes = [1, 32], strides = [1, 1]} : vector<8x32xf32> to vector<1x32xf32>
    %57 = vector.broadcast %56 : vector<1x32xf32> to vector<16x32xf32>
    %58 = arith.addf %55, %57 : vector<16x32xf32>
    %cst_23 = arith.constant 0.000000e+00 : f32
    %59 = vector.broadcast %cst_23 : f32 to vector<16x32xf32>
    %60 = arith.maximumf %58, %59 : vector<16x32xf32>
    %61 = vector.extract_strided_slice %46 {offsets = [64, 0], sizes = [32, 32], strides = [1, 1]} : vector<96x32xf32> to vector<32x32xf32>
    %cst_24 = arith.constant dense<0.000000e+00> : vector<16x32xf32>
    %62 = tpu.matmul %60, %61, %cst_24 {dimension_numbers = #tpu.dot_dimension_numbers<[1], [0], [0], [1], [0, 0, 1, 1], [], []>} : vector<16x32xf32>, vector<32x32xf32>, vector<16x32xf32> -> vector<16x32xf32>
    %63 = vector.extract_strided_slice %12 {offsets = [4, 0], sizes = [1, 32], strides = [1, 1]} : vector<8x32xf32> to vector<1x32xf32>
    %64 = vector.broadcast %63 : vector<1x32xf32> to vector<16x32xf32>
    %65 = arith.addf %62, %64 : vector<16x32xf32>
    %66 = vector.extract_strided_slice %65 {offsets = [0, 0], sizes = [8, 32], strides = [1, 1]} : vector<16x32xf32> to vector<8x32xf32>
    %c0_25 = arith.constant 0 : index
    %c0_26 = arith.constant 0 : index
    %c0_27 = arith.constant 0 : index
    %67 = vector.load %arg14[%c0_25, %c0_26, %c0_27] : memref<2x32x256xf32, #tpu.memory_space<vmem>>, vector<1x32x256xf32>
    %68 = vector.shape_cast %67 : vector<1x32x256xf32> to vector<32x256xf32>
    %cst_28 = arith.constant dense<0.000000e+00> : vector<8x256xf32>
    %69 = tpu.matmul %66, %68, %cst_28 {dimension_numbers = #tpu.dot_dimension_numbers<[1], [0], [0], [1], [0, 0, 1, 1], [], []>} : vector<8x32xf32>, vector<32x256xf32>, vector<8x256xf32> -> vector<8x256xf32>
    %c0_29 = arith.constant 0 : index
    %c0_30 = arith.constant 0 : index
    %c0_31 = arith.constant 0 : index
    %c0_32 = arith.constant 0 : index
    %70 = vector.load %arg16[%c0_29, %c0_30, %c0_31, %c0_32] : memref<1x2x8x256xf32, #tpu.memory_space<vmem>>, vector<1x1x8x256xf32>
    %71 = vector.shape_cast %70 : vector<1x1x8x256xf32> to vector<8x256xf32>
    %72 = vector.shape_cast %69 : vector<8x256xf32> to vector<1x1x8x256xf32>
    tpu.vector_store %arg16[%c0_29, %c0_30, %c0_31, %c0_32], %72 {strides = array<i32>} : memref<1x2x8x256xf32, #tpu.memory_space<vmem>>, vector<1x1x8x256xf32>,
    %73 = vector.extract_strided_slice %65 {offsets = [8, 0], sizes = [8, 32], strides = [1, 1]} : vector<16x32xf32> to vector<8x32xf32>
    %c1 = arith.constant 1 : index
    %c0_33 = arith.constant 0 : index
    %c0_34 = arith.constant 0 : index
    %74 = vector.load %arg14[%c1, %c0_33, %c0_34] : memref<2x32x256xf32, #tpu.memory_space<vmem>>, vector<1x32x256xf32>
    %75 = vector.shape_cast %74 : vector<1x32x256xf32> to vector<32x256xf32>
    %cst_35 = arith.constant dense<0.000000e+00> : vector<8x256xf32>
    %76 = tpu.matmul %73, %75, %cst_35 {dimension_numbers = #tpu.dot_dimension_numbers<[1], [0], [0], [1], [0, 0, 1, 1], [], []>} : vector<8x32xf32>, vector<32x256xf32>, vector<8x256xf32> -> vector<8x256xf32>
    %c0_36 = arith.constant 0 : index
    %c1_37 = arith.constant 1 : index
    %c0_38 = arith.constant 0 : index
    %c0_39 = arith.constant 0 : index
    %77 = vector.load %arg16[%c0_36, %c1_37, %c0_38, %c0_39] : memref<1x2x8x256xf32, #tpu.memory_space<vmem>>, vector<1x1x8x256xf32>
    %78 = vector.shape_cast %77 : vector<1x1x8x256xf32> to vector<8x256xf32>
    %79 = vector.shape_cast %76 : vector<8x256xf32> to vector<1x1x8x256xf32>
    tpu.vector_store %arg16[%c0_36, %c1_37, %c0_38, %c0_39], %79 {strides = array<i32>} : memref<1x2x8x256xf32, #tpu.memory_space<vmem>>, vector<1x1x8x256xf32>,
    return
  }
  func.func @transform_0(%arg0: i32) -> (i32, i32) {
    %c0_i32 = arith.constant 0 : i32
    %c0_i32_0 = arith.constant 0 : i32
    %c0_i32_1 = arith.constant 0 : i32
    return %c0_i32, %c0_i32_0 : i32, i32
  }
  func.func @transform_1(%arg0: i32) -> (i32, i32) {
    %c0_i32 = arith.constant 0 : i32
    %c0_i32_0 = arith.constant 0 : i32
    %c0_i32_1 = arith.constant 0 : i32
    return %c0_i32, %c0_i32_0 : i32, i32
  }
  func.func @transform_2(%arg0: i32) -> (i32, i32, i32) {
    %c0_i32 = arith.constant 0 : i32
    %c0_i32_0 = arith.constant 0 : i32
    %c0_i32_1 = arith.constant 0 : i32
    %c0_i32_2 = arith.constant 0 : i32
    return %c0_i32, %c0_i32_0, %c0_i32_1 : i32, i32, i32
  }
  func.func @transform_3(%arg0: i32) -> (i32, i32, i32) {
    %c0_i32 = arith.constant 0 : i32
    %c0_i32_0 = arith.constant 0 : i32
    %c0_i32_1 = arith.constant 0 : i32
    %c0_i32_2 = arith.constant 0 : i32
    return %c0_i32, %c0_i32_0, %c0_i32_1 : i32, i32, i32
  }
  func.func @transform_4(%arg0: i32) -> (i32, i32, i32) {
    %c0_i32 = arith.constant 0 : i32
    %c0_i32_0 = arith.constant 0 : i32
    %c0_i32_1 = arith.constant 0 : i32
    %c0_i32_2 = arith.constant 0 : i32
    return %c0_i32, %c0_i32_0, %c0_i32_1 : i32, i32, i32
  }
  func.func @transform_5(%arg0: i32) -> (i32, i32) {
    %c0_i32 = arith.constant 0 : i32
    %c0_i32_0 = arith.constant 0 : i32
    %c0_i32_1 = arith.constant 0 : i32
    return %c0_i32, %c0_i32_0 : i32, i32
  }
  func.func @transform_6(%arg0: i32) -> (i32, i32) {
    %c0_i32 = arith.constant 0 : i32
    %c0_i32_0 = arith.constant 0 : i32
    %c0_i32_1 = arith.constant 0 : i32
    return %c0_i32, %c0_i32_0 : i32, i32
  }
  func.func @transform_7(%arg0: i32) -> (i32, i32, i32) {
    %c3_i32 = arith.constant 3 : i32
    %0 = arith.addi %arg0, %c3_i32 : i32
    %c1_i32 = arith.constant 1 : i32
    %1 = arith.subi %0, %c1_i32 : i32
    %c3_i32_0 = arith.constant 3 : i32
    %c0_i32 = arith.constant 0 : i32
    %2 = arith.cmpi eq, %c3_i32_0, %c0_i32 : i32
    %c1_i32_1 = arith.constant 1 : i32
    %3 = arith.select %2, %c1_i32_1, %c3_i32_0 : i32
    %4 = arith.remsi %1, %3 : i32
    %c0_i32_2 = arith.constant 0 : i32
    %5 = arith.cmpi ne, %4, %c0_i32_2 : i32
    %c0_i32_3 = arith.constant 0 : i32
    %6 = arith.cmpi slt, %4, %c0_i32_3 : i32
    %c0_i32_4 = arith.constant 0 : i32
    %7 = arith.cmpi slt, %3, %c0_i32_4 : i32
    %8 = arith.xori %6, %7 : i1
    %9 = arith.andi %8, %5 : i1
    %10 = arith.addi %4, %3 : i32
    %11 = arith.select %9, %10, %4 : i32
    %c0_i32_5 = arith.constant 0 : i32
    %c0_i32_6 = arith.constant 0 : i32
    %c0_i32_7 = arith.constant 0 : i32
    return %11, %c0_i32_5, %c0_i32_6 : i32, i32, i32
  }
  func.func @transform_8(%arg0: i32) -> (i32, i32, i32) {
    %c3_i32 = arith.constant 3 : i32
    %0 = arith.addi %arg0, %c3_i32 : i32
    %c1_i32 = arith.constant 1 : i32
    %1 = arith.subi %0, %c1_i32 : i32
    %c3_i32_0 = arith.constant 3 : i32
    %c0_i32 = arith.constant 0 : i32
    %2 = arith.cmpi eq, %c3_i32_0, %c0_i32 : i32
    %c1_i32_1 = arith.constant 1 : i32
    %3 = arith.select %2, %c1_i32_1, %c3_i32_0 : i32
    %4 = arith.remsi %1, %3 : i32
    %c0_i32_2 = arith.constant 0 : i32
    %5 = arith.cmpi ne, %4, %c0_i32_2 : i32
    %c0_i32_3 = arith.constant 0 : i32
    %6 = arith.cmpi slt, %4, %c0_i32_3 : i32
    %c0_i32_4 = arith.constant 0 : i32
    %7 = arith.cmpi slt, %3, %c0_i32_4 : i32
    %8 = arith.xori %6, %7 : i1
    %9 = arith.andi %8, %5 : i1
    %10 = arith.addi %4, %3 : i32
    %11 = arith.select %9, %10, %4 : i32
    %c0_i32_5 = arith.constant 0 : i32
    %c0_i32_6 = arith.constant 0 : i32
    %c0_i32_7 = arith.constant 0 : i32
    return %11, %c0_i32_5, %c0_i32_6 : i32, i32, i32
  }
  func.func @transform_9(%arg0: i32) -> (i32, i32, i32) {
    %c3_i32 = arith.constant 3 : i32
    %0 = arith.addi %arg0, %c3_i32 : i32
    %c1_i32 = arith.constant 1 : i32
    %1 = arith.subi %0, %c1_i32 : i32
    %c3_i32_0 = arith.constant 3 : i32
    %c0_i32 = arith.constant 0 : i32
    %2 = arith.cmpi eq, %c3_i32_0, %c0_i32 : i32
    %c1_i32_1 = arith.constant 1 : i32
    %3 = arith.select %2, %c1_i32_1, %c3_i32_0 : i32
    %4 = arith.remsi %1, %3 : i32
    %c0_i32_2 = arith.constant 0 : i32
    %5 = arith.cmpi ne, %4, %c0_i32_2 : i32
    %c0_i32_3 = arith.constant 0 : i32
    %6 = arith.cmpi slt, %4, %c0_i32_3 : i32
    %c0_i32_4 = arith.constant 0 : i32
    %7 = arith.cmpi slt, %3, %c0_i32_4 : i32
    %8 = arith.xori %6, %7 : i1
    %9 = arith.andi %8, %5 : i1
    %10 = arith.addi %4, %3 : i32
    %11 = arith.select %9, %10, %4 : i32
    %c0_i32_5 = arith.constant 0 : i32
    %c0_i32_6 = arith.constant 0 : i32
    %c0_i32_7 = arith.constant 0 : i32
    return %11, %c0_i32_5, %c0_i32_6 : i32, i32, i32
  }
  func.func @transform_10(%arg0: i32) -> (i32, i32) {
    %c0_i32 = arith.constant 0 : i32
    %c0_i32_0 = arith.constant 0 : i32
    %c0_i32_1 = arith.constant 0 : i32
    return %c0_i32, %c0_i32_0 : i32, i32
  }
  func.func @transform_11(%arg0: i32) -> (i32, i32) {
    %c0_i32 = arith.constant 0 : i32
    %c0_i32_0 = arith.constant 0 : i32
    %c0_i32_1 = arith.constant 0 : i32
    return %c0_i32, %c0_i32_0 : i32, i32
  }
  func.func @transform_12(%arg0: i32) -> (i32, i32) {
    %c0_i32 = arith.constant 0 : i32
    %c0_i32_0 = arith.constant 0 : i32
    %c0_i32_1 = arith.constant 0 : i32
    return %c0_i32, %c0_i32_0 : i32, i32
  }
  func.func @transform_13(%arg0: i32) -> (i32, i32, i32) {
    %c0_i32 = arith.constant 0 : i32
    %c0_i32_0 = arith.constant 0 : i32
    %c0_i32_1 = arith.constant 0 : i32
    %c0_i32_2 = arith.constant 0 : i32
    return %c0_i32, %c0_i32_0, %c0_i32_1 : i32, i32, i32
  }
  func.func @transform_14(%arg0: i32) -> (i32, i32, i32) {
    %c0_i32 = arith.constant 0 : i32
    %c0_i32_0 = arith.constant 0 : i32
    %c0_i32_1 = arith.constant 0 : i32
    return %arg0, %c0_i32, %c0_i32_0 : i32, i32, i32
  }
  func.func @transform_15(%arg0: i32) -> (i32, i32, i32, i32) {
    %c0_i32 = arith.constant 0 : i32
    %c0_i32_0 = arith.constant 0 : i32
    %c0_i32_1 = arith.constant 0 : i32
    %c0_i32_2 = arith.constant 0 : i32
    return %arg0, %c0_i32, %c0_i32_0, %c0_i32_1 : i32, i32, i32, i32
  }
}

</mosaic_0001>

<bundles_post_ra>
// kernel: squeeze.11
= control target key start
LH: loop header
LB: loop body
LE: loop exit
PB: predicated region body
PF: predicated region fallthrough
CT: control target
= control target key end

     0   :  { %s357_s8 = smov 112   ;;  %s358_s11 = smov 96   ;;  %s474_s0 = inlined_call_operand.vmem [shape: f32[1,2,8,256], index: 0, kind: input, shape index: {}]   ;;  %s475_s1 = inlined_call_operand.hbm [shape: f32[2,8,16,16], index: 1, kind: output, shape index: {}]  }
   0x1   :  { %v42_v0 = vld.sshfl [vmem:[%s474_s0] sm:$0xff pattern:$0xb3a29180]   ;;  %v303_v1 = vld.sshfl [vmem:[%s474_s0 + $0x10] sm:$0xff pattern:$0xb3a29180]  }
   0x2   :  { %43 = vrot.lane.b32.xlu0 %v42_v0, %s357_s8  ;;  %78 = vrot.lane.b32.xlu2 %v42_v0, %s358_s11 }
   0x3   :  { %61 = vrot.lane.b32.xlu1 %v303_v1, %s357_s8 }
   0x4   :  { %2 = vsyncpa [#allocation1], 0  ;;  %v302_v2 = vld.sshfl [vmem:[%s474_s0 + $0x4] sm:$0xff pattern:$0xb3a29180]   ;;  %s359_s16 = smov 80  }
   0x5   :  { %v304_v3 = vld.sshfl [vmem:[%s474_s0 + $0x14] sm:$0xff pattern:$0xb3a29180]   ;;  %s360_s17 = smov 64   ;;  %s361_s18 = smov 48   ;;  %vm4_vm0 = vcmask 130048  }
   0x6   :  { %s362_s19 = smov 32   ;;  %s363_s20 = smov 16   ;;  %v3_v25 = vld [vmem:[%s474_s0] sm:$0xff]   ;;  %v299_v28 = vld [vmem:[%s474_s0 + $0x8] sm:$0xff]   ;;  %v300_v31 = vld [vmem:[%s474_s0 + $0x10] sm:$0xff]  }
   0x7   :  { %5 = vst.msk [vmem:[#allocation0] ss:$16 sm:$0x3] %vm4_vm0, %v3_v25   ;;  %v301_v34 = vld [vmem:[%s474_s0 + $0x18] sm:$0xff]   ;;  %s364_s0 = smov [#allocation0]   ;;  %s292_s1 = sshll.u32 %s475_s1, 4  ;;  %s293_s1 = int_to_ptr.hbm [resolvable:$true] %s292_s1 }
   0x8   :  { %6 = vst.msk [vmem:[#allocation0] ss:$16 sm:$0xc] %vm4_vm0, %v3_v25   ;;  %s290_s29 = sshll.u32 %s364_s0, 4  ;;  %s291_s29 = int_to_ptr.vmem [resolvable:$true] %s290_s29 }
   0x9   :  { %7 = vst.msk [vmem:[#allocation0] ss:$16 sm:$0x30] %vm4_vm0, %v3_v25  }
   0xa   :  { %52 = vrot.lane.b32.xlu0 %v302_v2, %s357_s8  ;;  %87 = vrot.lane.b32.xlu2 %v302_v2, %s358_s11  ;;  %8 = vst.msk [vmem:[#allocation0] ss:$16 sm:$0xc0] %vm4_vm0, %v3_v25  }
   0xb   :  { %70 = vrot.lane.b32.xlu1 %v304_v3, %s357_s8  ;;  %13 = vst.msk [vmem:[#allocation0 + $0x8] ss:$16 sm:$0x3] %vm4_vm0, %v299_v28  }
   0xc   :  { %15 = vst.msk [vmem:[#allocation0 + $0x8] ss:$16 sm:$0xc] %vm4_vm0, %v299_v28  }
   0xd   :  { %17 = vst.msk [vmem:[#allocation0 + $0x8] ss:$16 sm:$0x30] %vm4_vm0, %v299_v28  }
   0xe   :  { %19 = vst.msk [vmem:[#allocation0 + $0x8] ss:$16 sm:$0xc0] %vm4_vm0, %v299_v28  }
   0xf   :  { %24 = vst.msk [vmem:[#allocation0 + $0x80] ss:$16 sm:$0x3] %vm4_vm0, %v300_v31  }
  0x10   :  { %26 = vst.msk [vmem:[#allocation0 + $0x80] ss:$16 sm:$0xc] %vm4_vm0, %v300_v31  }
  0x11   :  { %28 = vst.msk [vmem:[#allocation0 + $0x80] ss:$16 sm:$0x30] %vm4_vm0, %v300_v31  }
  0x12   :  { %96 = vrot.lane.b32.xlu0 %v303_v1, %s358_s11  ;;  %113 = vrot.lane.b32.xlu2 %v42_v0, %s359_s16  ;;  %30 = vst.msk [vmem:[#allocation0 + $0x80] ss:$16 sm:$0xc0] %vm4_vm0, %v300_v31  }
  0x13   :  { %105 = vrot.lane.b32.xlu1 %v304_v3, %s358_s11  ;;  %35 = vst.msk [vmem:[#allocation0 + $0x88] ss:$16 sm:$0x3] %vm4_vm0, %v301_v34  }
  0x14   :  { %37 = vst.msk [vmem:[#allocation0 + $0x88] ss:$16 sm:$0xc] %vm4_vm0, %v301_v34  }
  0x15   :  { %39 = vst.msk [vmem:[#allocation0 + $0x88] ss:$16 sm:$0x30] %vm4_vm0, %v301_v34  }
  0x16   :  { %41 = vst.msk [vmem:[#allocation0 + $0x88] ss:$16 sm:$0xc0] %vm4_vm0, %v301_v34  }
  0x1a   :  { %122 = vrot.lane.b32.xlu0 %v302_v2, %s359_s16  ;;  %140 = vrot.lane.b32.xlu2 %v304_v3, %s359_s16 }
  0x1b   :  { %131 = vrot.lane.b32.xlu1 %v303_v1, %s359_s16 }
  0x22   :  { %148 = vrot.lane.b32.xlu0 %v42_v0, %s360_s17  ;;  %166 = vrot.lane.b32.xlu2 %v303_v1, %s360_s17 }
  0x23   :  { %157 = vrot.lane.b32.xlu1 %v302_v2, %s360_s17 }
  0x2a   :  { %175 = vrot.lane.b32.xlu0 %v304_v3, %s360_s17  ;;  %192 = vrot.lane.b32.xlu2 %v302_v2, %s361_s18 }
  0x2b   :  { %183 = vrot.lane.b32.xlu1 %v42_v0, %s361_s18 }
  0x32   :  { %201 = vrot.lane.b32.xlu0 %v303_v1, %s361_s18  ;;  %218 = vrot.lane.b32.xlu2 %v42_v0, %s362_s19 }
  0x33   :  { %210 = vrot.lane.b32.xlu1 %v304_v3, %s361_s18 }
  0x3a   :  { %227 = vrot.lane.b32.xlu0 %v302_v2, %s362_s19  ;;  %245 = vrot.lane.b32.xlu2 %v304_v3, %s362_s19 }
  0x3b   :  { %236 = vrot.lane.b32.xlu1 %v303_v1, %s362_s19 }
  0x42   :  { %253 = vrot.lane.b32.xlu0 %v42_v0, %s363_s20  ;;  %271 = vrot.lane.b32.xlu2 %v303_v1, %s363_s20 }
  0x43   :  { %262 = vrot.lane.b32.xlu1 %v302_v2, %s363_s20 }
  0x4a   :  { %280 = vrot.lane.b32.xlu0 %v304_v3, %s363_s20 }
  0x5c   :  { %v79_v4 = vpop.permute.xlu2 %78  }
  0x5d   :  { %82 = vst.msk [vmem:[#allocation0 + $0x2] ss:$8 sm:$0xf] %vm4_vm0, %v79_v4  }
  0x5e   :  { %84 = vst.msk [vmem:[#allocation0 + $0x2] ss:$8 sm:$0xf0] %vm4_vm0, %v79_v4  }
  0x64   :  { %v88_v5 = vpop.permute.xlu2 %87  }
  0x65   :  { %91 = vst.msk [vmem:[#allocation0 + $0x42] ss:$8 sm:$0xf] %vm4_vm0, %v88_v5  }
  0x66   :  { %93 = vst.msk [vmem:[#allocation0 + $0x42] ss:$8 sm:$0xf0] %vm4_vm0, %v88_v5  }
  0x6c   :  { %v114_v6 = vpop.permute.xlu2 %113  }
  0x6d   :  { %117 = vst.msk [vmem:[#allocation0 + $0x3] ss:$8 sm:$0xf] %vm4_vm0, %v114_v6  }
  0x6e   :  { %119 = vst.msk [vmem:[#allocation0 + $0x3] ss:$8 sm:$0xf0] %vm4_vm0, %v114_v6  }
  0x74   :  { %v44_v7 = vpop.permute.xlu0 %43   ;;  %v141_v8 = vpop.permute.xlu2 %140  }
  0x75   :  { %47 = vst.msk [vmem:[#allocation0 + $0x1] ss:$8 sm:$0xf] %vm4_vm0, %v44_v7   ;;  %v62_v9 = vpop.permute.xlu1 %61  }
  0x76   :  { %49 = vst.msk [vmem:[#allocation0 + $0x1] ss:$8 sm:$0xf0] %vm4_vm0, %v44_v7  }
  0x77   :  { %65 = vst.msk [vmem:[#allocation0 + $0x81] ss:$8 sm:$0xf] %vm4_vm0, %v62_v9  }
  0x78   :  { %67 = vst.msk [vmem:[#allocation0 + $0x81] ss:$8 sm:$0xf0] %vm4_vm0, %v62_v9  }
  0x79   :  { %144 = vst.msk [vmem:[#allocation0 + $0xc3] ss:$8 sm:$0xf] %vm4_vm0, %v141_v8  }
  0x7a   :  { %146 = vst.msk [vmem:[#allocation0 + $0xc3] ss:$8 sm:$0xf0] %vm4_vm0, %v141_v8  }
  0x7c   :  { %v53_v10 = vpop.permute.xlu0 %52   ;;  %v167_v11 = vpop.permute.xlu2 %166  }
  0x7d   :  { %56 = vst.msk [vmem:[#allocation0 + $0x41] ss:$8 sm:$0xf] %vm4_vm0, %v53_v10   ;;  %v71_v12 = vpop.permute.xlu1 %70  }
  0x7e   :  { %58 = vst.msk [vmem:[#allocation0 + $0x41] ss:$8 sm:$0xf0] %vm4_vm0, %v53_v10  }
  0x7f   :  { %74 = vst.msk [vmem:[#allocation0 + $0xc1] ss:$8 sm:$0xf] %vm4_vm0, %v71_v12  }
  0x80   :  { %76 = vst.msk [vmem:[#allocation0 + $0xc1] ss:$8 sm:$0xf0] %vm4_vm0, %v71_v12  }
  0x81   :  { %170 = vst.msk [vmem:[#allocation0 + $0x84] ss:$8 sm:$0xf] %vm4_vm0, %v167_v11  }
  0x82   :  { %172 = vst.msk [vmem:[#allocation0 + $0x84] ss:$8 sm:$0xf0] %vm4_vm0, %v167_v11  }
  0x84   :  { %v97_v13 = vpop.permute.xlu0 %96   ;;  %v193_v14 = vpop.permute.xlu2 %192  }
  0x85   :  { %100 = vst.msk [vmem:[#allocation0 + $0x82] ss:$8 sm:$0xf] %vm4_vm0, %v97_v13   ;;  %v106_v15 = vpop.permute.xlu1 %105  }
  0x86   :  { %102 = vst.msk [vmem:[#allocation0 + $0x82] ss:$8 sm:$0xf0] %vm4_vm0, %v97_v13  }
  0x87   :  { %109 = vst.msk [vmem:[#allocation0 + $0xc2] ss:$8 sm:$0xf] %vm4_vm0, %v106_v15  }
  0x88   :  { %111 = vst.msk [vmem:[#allocation0 + $0xc2] ss:$8 sm:$0xf0] %vm4_vm0, %v106_v15  }
  0x89   :  { %196 = vst.msk [vmem:[#allocation0 + $0x45] ss:$8 sm:$0xf] %vm4_vm0, %v193_v14  }
  0x8a   :  { %198 = vst.msk [vmem:[#allocation0 + $0x45] ss:$8 sm:$0xf0] %vm4_vm0, %v193_v14  }
  0x8c   :  { %v123_v16 = vpop.permute.xlu0 %122   ;;  %v219_v17 = vpop.permute.xlu2 %218  }
  0x8d   :  { %126 = vst.msk [vmem:[#allocation0 + $0x43] ss:$8 sm:$0xf] %vm4_vm0, %v123_v16   ;;  %v132_v18 = vpop.permute.xlu1 %131  }
  0x8e   :  { %128 = vst.msk [vmem:[#allocation0 + $0x43] ss:$8 sm:$0xf0] %vm4_vm0, %v123_v16  }
  0x8f   :  { %135 = vst.msk [vmem:[#allocation0 + $0x83] ss:$8 sm:$0xf] %vm4_vm0, %v132_v18  }
  0x90   :  { %137 = vst.msk [vmem:[#allocation0 + $0x83] ss:$8 sm:$0xf0] %vm4_vm0, %v132_v18  }
  0x91   :  { %222 = vst.msk [vmem:[#allocation0 + $0x6] ss:$8 sm:$0xf] %vm4_vm0, %v219_v17  }
  0x92   :  { %224 = vst.msk [vmem:[#allocation0 + $0x6] ss:$8 sm:$0xf0] %vm4_vm0, %v219_v17  }
  0x94   :  { %v149_v19 = vpop.permute.xlu0 %148   ;;  %v246_v20 = vpop.permute.xlu2 %245  }
  0x95   :  { %152 = vst.msk [vmem:[#allocation0 + $0x4] ss:$8 sm:$0xf] %vm4_vm0, %v149_v19   ;;  %v158_v21 = vpop.permute.xlu1 %157  }
  0x96   :  { %154 = vst.msk [vmem:[#allocation0 + $0x4] ss:$8 sm:$0xf0] %vm4_vm0, %v149_v19  }
  0x97   :  { %161 = vst.msk [vmem:[#allocation0 + $0x44] ss:$8 sm:$0xf] %vm4_vm0, %v158_v21  }
  0x98   :  { %163 = vst.msk [vmem:[#allocation0 + $0x44] ss:$8 sm:$0xf0] %vm4_vm0, %v158_v21  }
  0x99   :  { %249 = vst.msk [vmem:[#allocation0 + $0xc6] ss:$8 sm:$0xf] %vm4_vm0, %v246_v20  }
  0x9a   :  { %251 = vst.msk [vmem:[#allocation0 + $0xc6] ss:$8 sm:$0xf0] %vm4_vm0, %v246_v20  }
  0x9c   :  { %v176_v22 = vpop.permute.xlu0 %175   ;;  %v272_v23 = vpop.permute.xlu2 %271  }
  0x9d   :  { %179 = vst.msk [vmem:[#allocation0 + $0xc4] ss:$8 sm:$0xf] %vm4_vm0, %v176_v22   ;;  %v184_v24 = vpop.permute.xlu1 %183  }
  0x9e   :  { %181 = vst.msk [vmem:[#allocation0 + $0xc4] ss:$8 sm:$0xf0] %vm4_vm0, %v176_v22  }
  0x9f   :  { %187 = vst.msk [vmem:[#allocation0 + $0x5] ss:$8 sm:$0xf] %vm4_vm0, %v184_v24  }
  0xa0   :  { %189 = vst.msk [vmem:[#allocation0 + $0x5] ss:$8 sm:$0xf0] %vm4_vm0, %v184_v24  }
  0xa1   :  { %275 = vst.msk [vmem:[#allocation0 + $0x87] ss:$8 sm:$0xf] %vm4_vm0, %v272_v23  }
  0xa2   :  { %277 = vst.msk [vmem:[#allocation0 + $0x87] ss:$8 sm:$0xf0] %vm4_vm0, %v272_v23  }
  0xa4   :  { %v202_v26 = vpop.permute.xlu0 %201  }
  0xa5   :  { %205 = vst.msk [vmem:[#allocation0 + $0x85] ss:$8 sm:$0xf] %vm4_vm0, %v202_v26   ;;  %v211_v27 = vpop.permute.xlu1 %210  }
  0xa6   :  { %207 = vst.msk [vmem:[#allocation0 + $0x85] ss:$8 sm:$0xf0] %vm4_vm0, %v202_v26  }
  0xa7   :  { %214 = vst.msk [vmem:[#allocation0 + $0xc5] ss:$8 sm:$0xf] %vm4_vm0, %v211_v27  }
  0xa8   :  { %216 = vst.msk [vmem:[#allocation0 + $0xc5] ss:$8 sm:$0xf0] %vm4_vm0, %v211_v27  }
  0xac   :  { %v228_v29 = vpop.permute.xlu0 %227  }
  0xad   :  { %231 = vst.msk [vmem:[#allocation0 + $0x46] ss:$8 sm:$0xf] %vm4_vm0, %v228_v29   ;;  %v237_v30 = vpop.permute.xlu1 %236  }
  0xae   :  { %233 = vst.msk [vmem:[#allocation0 + $0x46] ss:$8 sm:$0xf0] %vm4_vm0, %v228_v29  }
  0xaf   :  { %240 = vst.msk [vmem:[#allocation0 + $0x86] ss:$8 sm:$0xf] %vm4_vm0, %v237_v30  }
  0xb0   :  { %242 = vst.msk [vmem:[#allocation0 + $0x86] ss:$8 sm:$0xf0] %vm4_vm0, %v237_v30  }
  0xb4   :  { %v254_v32 = vpop.permute.xlu0 %253  }
  0xb5   :  { %257 = vst.msk [vmem:[#allocation0 + $0x7] ss:$8 sm:$0xf] %vm4_vm0, %v254_v32   ;;  %v263_v33 = vpop.permute.xlu1 %262  }
  0xb6   :  { %259 = vst.msk [vmem:[#allocation0 + $0x7] ss:$8 sm:$0xf0] %vm4_vm0, %v254_v32  }
  0xb7   :  { %266 = vst.msk [vmem:[#allocation0 + $0x47] ss:$8 sm:$0xf] %vm4_vm0, %v263_v33  }
  0xb8   :  { %268 = vst.msk [vmem:[#allocation0 + $0x47] ss:$8 sm:$0xf0] %vm4_vm0, %v263_v33  }
  0xbc   :  { %v281_v35 = vpop.permute.xlu0 %280  }
  0xbd   :  { %284 = vst.msk [vmem:[#allocation0 + $0xc7] ss:$8 sm:$0xf] %vm4_vm0, %v281_v35  }
  0xbe   :  { %286 = vst.msk [vmem:[#allocation0 + $0xc7] ss:$8 sm:$0xf0] %vm4_vm0, %v281_v35  }
  0xbf   :  { %295 = dma.vmem_to_hbm [thread:$0]  %s291_s29, 4096, %s293_s1, [#allocation1]  }
  0xc0   :  { %355 = dma.done.wait [#allocation1], 4096  }
  0xc1   :  { %356 = vsyncadd [#allocation1], 4294963200 }
  0xc2   :  { %298 = vsyncpa [#allocation1], 1 }

// kernel: run.1
= control target key start
LH: loop header
LB: loop body
LE: loop exit
PB: predicated region body
PF: predicated region fallthrough
CT: control target
= control target key end

     0   :  { %s3199_s18 = smov 0   ;;  %s4049_s0 = inlined_call_operand.vmem [shape: f32[16,32], index: 0, kind: input, shape index: {}]   ;;  %s4050_s1 = inlined_call_operand.vmem [shape: f32[16,32], index: 1, kind: input, shape index: {}]   ;;  %s4051_s2 = inlined_call_operand.vmem [shape: f32[3,128,32], index: 2, kind: input, shape index: {}]   ;;  %s4052_s3 = inlined_call_operand.vmem [shape: f32[3,128,32], index: 3, kind: input, shape index: {}]   ;;  %s4053_s4 = inlined_call_operand.vmem [shape: f32[3,16,128], index: 4, kind: input, shape index: {}]   ;;  %s4054_s5 = inlined_call_operand.vmem [shape: f32[16,16], index: 5, kind: input, shape index: {}]   ;;  %s4055_s6 = inlined_call_operand.vmem [shape: f32[4,32], index: 6, kind: input, shape index: {}]   ;;  %s4056_s7 = inlined_call_operand.vmem [shape: f32[3,320,32], index: 7, kind: input, shape index: {}]   ;;  %s4057_s8 = inlined_call_operand.vmem [shape: f32[3,40,64], index: 8, kind: input, shape index: {}]   ;;  %s4058_s9 = inlined_call_operand.vmem [shape: f32[3,16,32], index: 9, kind: input, shape index: {}]   ;;  %s4059_s10 = inlined_call_operand.vmem [shape: f32[96,32], index: 10, kind: input, shape index: {}]   ;;  %s4060_s11 = inlined_call_operand.vmem [shape: f32[40,128], index: 11, kind: input, shape index: {}]   ;;  %s4061_s12 = inlined_call_operand.vmem [shape: f32[8,32], index: 12, kind: input, shape index: {}]   ;;  %s4062_s13 = inlined_call_operand.vmem [shape: f32[2,32,256], index: 13, kind: input, shape index: {}]   ;;  %s4063_s14 = inlined_call_operand.vmem [shape: f32[4,16,128], index: 14, kind: output, shape index: {0}]   ;;  %s4064_s15 = inlined_call_operand.vmem [shape: f32[4,2,8,256], index: 15, kind: output, shape index: {1}]  }
   0x1   :  { %4067 = sst [smem:[#allocation4_spill]] %s4062_s13 }
   0x2   :  { %4068 = sst [smem:[#allocation5_spill]] %s4063_s14 }
   0x3 LB: > { %4069 = sst [smem:[#allocation3_spill]] %s3115_s18  ;;  %s3205_s19 = sadd.s32 4294967295, %s3115_s18   ;;  %s3115_s18 = sphi %s3199_s18, %s26_s18  }
   0x4   : > { %p2802_p0 = scmp.ge.s32.totalorder %s3115_s18, 1  ;;  %p628_p1 = scmp.lt.s32.totalorder %s3115_s18, 5 }
   0x6   : > { %p629_p2 = pnand %p2802_p0, %p628_p1 }
   0x7   : > { %s733_s20 = sadd.s32 (!%p629_p2), 2, %s3205_s19  ;;  %p832_p3 = scmp.lt.s32.totalorder (!%p629_p2), %s3205_s19, 3 }
   0x8   : > { %632 = sbr.rel (%p629_p2) target bundleno = 4119 (0x1017), region = 76  ;;  %s735_s21 = ssub.s32 (!%p629_p2), 0, %s733_s20 }
   0x9   : > { %s2803_s22 = smin.u32 (!%p629_p2), %s735_s21, %s733_s20  ;;  %s4070_s14 = sld [smem:[#allocation5_spill]] (!%p629_p2) }
   0xa   : > { %3017 = sdivrem.u32 (!%p629_p2), %s2803_s22, 3  ;;  %p734_p4 = scmp.lt.s32.totalorder (!%p629_p2), %s733_s20, 0 }
   0xb   : > { %p2820_p7 = scmp.ne.s32.totalorder (!%p629_p2), %s3205_s19, 0 }
   0xd   : > { %s833_s23 = scalar_select %p832_p3, %s3205_s19, 3 }
   0xf   : > { %s2997_s24 = sshll.u32 %s833_s23, 4  ;;  %s2998_s25 = sshll.u32 %s833_s23, 5 }
  0x10   : > { %s3215_s28 = scalar_lea.vmem %s4070_s14, %s2997_s24  ;;  %s3220_s16 = scalar_lea.vmem %s4064_s15, %s2998_s25 }
  0x13   : > { %s3018_s17 = spop.drf %3017 }
  0x14   : > { %s3019_s18 = spop.drf %3017 }
  0x15   : > { %s739_s13 = ssub.s32 0, %s3019_s18 }
  0x16   : > { %s4074_s13 = smov (!%p734_p4, %s739_s13), %s3019_s18 }
  0x17   : > { %p2805_p5 = scmp.lt.s32.totalorder %s4074_s13, 0  ;;  %s745_s21 = sadd.s32 3, %s4074_s13 }
  0x19   : > { %s4076_s21 = smov (!%p2805_p5, %s745_s21), %s4074_s13 }
  0x1a   : > { %p747_p6 = scmp.lt.s32.totalorder %s4076_s21, 2 }
  0x1c   : > { %s4078_s21 = smov (!%p747_p6, %s4076_s21), 2  ;;  %845 = sbr.rel (%p2820_p7) target bundleno = 36 (0x24), region = 80 }
  0x1d   : > { %s3003_s22 = smul.u32 320, %s4078_s21  ;;  %s2996_s23 = sshll.u32 %s4078_s21, 4 }
  0x1e   : > { %s3004_s26 = smul.u32 40, %s4078_s21  ;;  %s3225_s14 = scalar_lea.vmem %s4058_s9, %s2996_s23 }
  0x1f   : > { %s3230_s20 = scalar_lea.vmem %s4056_s7, %s3003_s22 }
  0x20   : > { %s3235_s17 = scalar_lea.vmem %s4057_s8, %s3004_s26 }
  0x21   : > { %v846_v0 = vld [vmem:[%s4049_s0] sm:$0xff]  ;;  %vm848_vm0 = vcmask 261120   ;;  %v847_v1 = vld [vmem:[%s4049_s0 + $0x8] sm:$0xff] }
  0x22   : > { %849 = vst.msk [vmem:[#allocation2] sm:$0xff] %vm848_vm0, %v846_v0 }
  0x23   : > { %850 = vst.msk [vmem:[#allocation2 + $0x8] sm:$0xff] %vm848_vm0, %v847_v1 }
  0x24 PF: > { %v3247_v2 = vld [vmem:[%s4055_s6] sm:$0xf]  ;;  %p2821_p8 = scmp.le.s32.totalorder %s3205_s19, 0 }
  0x25   : > { %s2822_s26 = sadd.s32 (!%p2821_p8), 4294967295, %s3205_s19 }
  0x26   : > { %855 = sbr.rel (%p2821_p8) target bundleno = 3308 (0xcec), region = 84  ;;  %s858_s25 = ssub.s32 (!%p2821_p8), 0, %s2822_s26 }
  0x27   : > { %s2823_s29 = smin.u32 (!%p2821_p8), %s2822_s26, %s858_s25  ;;  %p857_p9 = scmp.lt.s32.totalorder (!%p2821_p8), %s2822_s26, 0 }
  0x28   : > { %3020 = sdivrem.u32 (!%p2821_p8), %s2823_s29, 3 }
  0x2b   : > { %v877_v3 = vld [vmem:[%s3230_s20 + $0x38] sm:$0xff]  ;;  %v876_v4 = vld [vmem:[%s3230_s20 + $0x30] sm:$0xff]  ;;  %v875_v7 = vld [vmem:[%s3230_s20 + $0x28] sm:$0xff]  ;;  %vm959_vm1 = vcmask 261120   ;;  %vm1847_vm9 = vcmask 130048   ;;  %vm2272_vm0 = vcmask 523264  }
  0x2c   : > { %1050 = vmatpush.msra.mxu1 %v877_v3  ;;  %v881_v5 = vld [vmem:[%s3230_s20 + $0x58] sm:$0xff]  ;;  %v880_v6 = vld [vmem:[%s3230_s20 + $0x50] sm:$0xff]  ;;  %v879_v8 = vld [vmem:[%s3230_s20 + $0x48] sm:$0xff] }
  0x2d   : > { %1164 = vmatpush.msra.mxu2 %v881_v5  ;;  %v874_v9 = vld [vmem:[%s3230_s20 + $0x20] sm:$0xff]  ;;  %v873_v45 = vld [vmem:[%s3230_s20 + $0x18] sm:$0xff]  ;;  %v872_v47 = vld [vmem:[%s3230_s20 + $0x10] sm:$0xff] }
  0x2e   : > { %1051 = vmatpush.msra.mxu1 %v876_v4  ;;  %v878_v10 = vld [vmem:[%s3230_s20 + $0x40] sm:$0xff]  ;;  %978 = vmatpush.msra.mxu0 %v873_v45  ;;  %v871_v48 = vld [vmem:[%s3230_s20 + $0x8] sm:$0xff] }
  0x2f   : > { %1165 = vmatpush.msra.mxu2 %v880_v6  ;;  %v3345_v49 = vld [vmem:[#allocation2] sm:$0xff]  ;;  %v3355_v54 = vld [vmem:[#allocation2 + $0x8] sm:$0xff] }
  0x30   : > { %1052 = vmatpush.msra.mxu1 %v875_v7  ;;  %979 = vmatpush.msra.mxu0 %v872_v47  ;;  %v919_v50 = vld [vmem:[%s4050_s1] sm:$0xff]  ;;  %v920_v55 = vld [vmem:[%s4050_s1 + $0x8] sm:$0xff] }
  0x31   : > { %1166 = vmatpush.msra.mxu2 %v879_v8  ;;  %s3021_s30 = spop.drf %3020  ;;  %v870_v51 = vld [vmem:[%s3230_s20] sm:$0xff]  ;;  %v956_v52 = vadd.f32 %v919_v50, %v3345_v49  ;;  %v957_v57 = vadd.f32 %v920_v55, %v3355_v54  ;;  %v3492_v50 = vperm.slane %v3247_v2, 0 }
  0x32   : > { %1053 = vmatpush.msra.mxu1 %v874_v9  ;;  %s3022_s19 = spop.drf %3020  ;;  %980 = vmatpush.msra.mxu0 %v871_v48  ;;  %v3489_v48 = vperm.slane %v3247_v2, 1 }
  0x33   : > { %1167 = vmatpush.msra.mxu2 %v878_v10  ;;  %s862_s18 = ssub.s32 0, %s3022_s19 }
  0x34   : > { %s4080_s18 = smov (!%p857_p9, %s862_s18), %s3022_s19  ;;  %981 = vmatpush.msra.mxu0 %v870_v51 }
  0x35   : > { %p2825_p10 = scmp.lt.s32.totalorder %s4080_s18, 0  ;;  %s868_s13 = sadd.s32 3, %s4080_s18  ;;  %2827 = vmatmul.msk.f32.vlgmr.msra.gmra.mxu0 %vm959_vm1, %v956_v52  ;;  %v3500_v52 = vperm.slane %v3247_v2, 2 }
  0x37   : > { %s4082_s13 = smov (!%p2825_p10, %s868_s13), %s4080_s18 }
  0x38   : > { %s2826_s21 = sshll.u32 %s4082_s13, 7 }
  0x39   : > { %s3265_s22 = scalar_lea.vmem %s4051_s2, %s2826_s21  ;;  %s3271_s25 = scalar_lea.vmem %s4052_s3, %s2826_s21 }
  0x3a   : > { %v923_v11 = vld [vmem:[%s3265_s22] sm:$0xff]  ;;  %v924_v13 = vld [vmem:[%s3265_s22 + $0x8] sm:$0xff]  ;;  %v925_v15 = vld [vmem:[%s3265_s22 + $0x10] sm:$0xff]  ;;  %s2861_s21 = sshll.u32 %s4082_s13, 4 }
  0x3b   : > { %2829 = vmatmul.msk.f32.vlgmr.msra.gmra.mxu1 %vm959_vm1, %v923_v11  ;;  %v940_v12 = vld [vmem:[%s3271_s25] sm:$0xff]  ;;  %v941_v14 = vld [vmem:[%s3271_s25 + $0x8] sm:$0xff]  ;;  %v942_v16 = vld [vmem:[%s3271_s25 + $0x10] sm:$0xff] }
  0x3c   : > { %2845 = vmatmul.msk.f32.vlgmr.msra.gmra.mxu2 %vm959_vm1, %v940_v12  ;;  %v926_v17 = vld [vmem:[%s3265_s22 + $0x18] sm:$0xff]  ;;  %v927_v19 = vld [vmem:[%s3265_s22 + $0x20] sm:$0xff]  ;;  %v928_v21 = vld [vmem:[%s3265_s22 + $0x28] sm:$0xff] }
  0x3d   : > { %v943_v18 = vld [vmem:[%s3271_s25 + $0x18] sm:$0xff]  ;;  %v944_v20 = vld [vmem:[%s3271_s25 + $0x20] sm:$0xff]  ;;  %v945_v22 = vld [vmem:[%s3271_s25 + $0x28] sm:$0xff]  ;;  %2828 = vmatmul.msk.f32.gmra.mxu0 %vm959_vm1, %v957_v57 }
  0x3e   : > { %v929_v23 = vld [vmem:[%s3265_s22 + $0x30] sm:$0xff]  ;;  %v930_v25 = vld [vmem:[%s3265_s22 + $0x38] sm:$0xff]  ;;  %v931_v27 = vld [vmem:[%s3265_s22 + $0x40] sm:$0xff] }
  0x3f   : > { %v946_v24 = vld [vmem:[%s3271_s25 + $0x30] sm:$0xff]  ;;  %v947_v26 = vld [vmem:[%s3271_s25 + $0x38] sm:$0xff]  ;;  %v948_v28 = vld [vmem:[%s3271_s25 + $0x40] sm:$0xff] }
  0x40   : > { %v932_v29 = vld [vmem:[%s3265_s22 + $0x48] sm:$0xff]  ;;  %v933_v31 = vld [vmem:[%s3265_s22 + $0x50] sm:$0xff]  ;;  %v934_v33 = vld [vmem:[%s3265_s22 + $0x58] sm:$0xff] }
  0x41   : > { %v949_v30 = vld [vmem:[%s3271_s25 + $0x48] sm:$0xff]  ;;  %v950_v32 = vld [vmem:[%s3271_s25 + $0x50] sm:$0xff]  ;;  %v951_v34 = vld [vmem:[%s3271_s25 + $0x58] sm:$0xff] }
  0x42   : > { %v935_v35 = vld [vmem:[%s3265_s22 + $0x60] sm:$0xff]  ;;  %v936_v37 = vld [vmem:[%s3265_s22 + $0x68] sm:$0xff]  ;;  %v937_v39 = vld [vmem:[%s3265_s22 + $0x70] sm:$0xff] }
  0x43   : > { %2830 = vmatmul.msk.f32.gmra.mxu1 %vm959_vm1, %v924_v13  ;;  %v952_v36 = vld [vmem:[%s3271_s25 + $0x60] sm:$0xff]  ;;  %v953_v38 = vld [vmem:[%s3271_s25 + $0x68] sm:$0xff]  ;;  %v954_v40 = vld [vmem:[%s3271_s25 + $0x70] sm:$0xff] }
  0x44   : > { %2846 = vmatmul.msk.f32.gmra.mxu2 %vm959_vm1, %v941_v14  ;;  %v938_v41 = vld [vmem:[%s3265_s22 + $0x78] sm:$0xff]  ;;  %s1218_s22 = scalar_lea.vmem %s4053_s4, %s2861_s21 }
  0x45   : > { %v955_v42 = vld [vmem:[%s3271_s25 + $0x78] sm:$0xff] }
  0x4b   : > { %2831 = vmatmul.msk.f32.gmra.mxu1 %vm959_vm1, %v925_v15  ;;  %v3389_v15 = vld [vmem:[%s3225_s14] sm:$0xff] }
  0x4c   : > { %2847 = vmatmul.msk.f32.gmra.mxu2 %vm959_vm1, %v942_v16  ;;  %v3392_v16 = vperm.slane %v3389_v15, 1 }
  0x53   : > { %2832 = vmatmul.msk.f32.gmra.mxu1 %vm959_vm1, %v926_v17 }
  0x54   : > { %2848 = vmatmul.msk.f32.gmra.mxu2 %vm959_vm1, %v943_v18 }
  0x5b   : > { %2833 = vmatmul.msk.f32.gmra.mxu1 %vm959_vm1, %v927_v19 }
  0x5c   : > { %2849 = vmatmul.msk.f32.gmra.mxu2 %vm959_vm1, %v944_v20 }
  0x63   : > { %2834 = vmatmul.msk.f32.gmra.mxu1 %vm959_vm1, %v928_v21 }
  0x64   : > { %2850 = vmatmul.msk.f32.gmra.mxu2 %vm959_vm1, %v945_v22 }
  0x6b   : > { %2835 = vmatmul.msk.f32.gmra.mxu1 %vm959_vm1, %v929_v23 }
  0x6c   : > { %2851 = vmatmul.msk.f32.gmra.mxu2 %vm959_vm1, %v946_v24 }
  0x73   : > { %2836 = vmatmul.msk.f32.gmra.mxu1 %vm959_vm1, %v930_v25 }
  0x74   : > { %2852 = vmatmul.msk.f32.gmra.mxu2 %vm959_vm1, %v947_v26 }
  0x7b   : > { %2837 = vmatmul.msk.f32.gmra.mxu1 %vm959_vm1, %v931_v27 }
  0x7c   : > { %2853 = vmatmul.msk.f32.gmra.mxu2 %vm959_vm1, %v948_v28 }
  0x83   : > { %2838 = vmatmul.msk.f32.gmra.mxu1 %vm959_vm1, %v932_v29 }
  0x84   : > { %2854 = vmatmul.msk.f32.gmra.mxu2 %vm959_vm1, %v949_v30 }
  0x8b   : > { %2839 = vmatmul.msk.f32.gmra.mxu1 %vm959_vm1, %v933_v31 }
  0x8c   : > { %2855 = vmatmul.msk.f32.gmra.mxu2 %vm959_vm1, %v950_v32 }
  0x93   : > { %2840 = vmatmul.msk.f32.gmra.mxu1 %vm959_vm1, %v934_v33 }
  0x94   : > { %2856 = vmatmul.msk.f32.gmra.mxu2 %vm959_vm1, %v951_v34 }
  0x9b   : > { %2841 = vmatmul.msk.f32.gmra.mxu1 %vm959_vm1, %v935_v35 }
  0x9c   : > { %2857 = vmatmul.msk.f32.gmra.mxu2 %vm959_vm1, %v952_v36 }
  0xa3   : > { %2842 = vmatmul.msk.f32.gmra.mxu1 %vm959_vm1, %v936_v37  ;;  %v958_v37 = vperm.slane %v3389_v15, 0 }
  0xa4   : > { %2858 = vmatmul.msk.f32.gmra.mxu2 %vm959_vm1, %v953_v38 }
  0xab   : > { %2843 = vmatmul.msk.f32.gmra.mxu1 %vm959_vm1, %v937_v39 }
  0xac   : > { %2859 = vmatmul.msk.f32.gmra.mxu2 %vm959_vm1, %v954_v40 }
  0xb2   : > { %v983_v36 = vpop.f32.mrf.mxu0 }
  0xb3   : > { %2844 = vmatmul.msk.f32.gmra.mxu1 %vm959_vm1, %v938_v41  ;;  %v984_v39 = vadd.f32 %v983_v36, %v958_v37  ;;  %v3475_v41 = vperm.slane %v3389_v15, 2 }
  0xb4   : > { %2860 = vmatmul.msk.f32.gmra.mxu2 %vm959_vm1, %v955_v42 }
  0xb5   : > { %v1221_v45 = vmul.f32 0.35355338, %v984_v39 }
  0xb7   : > { %v1338_v55 = vmul.f32 %v3489_v48, %v1221_v45 }
  0xb8   : > { %v3336_v43 = vpop.f32.mrf.mxu1 }
  0xbf   : > { %v3360_v56 = vpop.f32.mrf.mxu2 }
  0xc0   : > { %v3338_v44 = vpop.f32.mrf.mxu1 }
  0xc1   : > { %v1059_v42 = vadd.f32 %v3338_v44, %v3392_v16  ;;  %v1056_v44 = vadd.f32 %v3336_v43, %v3392_v16  ;;  %v1450_v43 = vmul.f32 %v3500_v52, %v1221_v45 }
  0xc7   : > { %v3366_v59 = vpop.f32.mrf.mxu2 }
  0xc8   : > { %v3341_v46 = vpop.f32.mrf.mxu1 }
  0xc9   : > { %v1062_v38 = vadd.f32 %v3341_v46, %v3392_v16  ;;  %v986_v46 = vpop.f32.mrf.mxu0 }
  0xca   : > { %v987_v57 = vadd.f32 %v986_v46, %v958_v37 }
  0xcf   : > { %v3370_v61 = vpop.f32.mrf.mxu2 }
  0xd0   : > { %v3353_v53 = vpop.f32.mrf.mxu1 }
  0xd1   : > { %v1065_v35 = vadd.f32 %v3353_v53, %v3392_v16  ;;  %v3503_v53 = vperm.slane %v3247_v2, 3 }
  0xd7   : > { %v3374_v63 = vpop.f32.mrf.mxu2 }
  0xd8   : > { %v3364_v58 = vpop.f32.mrf.mxu1  ;;  %v3606_v36 = vadd.f32 %v3374_v63, %v3475_v41 }
  0xd9   : > { %v1068_v33 = vadd.f32 %v3364_v58, %v3392_v16  ;;  %v1224_v58 = vmul.f32 %v3492_v50, %v1221_v45 }
  0xdf   : > { %v3376_v3 = vpop.f32.mrf.mxu2 }
  0xe0   : > { %v3368_v60 = vpop.f32.mrf.mxu1 }
  0xe1   : > { %v1071_v32 = vadd.f32 %v3368_v60, %v3392_v16 }
  0xe7   : > { %v3378_v5 = vpop.f32.mrf.mxu2 }
  0xe8   : > { %v3372_v62 = vpop.f32.mrf.mxu1 }
  0xe9   : > { %v1074_v31 = vadd.f32 %v3372_v62, %v3392_v16  ;;  %v1541_v62 = vmul.f32 %v3503_v53, %v1221_v45  ;;  %v3630_v45 = vadd.f32 %v3360_v56, %v3475_v41 }
  0xeb   : > { %v1387_v56 = vmul.f32 %v3489_v48, %v3630_v45 }
  0xef   : > { %v3380_v7 = vpop.f32.mrf.mxu2 }
  0xf0   : > { %v1076_v0 = vpop.f32.mrf.mxu1 }
  0xf1   : > { %v1077_v29 = vadd.f32 %v1076_v0, %v3392_v16 }
  0xf7   : > { %v3382_v9 = vpop.f32.mrf.mxu2 }
  0xf8   : > { %v1079_v1 = vpop.f32.mrf.mxu1 }
  0xf9   : > { %v1080_v28 = vadd.f32 %v1079_v1, %v3392_v16 }
  0xff   : > { %v3384_v12 = vpop.f32.mrf.mxu2 }
 0x100   : > { %v1082_v4 = vpop.f32.mrf.mxu1 }
 0x101   : > { %v1083_v26 = vadd.f32 %v1082_v4, %v3392_v16  ;;  %v1222_v4 = vmul.f32 0.35355338, %v987_v57 }
 0x107   : > { %v3386_v14 = vpop.f32.mrf.mxu2 }
 0x108   : > { %v1085_v6 = vpop.f32.mrf.mxu1 }
 0x109   : > { %v1086_v25 = vadd.f32 %v1085_v6, %v3392_v16 }
 0x10f   : > { %v3400_v20 = vpop.f32.mrf.mxu2 }
 0x110   : > { %v1088_v8 = vpop.f32.mrf.mxu1 }
 0x111   : > { %v1089_v24 = vadd.f32 %v1088_v8, %v3392_v16 }
 0x117   : > { %v3414_v23 = vpop.f32.mrf.mxu2 }
 0x118   : > { %v1091_v10 = vpop.f32.mrf.mxu1 }
 0x119   : > { %v1092_v22 = vadd.f32 %v1091_v10, %v3392_v16 }
 0x11f   : > { %v3429_v27 = vpop.f32.mrf.mxu2 }
 0x120   : > { %v1094_v11 = vpop.f32.mrf.mxu1  ;;  %v3522_v1 = vadd.f32 %v3429_v27, %v3475_v41 }
 0x121   : > { %v1095_v21 = vadd.f32 %v1094_v11, %v3392_v16 }
 0x127   : > { %v1208_v30 = vpop.f32.mrf.mxu2 }
 0x128   : > { %v1097_v13 = vpop.f32.mrf.mxu1  ;;  %v3516_v0 = vadd.f32 %v1208_v30, %v3475_v41  ;;  %v3582_v30 = vadd.f32 %v3380_v7, %v3475_v41 }
 0x129   : > { %v1098_v19 = vadd.f32 %v1097_v13, %v3392_v16  ;;  %v3538_v13 = vadd.f32 %v3414_v23, %v3475_v41  ;;  %v3550_v23 = vadd.f32 %v3400_v20, %v3475_v41  ;;  %v3566_v20 = vadd.f32 %v3384_v12, %v3475_v41 }
 0x12a   : > { %v1400_v10 = vmul.f32 %v3489_v48, %v3516_v0  ;;  %v1334_v11 = vmul.f32 %v3492_v50, %v3516_v0 }
 0x12b   : > { %v1331_v27 = vmul.f32 %v3492_v50, %v3550_v23 }
 0x12f   : > { %v1211_v34 = vpop.f32.mrf.mxu2 }
 0x130   : > { %v1100_v17 = vpop.f32.mrf.mxu1  ;;  %v3497_v51 = vadd.f32 %v1211_v34, %v3475_v41  ;;  %v3598_v34 = vadd.f32 %v3376_v3, %v3475_v41 }
 0x131   : > { %v1101_v18 = vadd.f32 %v1100_v17, %v3392_v16  ;;  %v1399_v16 = vmul.f32 %v3489_v48, %v3522_v1  ;;  %v1339_v17 = vmul.f32 %v3489_v48, %v1222_v4 }
 0x132   : > { %v1401_v6 = vmul.f32 %v3489_v48, %v3497_v51  ;;  %v1335_v8 = vmul.f32 %v3492_v50, %v3497_v51  ;;  %v1391_v39 = vmul.f32 %v3489_v48, %v3598_v34  ;;  %v1325_v63 = vmul.f32 %v3492_v50, %v3598_v34 }
 0x133   : > { %2862 = vmatpush.xpose.msk.msra.mxu3 %vm959_vm1, %v1101_v18  ;;  %2880 = vmatpush.xpose.msk.msrb.mxu0 %vm959_vm1, %v1101_v18 }
 0x134   : > { %2898 = vmatpush.xpose.msk.msrb.mxu1 %vm959_vm1, %v1101_v18  ;;  %2916 = vmatpush.xpose.msk.msrb.mxu2 %vm959_vm1, %v1101_v18  ;;  %v1225_v18 = vmul.f32 %v3492_v50, %v1222_v4 }
 0x137   : > { %2863 = vmatpush.xpose.msk.msra.mxu3 %vm959_vm1, %v1098_v19  ;;  %2881 = vmatpush.xpose.msk.msrb.mxu0 %vm959_vm1, %v1098_v19  ;;  %v1214_v40 = vpop.f32.mrf.mxu2 }
 0x138   : > { %2899 = vmatpush.xpose.msk.msrb.mxu1 %vm959_vm1, %v1098_v19  ;;  %2917 = vmatpush.xpose.msk.msrb.mxu2 %vm959_vm1, %v1098_v19  ;;  %v3482_v47 = vadd.f32 %v1214_v40, %v3475_v41  ;;  %v1333_v19 = vmul.f32 %v3492_v50, %v3522_v1  ;;  %v3622_v40 = vadd.f32 %v3366_v59, %v3475_v41 }
 0x13a   : > { %v1402_v60 = vmul.f32 %v3489_v48, %v3482_v47  ;;  %v1336_v2 = vmul.f32 %v3492_v50, %v3482_v47  ;;  %v1514_v57 = vmul.f32 %v3500_v52, %v3482_v47 }
 0x13b   : > { %2864 = vmatpush.xpose.msk.msra.mxu3 %vm959_vm1, %v1095_v21  ;;  %2882 = vmatpush.xpose.msk.msrb.mxu0 %vm959_vm1, %v1095_v21 }
 0x13c   : > { %2900 = vmatpush.xpose.msk.msrb.mxu1 %vm959_vm1, %v1095_v21  ;;  %2918 = vmatpush.xpose.msk.msrb.mxu2 %vm959_vm1, %v1095_v21  ;;  %v1451_v21 = vmul.f32 %v3500_v52, %v1222_v4 }
 0x13f   : > { %2865 = vmatpush.xpose.msk.msra.mxu3 %vm959_vm1, %v1092_v22  ;;  %2883 = vmatpush.xpose.msk.msrb.mxu0 %vm959_vm1, %v1092_v22 }
 0x140   : > { %2901 = vmatpush.xpose.msk.msrb.mxu1 %vm959_vm1, %v1092_v22  ;;  %2919 = vmatpush.xpose.msk.msrb.mxu2 %vm959_vm1, %v1092_v22  ;;  %v1542_v22 = vmul.f32 %v3503_v53, %v1222_v4  ;;  %v1602_v4 = vmul.f32 %v3503_v53, %v3522_v1 }
 0x143   : > { %2866 = vmatpush.xpose.msk.msra.mxu3 %vm959_vm1, %v1089_v24  ;;  %2884 = vmatpush.xpose.msk.msrb.mxu0 %vm959_vm1, %v1089_v24 }
 0x144   : > { %2902 = vmatpush.xpose.msk.msrb.mxu1 %vm959_vm1, %v1089_v24  ;;  %2920 = vmatpush.xpose.msk.msrb.mxu2 %vm959_vm1, %v1089_v24  ;;  %v3554_v24 = vadd.f32 %v3386_v14, %v3475_v41  ;;  %v1397_v14 = vmul.f32 %v3489_v48, %v3550_v23 }
 0x146   : > { %v1330_v12 = vmul.f32 %v3492_v50, %v3554_v24 }
 0x147   : > { %2867 = vmatpush.xpose.msk.msra.mxu3 %vm959_vm1, %v1086_v25  ;;  %2885 = vmatpush.xpose.msk.msrb.mxu0 %vm959_vm1, %v1086_v25 }
 0x148   : > { %2903 = vmatpush.xpose.msk.msrb.mxu1 %vm959_vm1, %v1086_v25  ;;  %2921 = vmatpush.xpose.msk.msrb.mxu2 %vm959_vm1, %v1086_v25  ;;  %v1398_v25 = vmul.f32 %v3489_v48, %v3538_v13 }
 0x14b   : > { %2868 = vmatpush.xpose.msk.msra.mxu3 %vm959_vm1, %v1083_v26  ;;  %2886 = vmatpush.xpose.msk.msrb.mxu0 %vm959_vm1, %v1083_v26 }
 0x14c   : > { %2904 = vmatpush.xpose.msk.msrb.mxu1 %vm959_vm1, %v1083_v26  ;;  %2922 = vmatpush.xpose.msk.msrb.mxu2 %vm959_vm1, %v1083_v26  ;;  %v1332_v26 = vmul.f32 %v3492_v50, %v3538_v13 }
 0x14f   : > { %2869 = vmatpush.xpose.msk.msra.mxu3 %vm959_vm1, %v1080_v28  ;;  %2887 = vmatpush.xpose.msk.msrb.mxu0 %vm959_vm1, %v1080_v28 }
 0x150   : > { %2905 = vmatpush.xpose.msk.msrb.mxu1 %vm959_vm1, %v1080_v28  ;;  %2923 = vmatpush.xpose.msk.msrb.mxu2 %vm959_vm1, %v1080_v28  ;;  %v3574_v28 = vadd.f32 %v3382_v9, %v3475_v41  ;;  %v1329_v9 = vmul.f32 %v3492_v50, %v3566_v20 }
 0x152   : > { %v1328_v7 = vmul.f32 %v3492_v50, %v3574_v28 }
 0x153   : > { %2870 = vmatpush.xpose.msk.msra.mxu3 %vm959_vm1, %v1077_v29  ;;  %2888 = vmatpush.xpose.msk.msrb.mxu0 %vm959_vm1, %v1077_v29 }
 0x154   : > { %2906 = vmatpush.xpose.msk.msrb.mxu1 %vm959_vm1, %v1077_v29  ;;  %2924 = vmatpush.xpose.msk.msrb.mxu2 %vm959_vm1, %v1077_v29  ;;  %v1396_v29 = vmul.f32 %v3489_v48, %v3554_v24 }
 0x157   : > { %2871 = vmatpush.xpose.msk.msra.mxu3 %vm959_vm1, %v1074_v31  ;;  %2889 = vmatpush.xpose.msk.msrb.mxu0 %vm959_vm1, %v1074_v31 }
 0x158   : > { %2907 = vmatpush.xpose.msk.msrb.mxu1 %vm959_vm1, %v1074_v31  ;;  %2925 = vmatpush.xpose.msk.msrb.mxu2 %vm959_vm1, %v1074_v31  ;;  %v1395_v31 = vmul.f32 %v3489_v48, %v3566_v20 }
 0x15b   : > { %2872 = vmatpush.xpose.msk.msra.mxu3 %vm959_vm1, %v1071_v32  ;;  %2890 = vmatpush.xpose.msk.msrb.mxu0 %vm959_vm1, %v1071_v32 }
 0x15c   : > { %2908 = vmatpush.xpose.msk.msrb.mxu1 %vm959_vm1, %v1071_v32  ;;  %2926 = vmatpush.xpose.msk.msrb.mxu2 %vm959_vm1, %v1071_v32  ;;  %v3590_v32 = vadd.f32 %v3378_v5, %v3475_v41  ;;  %v1327_v5 = vmul.f32 %v3492_v50, %v3582_v30 }
 0x15e   : > { %v1392_v37 = vmul.f32 %v3489_v48, %v3590_v32  ;;  %v1326_v3 = vmul.f32 %v3492_v50, %v3590_v32 }
 0x15f   : > { %2873 = vmatpush.xpose.msk.msra.mxu3 %vm959_vm1, %v1068_v33  ;;  %2891 = vmatpush.xpose.msk.msrb.mxu0 %vm959_vm1, %v1068_v33 }
 0x160   : > { %2909 = vmatpush.xpose.msk.msrb.mxu1 %vm959_vm1, %v1068_v33  ;;  %2927 = vmatpush.xpose.msk.msrb.mxu2 %vm959_vm1, %v1068_v33  ;;  %v1394_v33 = vmul.f32 %v3489_v48, %v3574_v28 }
 0x163   : > { %2874 = vmatpush.xpose.msk.msra.mxu3 %vm959_vm1, %v1065_v35  ;;  %2892 = vmatpush.xpose.msk.msrb.mxu0 %vm959_vm1, %v1065_v35 }
 0x164   : > { %2910 = vmatpush.xpose.msk.msrb.mxu1 %vm959_vm1, %v1065_v35  ;;  %2928 = vmatpush.xpose.msk.msrb.mxu2 %vm959_vm1, %v1065_v35  ;;  %v1393_v35 = vmul.f32 %v3489_v48, %v3582_v30 }
 0x167   : > { %2875 = vmatpush.xpose.msk.msra.mxu3 %vm959_vm1, %v1062_v38  ;;  %2893 = vmatpush.xpose.msk.msrb.mxu0 %vm959_vm1, %v1062_v38 }
 0x168   : > { %2911 = vmatpush.xpose.msk.msrb.mxu1 %vm959_vm1, %v1062_v38  ;;  %2929 = vmatpush.xpose.msk.msrb.mxu2 %vm959_vm1, %v1062_v38  ;;  %v3614_v38 = vadd.f32 %v3370_v61, %v3475_v41  ;;  %v1324_v61 = vmul.f32 %v3492_v50, %v3606_v36  ;;  %v1321_v41 = vmul.f32 %v3492_v50, %v3630_v45 }
 0x16a   : > { %v1389_v46 = vmul.f32 %v3489_v48, %v3614_v38  ;;  %v1323_v59 = vmul.f32 %v3492_v50, %v3614_v38 }
 0x16b   : > { %2876 = vmatpush.xpose.msk.msra.mxu3 %vm959_vm1, %v1059_v42  ;;  %2894 = vmatpush.xpose.msk.msrb.mxu0 %vm959_vm1, %v1059_v42 }
 0x16c   : > { %2912 = vmatpush.xpose.msk.msrb.mxu1 %vm959_vm1, %v1059_v42  ;;  %2930 = vmatpush.xpose.msk.msrb.mxu2 %vm959_vm1, %v1059_v42  ;;  %v1390_v42 = vmul.f32 %v3489_v48, %v3606_v36 }
 0x16f   : > { %2877 = vmatpush.xpose.msk.msra.mxu3 %vm959_vm1, %v1056_v44  ;;  %2895 = vmatpush.xpose.msk.msrb.mxu0 %vm959_vm1, %v1056_v44 }
 0x170   : > { %2913 = vmatpush.xpose.msk.msrb.mxu1 %vm959_vm1, %v1056_v44  ;;  %2931 = vmatpush.xpose.msk.msrb.mxu2 %vm959_vm1, %v1056_v44  ;;  %v1388_v44 = vmul.f32 %v3489_v48, %v3622_v40 }
 0x172   : > { %2896 = vmatmul.msk.f32.vlgmr.msrb.gmra.mxu0 %vm959_vm1, %v1338_v55  ;;  %2878 = vmatmul.msk.f32.vlgmr.msra.gmra.mxu3 %vm959_vm1, %v1224_v58  ;;  %v1322_v55 = vmul.f32 %v3492_v50, %v3622_v40  ;;  %v1605_v58 = vmul.f32 %v3503_v53, %v3482_v47  ;;  %v1511_v47 = vmul.f32 %v3500_v52, %v3522_v1 }
 0x173   : > { %1403 = vmatpush.msrb.mxu3 %v1402_v60  ;;  %1426 = vmatpush.msra.mxu0 %v1336_v2  ;;  %v1513_v60 = vmul.f32 %v3500_v52, %v3497_v51  ;;  %v1603_v2 = vmul.f32 %v3503_v53, %v3516_v0  ;;  %v1508_v1 = vmul.f32 %v3500_v52, %v3554_v24 }
 0x174   : > { %2914 = vmatmul.msk.f32.vlgmr.msrb.gmra.mxu1 %vm959_vm1, %v1450_v43  ;;  %2932 = vmatmul.msk.f32.vlgmr.msrb.gmra.mxu2 %vm959_vm1, %v1541_v62  ;;  %v1604_v43 = vmul.f32 %v3503_v53, %v3497_v51  ;;  %v1512_v62 = vmul.f32 %v3500_v52, %v3516_v0  ;;  %v1510_v51 = vmul.f32 %v3500_v52, %v3538_v13 }
 0x175   : > { %1404 = vmatpush.msrb.mxu3 %v1401_v6  ;;  %1427 = vmatpush.msra.mxu0 %v1335_v8  ;;  %v1601_v6 = vmul.f32 %v3503_v53, %v3538_v13  ;;  %v1509_v0 = vmul.f32 %v3500_v52, %v3550_v23  ;;  %v1600_v8 = vmul.f32 %v3503_v53, %v3550_v23 }
 0x176   : > { %v1598_v13 = vmul.f32 %v3503_v53, %v3566_v20  ;;  %v1503_v23 = vmul.f32 %v3500_v52, %v3598_v34 }
 0x177   : > { %1405 = vmatpush.msrb.mxu3 %v1400_v10  ;;  %1428 = vmatpush.msra.mxu0 %v1334_v11  ;;  %v1599_v10 = vmul.f32 %v3503_v53, %v3554_v24  ;;  %v1507_v11 = vmul.f32 %v3500_v52, %v3566_v20  ;;  %v1594_v24 = vmul.f32 %v3503_v53, %v3598_v34  ;;  %v1220_v34 = vld [vmem:[%s1218_s22 + $0x8] sm:$0xff] }
 0x178   : > { %v1501_v20 = vmul.f32 %v3500_v52, %v3614_v38 }
 0x179   : > { %1406 = vmatpush.msrb.mxu3 %v1399_v16  ;;  %1429 = vmatpush.msra.mxu0 %v1333_v19  ;;  %v1506_v16 = vmul.f32 %v3500_v52, %v3574_v28  ;;  %v1596_v19 = vmul.f32 %v3503_v53, %v3582_v30 }
 0x17a   : > { %2897 = vmatmul.msk.f32.gmra.mxu0 %vm959_vm1, %v1339_v17  ;;  %2879 = vmatmul.msk.f32.gmra.mxu3 %vm959_vm1, %v1225_v18  ;;  %v1597_v17 = vmul.f32 %v3503_v53, %v3574_v28  ;;  %v1505_v18 = vmul.f32 %v3500_v52, %v3582_v30  ;;  %v1591_v28 = vmul.f32 %v3503_v53, %v3622_v40  ;;  %v1219_v30 = vld [vmem:[%s1218_s22] sm:$0xff] }
 0x17b   : > { %1407 = vmatpush.msrb.mxu3 %v1398_v25  ;;  %1430 = vmatpush.msra.mxu0 %v1332_v26  ;;  %v1502_v25 = vmul.f32 %v3500_v52, %v3606_v36  ;;  %v1593_v26 = vmul.f32 %v3503_v53, %v3606_v36 }
 0x17c   : > { %2915 = vmatmul.msk.f32.gmra.mxu1 %vm959_vm1, %v1451_v21  ;;  %2933 = vmatmul.msk.f32.gmra.mxu2 %vm959_vm1, %v1542_v22  ;;  %v1504_v21 = vmul.f32 %v3500_v52, %v3590_v32  ;;  %v1595_v22 = vmul.f32 %v3503_v53, %v3590_v32 }
 0x17d   : > { %1408 = vmatpush.msrb.mxu3 %v1397_v14  ;;  %1431 = vmatpush.msra.mxu0 %v1331_v27  ;;  %v1592_v14 = vmul.f32 %v3503_v53, %v3614_v38  ;;  %v1500_v27 = vmul.f32 %v3500_v52, %v3622_v40 }
 0x17f   : > { %1409 = vmatpush.msrb.mxu3 %v1396_v29  ;;  %1432 = vmatpush.msra.mxu0 %v1330_v12  ;;  %v1499_v29 = vmul.f32 %v3500_v52, %v3630_v45  ;;  %v1590_v12 = vmul.f32 %v3503_v53, %v3630_v45 }
 0x181   : > { %1410 = vmatpush.msrb.mxu3 %v1395_v31  ;;  %1433 = vmatpush.msra.mxu0 %v1329_v9 }
 0x183   : > { %1411 = vmatpush.msrb.mxu3 %v1394_v33  ;;  %1434 = vmatpush.msra.mxu0 %v1328_v7 }
 0x185   : > { %1412 = vmatpush.msrb.mxu3 %v1393_v35  ;;  %1435 = vmatpush.msra.mxu0 %v1327_v5 }
 0x187   : > { %1413 = vmatpush.msrb.mxu3 %v1392_v37  ;;  %1436 = vmatpush.msra.mxu0 %v1326_v3 }
 0x189   : > { %1414 = vmatpush.msrb.mxu3 %v1391_v39  ;;  %1437 = vmatpush.msra.mxu0 %v1325_v63 }
 0x18b   : > { %1415 = vmatpush.msrb.mxu3 %v1390_v42  ;;  %1438 = vmatpush.msra.mxu0 %v1324_v61 }
 0x18d   : > { %1416 = vmatpush.msrb.mxu3 %v1389_v46  ;;  %1439 = vmatpush.msra.mxu0 %v1323_v59 }
 0x18f   : > { %1417 = vmatpush.msrb.mxu3 %v1388_v44  ;;  %1440 = vmatpush.msra.mxu0 %v1322_v55 }
 0x191   : > { %1418 = vmatpush.msrb.mxu3 %v1387_v56  ;;  %1441 = vmatpush.msra.mxu0 %v1321_v41 }
 0x193   : > { %1515 = vmatpush.msra.mxu3 %v1514_v57  ;;  %1606 = vmatpush.msrb.mxu0 %v1605_v58 }
 0x195   : > { %1516 = vmatpush.msra.mxu3 %v1513_v60  ;;  %1607 = vmatpush.msrb.mxu0 %v1604_v43 }
 0x197   : > { %1517 = vmatpush.msra.mxu3 %v1512_v62  ;;  %1608 = vmatpush.msrb.mxu0 %v1603_v2 }
 0x199   : > { %1518 = vmatpush.msra.mxu3 %v1511_v47  ;;  %1609 = vmatpush.msrb.mxu0 %v1602_v4 }
 0x19b   : > { %1519 = vmatpush.msra.mxu3 %v1510_v51  ;;  %1610 = vmatpush.msrb.mxu0 %v1601_v6 }
 0x19d   : > { %1520 = vmatpush.msra.mxu3 %v1509_v0  ;;  %1611 = vmatpush.msrb.mxu0 %v1600_v8 }
 0x19f   : > { %1521 = vmatpush.msra.mxu3 %v1508_v1  ;;  %1612 = vmatpush.msrb.mxu0 %v1599_v10 }
 0x1a1   : > { %1522 = vmatpush.msra.mxu3 %v1507_v11  ;;  %1613 = vmatpush.msrb.mxu0 %v1598_v13 }
 0x1a3   : > { %1523 = vmatpush.msra.mxu3 %v1506_v16  ;;  %1614 = vmatpush.msrb.mxu0 %v1597_v17 }
 0x1a5   : > { %1524 = vmatpush.msra.mxu3 %v1505_v18  ;;  %1615 = vmatpush.msrb.mxu0 %v1596_v19 }
 0x1a7   : > { %1525 = vmatpush.msra.mxu3 %v1504_v21  ;;  %1616 = vmatpush.msrb.mxu0 %v1595_v22 }
 0x1a9   : > { %1526 = vmatpush.msra.mxu3 %v1503_v23  ;;  %1617 = vmatpush.msrb.mxu0 %v1594_v24 }
 0x1ab   : > { %1527 = vmatpush.msra.mxu3 %v1502_v25  ;;  %1618 = vmatpush.msrb.mxu0 %v1593_v26 }
 0x1ad   : > { %1528 = vmatpush.msra.mxu3 %v1501_v20  ;;  %1619 = vmatpush.msrb.mxu0 %v1592_v14 }
 0x1af   : > { %1529 = vmatpush.msra.mxu3 %v1500_v27  ;;  %1620 = vmatpush.msrb.mxu0 %v1591_v28 }
 0x1b1   : > { %1530 = vmatpush.msra.mxu3 %v1499_v29  ;;  %1621 = vmatpush.msrb.mxu0 %v1590_v12 }
 0x1ef   : > { %v1363_v31 = vpop.f32.mrf.mxu0 }
 0x1f0   : > { %v1364_v9 = vadd.f32 %v1363_v31, %v1219_v30 }
 0x1f1   : > { %v1475_v32 = vpop.f32.mrf.mxu1 }
 0x1f2   : > { %v1476_v33 = vadd.f32 %v1475_v32, %v1219_v30  ;;  %1369 = vmax.xlane.f32.xlu0 %v1364_v9 }
 0x1f4   : > { %1481 = vmax.xlane.f32.xlu2 %v1476_v33 }
 0x1f5   : > { %v1297_v7 = vpop.f32.mrf.mxu3 }
 0x1f6   : > { %v1298_v5 = vadd.f32 %v1297_v7, %v1219_v30 }
 0x1f7   : > { %v1366_v35 = vpop.f32.mrf.mxu0  ;;  %v1566_v38 = vpop.f32.mrf.mxu2 }
 0x1f8   : > { %v1367_v36 = vadd.f32 %v1366_v35, %v1220_v34  ;;  %v1567_v40 = vadd.f32 %v1566_v38, %v1219_v30 }
 0x1f9   : > { %v1478_v37 = vpop.f32.mrf.mxu1 }
 0x1fa   : > { %v1479_v3 = vadd.f32 %v1478_v37, %v1220_v34  ;;  %1371 = vmax.xlane.f32.xlu1 %v1367_v36  ;;  %1303 = vmax.xlane.f32.xlu0 %v1298_v5 }
 0x1fc   : > { %1483 = vmax.xlane.f32.xlu2 %v1479_v3 }
 0x1fd   : > { %v1300_v39 = vpop.f32.mrf.mxu3 }
 0x1fe   : > { %v1301_v63 = vadd.f32 %v1300_v39, %v1220_v34 }
 0x1ff   : > { %v1569_v42 = vpop.f32.mrf.mxu2 }
 0x200   : > { %v1570_v61 = vadd.f32 %v1569_v42, %v1220_v34 }
 0x202   : > { %1305 = vmax.xlane.f32.xlu1 %v1301_v63  ;;  %1572 = vmax.xlane.f32.xlu0 %v1567_v40 }
 0x20a   : > { %1574 = vmax.xlane.f32.xlu1 %v1570_v61 }
 0x265   : > { %v1370_v45 = vpop.xlane.xlu0 %1369 }
 0x266   : > { %v1373_v59 = vsub.f32 %v1364_v9, %v1370_v45  ;;  %v884_v45 = vld [vmem:[%s3230_s20 + $0x70] sm:$0xff] }
 0x267   : > { %v1482_v46 = vpop.xlane.xlu2 %1481 }
 0x268   : > { %v1375_v44 = vmul.f32 1.442695, %v1373_v59  ;;  %v1485_v47 = vsub.f32 %v1476_v33, %v1482_v46  ;;  %v883_v46 = vld [vmem:[%s3230_s20 + $0x68] sm:$0xff]  ;;  %v882_v59 = vld [vmem:[%s3230_s20 + $0x60] sm:$0xff] }
 0x26a   : > { %3023 = vpow2.f32 %v1375_v44  ;;  %v1487_v1 = vmul.f32 1.442695, %v1485_v47 }
 0x26d   : > { %v1372_v55 = vpop.xlane.xlu1 %1371  ;;  %v1304_v56 = vpop.xlane.xlu0 %1303 }
 0x26e   : > { %v1374_v57 = vsub.f32 %v1367_v36, %v1372_v55  ;;  %v1307_v58 = vsub.f32 %v1298_v5, %v1304_v56 }
 0x26f   : > { %v1484_v41 = vpop.xlane.xlu2 %1483 }
 0x270   : > { %v3024_v60 = vpop.eup %3023  ;;  %v1377_v43 = vmul.f32 1.442695, %v1374_v57  ;;  %v1309_v62 = vmul.f32 1.442695, %v1307_v58  ;;  %v1486_v2 = vsub.f32 %v1479_v3, %v1484_v41 }
 0x271   : > { %1379 = vadd.xlane.f32.xlu2 %v3024_v60 }
 0x272   : > { %3025 = vpow2.f32 %v1377_v43  ;;  %v1489_v4 = vmul.f32 1.442695, %v1486_v2 }
 0x273   : > { %3027 = vpow2.f32 %v1309_v62 }
 0x274   : > { %3029 = vpow2.f32 %v1489_v4 }
 0x275   : > { %v1306_v51 = vpop.xlane.xlu1 %1305  ;;  %v1573_v0 = vpop.xlane.xlu0 %1572 }
 0x276   : > { %v1308_v6 = vsub.f32 %v1301_v63, %v1306_v51  ;;  %v1576_v11 = vsub.f32 %v1567_v40, %v1573_v0  ;;  %v1631_v0 = vperm.slane %v3389_v15, 3 }
 0x278   : > { %v3026_v8 = vpop.eup %3025  ;;  %v1311_v10 = vmul.f32 1.442695, %v1308_v6  ;;  %v1578_v16 = vmul.f32 1.442695, %v1576_v11 }
 0x279   : > { %1381 = vadd.xlane.f32.xlu1 %v3026_v8  ;;  %v3028_v13 = vpop.eup %3027 }
 0x27a   : > { %3031 = vpow2.f32 %v1311_v10  ;;  %1313 = vadd.xlane.f32.xlu0 %v3028_v13  ;;  %v3030_v19 = vpop.eup %3029 }
 0x27b   : > { %3033 = vpow2.f32 %v1487_v1 }
 0x27c   : > { %3035 = vpow2.f32 %v1578_v16 }
 0x27d   : > { %v1575_v17 = vpop.xlane.xlu1 %1574 }
 0x27e   : > { %v1577_v18 = vsub.f32 %v1570_v61, %v1575_v17  ;;  %v885_v61 = vld [vmem:[%s3230_s20 + $0x78] sm:$0xff] }
 0x280   : > { %v3032_v21 = vpop.eup %3031  ;;  %v1580_v22 = vmul.f32 1.442695, %v1577_v18 }
 0x281   : > { %1493 = vadd.xlane.f32.xlu1 %v3030_v19  ;;  %1315 = vadd.xlane.f32.xlu2 %v3032_v21  ;;  %v3034_v23 = vpop.eup %3033 }
 0x282   : > { %3037 = vpow2.f32 %v1580_v22  ;;  %1491 = vadd.xlane.f32.xlu0 %v3034_v23  ;;  %v3036_v24 = vpop.eup %3035 }
 0x288   : > { %v3038_v25 = vpop.eup %3037 }
 0x289   : > { %1582 = vadd.xlane.f32.xlu2 %v3036_v24 }
 0x28a   : > { %1584 = vadd.xlane.f32.xlu0 %v3038_v25 }
 0x2e4   : > { %v1380_v26 = vpop.xlane.xlu2 %1379 }
 0x2e5   : > { %3039 = vrcp.f32 %v1380_v26 }
 0x2eb   : > { %v3040_v20 = vpop.eup %3039 }
 0x2ec   : > { %v1382_v14 = vpop.xlane.xlu1 %1381  ;;  %v1385_v27 = vmul.f32 %v3040_v20, %v3024_v60 }
 0x2ed   : > { %3041 = vrcp.f32 %v1382_v14  ;;  %v1314_v28 = vpop.xlane.xlu0 %1313 }
 0x2ee   : > { %1419 = vmatmul.f32.vlgmr.msrb.gmra.mxu3 %v1385_v27  ;;  %3043 = vrcp.f32 %v1314_v28 }
 0x2ef   : > { %1650 = vmatpush.msrb.mxu3 %v885_v61  ;;  %v895_v61 = vld [vmem:[%s3230_s20 + $0xc8] sm:$0xff] }
 0x2f1   : > { %1651 = vmatpush.msrb.mxu3 %v884_v45 }
 0x2f3   : > { %v3042_v29 = vpop.eup %3041  ;;  %1652 = vmatpush.msrb.mxu3 %v883_v46 }
 0x2f4   : > { %v1316_v12 = vpop.xlane.xlu2 %1315  ;;  %v1386_v30 = vmul.f32 %v3042_v29, %v3026_v8  ;;  %v3044_v31 = vpop.eup %3043 }
 0x2f5   : > { %3045 = vrcp.f32 %v1316_v12  ;;  %v1492_v9 = vpop.xlane.xlu0 %1491  ;;  %v1319_v32 = vmul.f32 %v3044_v31, %v3028_v13  ;;  %v1494_v33 = vpop.xlane.xlu1 %1493  ;;  %1653 = vmatpush.msrb.mxu3 %v882_v59 }
 0x2f6   : > { %1422 = vmatmul.f32.gmra.mxu3 %v1386_v30  ;;  %3047 = vrcp.f32 %v1492_v9 }
 0x2f7   : > { %1442 = vmatmul.f32.vlgmr.msra.gmra.mxu0 %v1319_v32  ;;  %3049 = vrcp.f32 %v1494_v33  ;;  %v889_v32 = vld [vmem:[%s3230_s20 + $0x98] sm:$0xff] }
 0x2f8   : > { %v893_v33 = vld [vmem:[%s3230_s20 + $0xb8] sm:$0xff]  ;;  %1741 = vmatpush.msra.mxu0 %v889_v32  ;;  %2999 = vmatpush.msra.mxu2 %v889_v32 }
 0x2f9   : > { %1765 = vmatpush.msra.mxu1 %v893_v33 }
 0x2fb   : > { %v3046_v7 = vpop.eup %3045 }
 0x2fc   : > { %v1583_v34 = vpop.xlane.xlu2 %1582  ;;  %v1320_v35 = vmul.f32 %v3046_v7, %v3032_v21  ;;  %v3048_v5 = vpop.eup %3047 }
 0x2fd   : > { %3051 = vrcp.f32 %v1583_v34  ;;  %v1497_v36 = vmul.f32 %v3048_v5, %v3034_v23  ;;  %v3050_v37 = vpop.eup %3049  ;;  %v1585_v3 = vpop.xlane.xlu0 %1584  ;;  %v888_v34 = vld [vmem:[%s3230_s20 + $0x90] sm:$0xff] }
 0x2fe   : > { %3053 = vrcp.f32 %v1585_v3  ;;  %v1498_v63 = vmul.f32 %v3050_v37, %v3030_v19  ;;  %v3117_v19 = vmov 32.0   ;;  %1742 = vmatpush.msra.mxu0 %v888_v34  ;;  %v891_v37 = vld [vmem:[%s3230_s20 + $0xa8] sm:$0xff]  ;;  %v886_v3 = vld [vmem:[%s3230_s20 + $0x80] sm:$0xff]  ;;  %3000 = vmatpush.msra.mxu2 %v888_v34 }
 0x2ff   : > { %1445 = vmatmul.f32.gmra.mxu0 %v1320_v35  ;;  %1531 = vmatmul.f32.vlgmr.msra.gmra.mxu3 %v1497_v36  ;;  %3055 = vrcp.f32 %v3117_v19  ;;  %v892_v35 = vld [vmem:[%s3230_s20 + $0xb0] sm:$0xff]  ;;  %v887_v36 = vld [vmem:[%s3230_s20 + $0x88] sm:$0xff] }
 0x300   : > { %1766 = vmatpush.msra.mxu1 %v892_v35  ;;  %1743 = vmatpush.msra.mxu0 %v887_v36  ;;  %v3102_v19 = vld [vmem:[%s4050_s1 + $0x8] sm:$0xff] }
 0x301   : > { %3001 = vmatpush.msra.mxu2 %v887_v36 }
 0x302   : > { %1767 = vmatpush.msra.mxu1 %v891_v37  ;;  %1744 = vmatpush.msra.mxu0 %v886_v3 }
 0x303   : > { %v3052_v38 = vpop.eup %3051  ;;  %3002 = vmatpush.msra.mxu2 %v886_v3 }
 0x304   : > { %v1588_v39 = vmul.f32 %v3052_v38, %v3036_v24  ;;  %v3054_v40 = vpop.eup %3053  ;;  %v890_v38 = vld [vmem:[%s3230_s20 + $0xa0] sm:$0xff] }
 0x305   : > { %v1589_v42 = vmul.f32 %v3054_v40, %v3038_v25  ;;  %v3056_v21 = vpop.eup %3055  ;;  %1768 = vmatpush.msra.mxu1 %v890_v38  ;;  %v896_v40 = vld [vmem:[%s3230_s20 + $0xd0] sm:$0xff] }
 0x306   : > { %v1670_v22 = vmul.f32 32.0, %v3056_v21  ;;  %vm1674_vm2 = vweird.f32 %v3056_v21 }
 0x307   : > { %1534 = vmatmul.f32.gmra.mxu3 %v1498_v63  ;;  %1622 = vmatmul.f32.vlgmr.msrb.gmra.mxu0 %v1588_v39  ;;  %v897_v39 = vld [vmem:[%s3230_s20 + $0xd8] sm:$0xff] }
 0x308   : > { %v1671_v23 = vsub.f32 1.0, %v1670_v22  ;;  %1795 = vmatpush.msrb.mxu2 %v897_v39 }
 0x30a   : > { %v1672_v24 = vmul.f32 %v3056_v21, %v1671_v23  ;;  %1796 = vmatpush.msrb.mxu2 %v896_v40  ;;  %v1722_v23 = vperm.slane %v3389_v15, 6 }
 0x30c   : > { %v1673_v25 = vadd.f32 %v3056_v21, %v1672_v24  ;;  %1797 = vmatpush.msrb.mxu2 %v895_v61 }
 0x30f   : > { %1625 = vmatmul.f32.gmra.mxu0 %v1589_v42 }
 0x371   : > { %v1420_v44 = vpop.f32.mrf.mxu3 }
 0x374   : > { %v1443_v55 = vpop.f32.mrf.mxu0 }
 0x375   : > { %v1444_v57 = vadd.f32 %v1443_v55, %v1420_v44  ;;  %v894_v44 = vld [vmem:[%s3230_s20 + $0xc0] sm:$0xff] }
 0x376   : > { %1798 = vmatpush.msrb.mxu2 %v894_v44 }
 0x379   : > { %v1423_v56 = vpop.f32.mrf.mxu3 }
 0x37c   : > { %v1446_v41 = vpop.f32.mrf.mxu0 }
 0x37d   : > { %v1447_v2 = vadd.f32 %v1446_v41, %v1423_v56 }
 0x382   : > { %v1532_v58 = vpop.f32.mrf.mxu3 }
 0x383   : > { %v1538_v60 = vadd.f32 %v1532_v58, %v1444_v57 }
 0x384   : > { %v1623_v43 = vpop.f32.mrf.mxu0 }
 0x385   : > { %v1629_v62 = vadd.f32 %v1623_v43, %v1538_v60  ;;  %v1714_v43 = vperm.slane %v3389_v15, 4 }
 0x387   : > { %2934 = vmatmul.msk.f32.vlgmr.msrb.gmra.mxu3 %vm959_vm1, %v1629_v62 }
 0x38a   : > { %v1535_v47 = vpop.f32.mrf.mxu3 }
 0x38b   : > { %v1539_v4 = vadd.f32 %v1535_v47, %v1447_v2  ;;  %v1717_v47 = vperm.slane %v3389_v15, 5 }
 0x38c   : > { %v1626_v51 = vpop.f32.mrf.mxu0 }
 0x38d   : > { %v1630_v6 = vadd.f32 %v1626_v51, %v1539_v4 }
 0x38f   : > { %2935 = vmatmul.msk.f32.gmra.mxu3 %vm959_vm1, %v1630_v6 }
 0x40a   : > { %v1655_v8 = vpop.f32.mrf.mxu3 }
 0x40b   : > { %v1656_v1 = vadd.f32 %v1655_v8, %v1631_v0 }
 0x40d   : > { %v1661_v10 = vadd.f32 %v1656_v1, %v3345_v49  ;;  %v3723_v49 = vsel %vm1674_vm2, %v3056_v21, %v1673_v25  ;;  %v1752_v25 = vperm.slane %v3389_v15, 7 }
 0x40f   : > { %v1663_v11 = vsel %vm959_vm1, %v1661_v10, 0.0 }
 0x410   : > { %1664 = vadd.xlane.f32.xlu1 %v1663_v11 }
 0x412   : > { %v1658_v13 = vpop.f32.mrf.mxu3 }
 0x413   : > { %v1659_v16 = vadd.f32 %v1658_v13, %v1631_v0 }
 0x415   : > { %v1662_v17 = vadd.f32 %v1659_v16, %v3355_v54 }
 0x417   : > { %v1666_v18 = vsel %vm959_vm1, %v1662_v17, 0.0 }
 0x418   : > { %1667 = vadd.xlane.f32.xlu2 %v1666_v18 }
 0x483   : > { %v1665_v26 = vpop.xlane.xlu1 %1664 }
 0x484   : > { %v1676_v20 = vmul.f32 %v3723_v49, %v1665_v26 }
 0x486   : > { %v1678_v14 = vsub.f32 %v1661_v10, %v1676_v20  ;;  %v3101_v10 = vld [vmem:[%s4050_s1] sm:$0xff] }
 0x488   : > { %v1680_v54 = vmul.f32 %v1678_v14, %v1678_v14 }
 0x48a   : > { %v1682_v27 = vsel %vm959_vm1, %v1680_v54, 0.0 }
 0x48b   : > { %1683 = vadd.xlane.f32.xlu0 %v1682_v27  ;;  %v1668_v28 = vpop.xlane.xlu2 %1667 }
 0x48c   : > { %v1677_v29 = vmul.f32 %v3723_v49, %v1668_v28 }
 0x48e   : > { %v3728_v12 = vsub.f32 %v1662_v17, %v1677_v29 }
 0x490   : > { %v1681_v30 = vmul.f32 %v3728_v12, %v3728_v12 }
 0x492   : > { %v1685_v31 = vsel %vm959_vm1, %v1681_v30, 0.0 }
 0x493   : > { %1686 = vadd.xlane.f32.xlu1 %v1685_v31 }
 0x4fe   : > { %v1684_v9 = vpop.xlane.xlu0 %1683 }
 0x4ff   : > { %v1688_v7 = vmul.f32 %v1684_v9, %v3723_v49  ;;  %v3789_v9 = vld [vmem:[%s3225_s14 + $0x8] sm:$0xff] }
 0x501   : > { %v1690_v5 = vadd.f32 1e-05, %v1688_v7  ;;  %v1776_v7 = vperm.slane %v3789_v9, 0 }
 0x503   : > { %3057 = vrsqrt.f32 %v1690_v5  ;;  %vm1698_vm4 = vweird.f32 %v1690_v5 }
 0x506   : > { %v1687_v63 = vpop.xlane.xlu1 %1686 }
 0x507   : > { %v1689_v42 = vmul.f32 %v1687_v63, %v3723_v49 }
 0x509   : > { %v3058_v45 = vpop.eup %3057  ;;  %v1691_v46 = vadd.f32 1e-05, %v1689_v42 }
 0x50a   : > { %v1693_v59 = vmul.f32 %v3058_v45, %v1690_v5  ;;  %vm1699_vm3 = vweird.f32 %v3058_v45 }
 0x50b   : > { %3059 = vrsqrt.f32 %v1691_v46  ;;  %vm1700_vm5 = vmor %vm1698_vm4, %vm1699_vm3  ;;  %vm1708_vm7 = vweird.f32 %v1691_v46 }
 0x50c   : > { %v1694_v55 = vmul.f32 %v3058_v45, %v1693_v59 }
 0x50e   : > { %v1695_v56 = vmul.f32 0.5, %v1694_v55 }
 0x510   : > { %v1696_v41 = vsub.f32 1.5, %v1695_v56 }
 0x511   : > { %v3060_v57 = vpop.eup %3059 }
 0x512   : > { %v1697_v58 = vmul.f32 %v3058_v45, %v1696_v41  ;;  %v1703_v60 = vmul.f32 %v3060_v57, %v1691_v46  ;;  %vm1709_vm6 = vweird.f32 %v3060_v57 }
 0x513   : > { %vm1710_vm8 = vmor %vm1708_vm7, %vm1709_vm6 }
 0x514   : > { %v1701_v62 = vsel %vm1700_vm5, %v3058_v45, %v1697_v58  ;;  %v1704_v2 = vmul.f32 %v3060_v57, %v1703_v60 }
 0x515   : > { %v1712_v4 = vmul.f32 %v1701_v62, %v1678_v14 }
 0x516   : > { %v1705_v51 = vmul.f32 0.5, %v1704_v2 }
 0x517   : > { %v1715_v6 = vmul.f32 %v1714_v43, %v1712_v4 }
 0x518   : > { %v1706_v0 = vsub.f32 1.5, %v1705_v51 }
 0x519   : > { %v3749_v8 = vadd.f32 %v1717_v47, %v1715_v6 }
 0x51a   : > { %v1707_v1 = vmul.f32 %v3060_v57, %v1706_v0 }
 0x51b   : > { %v1720_v11 = vadd.f32 %v3101_v10, %v3749_v8 }
 0x51c   : > { %v1711_v13 = vsel %vm1710_vm8, %v3060_v57, %v1707_v1 }
 0x51d   : > { %v1713_v16 = vmul.f32 %v1711_v13, %v3728_v12  ;;  %2936 = vmatmul.msk.f32.vlgmr.msra.gmra.mxu0 %vm959_vm1, %v1720_v11  ;;  %2938 = vmatmul.msk.f32.vlgmr.msra.gmra.mxu1 %vm959_vm1, %v1720_v11 }
 0x51f   : > { %v1716_v17 = vmul.f32 %v1714_v43, %v1713_v16 }
 0x521   : > { %v3758_v18 = vadd.f32 %v1717_v47, %v1716_v17 }
 0x523   : > { %v1721_v21 = vadd.f32 %v3102_v19, %v3758_v18 }
 0x525   : > { %2937 = vmatmul.msk.f32.vlgmr.msra.gmra.mxu2 %vm959_vm1, %v1721_v21  ;;  %2939 = vmatmul.msk.f32.gmra.mxu1 %vm959_vm1, %v1721_v21 }
 0x52d   : > { %2940 = vmatmul.msk.f32.vlgmr.msrb.gmra.mxu2 %vm959_vm1, %v3749_v8 }
 0x535   : > { %2941 = vmatmul.msk.f32.gmra.mxu2 %vm959_vm1, %v3758_v18 }
 0x59a   : > { %v1770_v22 = vpop.f32.mrf.mxu1  ;;  %v1746_v24 = vpop.f32.mrf.mxu0 }
 0x59b   : > { %v1747_v26 = vadd.f32 %v1746_v24, %v1722_v23  ;;  %v1771_v27 = vadd.f32 %v1770_v22, %v1752_v25 }
 0x59d   : > { %v3774_v54 = vmul.f32 0.35355338, %v1747_v26 }
 0x59f   : > { %v1810_v29 = vmul.f32 %v3774_v54, %v3492_v50  ;;  %v1872_v15 = vmul.f32 %v3774_v54, %v3489_v48  ;;  %v1985_v36 = vmul.f32 %v3774_v54, %v3500_v52 }
 0x5a2   : > { %v1773_v20 = vpop.f32.mrf.mxu1 }
 0x5a3   : > { %v1774_v14 = vadd.f32 %v1773_v20, %v1752_v25 }
 0x5a5   : > { %2942 = vmatpush.xpose.msk.msra.mxu3 %vm959_vm1, %v1774_v14  ;;  %2946 = vmatpush.xpose.msk.msrb.mxu0 %vm959_vm1, %v1774_v14 }
 0x5a8   : > { %v1749_v28 = vpop.f32.mrf.mxu2 }
 0x5a9   : > { %2943 = vmatpush.xpose.msk.msra.mxu3 %vm959_vm1, %v1771_v27  ;;  %2947 = vmatpush.xpose.msk.msrb.mxu0 %vm959_vm1, %v1771_v27  ;;  %v1750_v12 = vadd.f32 %v1749_v28, %v1722_v23 }
 0x5ab   : > { %v3785_v30 = vmul.f32 0.35355338, %v1750_v12 }
 0x5ac   : > { %2944 = vmatmul.msk.f32.vlgmr.msra.gmra.mxu3 %vm959_vm1, %v1810_v29  ;;  %2948 = vmatmul.msk.f32.vlgmr.msrb.gmra.mxu0 %vm959_vm1, %v1872_v15 }
 0x5ad   : > { %2954 = vmatpush.xpose.msk.msrb.mxu3 %vm959_vm1, %v1774_v14  ;;  %v1811_v32 = vmul.f32 %v3785_v30, %v3492_v50  ;;  %v1873_v33 = vmul.f32 %v3785_v30, %v3489_v48  ;;  %v1986_v45 = vmul.f32 %v3785_v30, %v3500_v52 }
 0x5b0   : > { %v1800_v31 = vpop.f32.mrf.mxu2 }
 0x5b1   : > { %2955 = vmatpush.xpose.msk.msrb.mxu3 %vm959_vm1, %v1771_v27  ;;  %v1801_v35 = vadd.f32 %v1800_v31, %v1776_v7 }
 0x5b3   : > { %v1925_v39 = vmul.f32 %v1801_v35, %v3489_v48  ;;  %v1870_v63 = vmul.f32 %v1801_v35, %v3492_v50  ;;  %v2038_v40 = vmul.f32 %v1801_v35, %v3500_v52  ;;  %v2124_v61 = vmul.f32 %v1801_v35, %v3503_v53 }
 0x5b4   : > { %2945 = vmatmul.msk.f32.gmra.mxu3 %vm959_vm1, %v1811_v32  ;;  %2949 = vmatmul.msk.f32.gmra.mxu0 %vm959_vm1, %v1873_v33  ;;  %v2071_v35 = vmul.f32 %v3774_v54, %v3503_v53 }
 0x5b8   : > { %v1803_v34 = vpop.f32.mrf.mxu2 }
 0x5b9   : > { %v1804_v5 = vadd.f32 %v1803_v34, %v1776_v7 }
 0x5bb   : > { %v1926_v37 = vmul.f32 %v1804_v5, %v3489_v48  ;;  %v1871_v3 = vmul.f32 %v1804_v5, %v3492_v50  ;;  %v2039_v38 = vmul.f32 %v1804_v5, %v3500_v52  ;;  %v2125_v42 = vmul.f32 %v1804_v5, %v3503_v53  ;;  %v3817_v48 = vld [vmem:[%s4054_s5] sm:$0xff]  ;;  %v3824_v52 = vld [vmem:[%s4054_s5 + $0x8] sm:$0xff] }
 0x5bc   : > { %2956 = vmatmul.msk.f32.vlgmr.msrb.gmra.mxu3 %vm959_vm1, %v1985_v36 }
 0x5bd   : > { %1947 = vmatpush.msrb.mxu1 %v1926_v37  ;;  %1976 = vmatpush.msra.mxu2 %v1871_v3 }
 0x5be   : > { %2060 = vmatpush.msra.mxu0 %v2039_v38  ;;  %v2072_v38 = vmul.f32 %v3785_v30, %v3503_v53 }
 0x5bf   : > { %1948 = vmatpush.msrb.mxu1 %v1925_v39  ;;  %1977 = vmatpush.msra.mxu2 %v1870_v63 }
 0x5c0   : > { %2061 = vmatpush.msra.mxu0 %v2038_v40 }
 0x5c1   : > { %2960 = vmatpush.xpose.msk.msra.mxu1 %vm959_vm1, %v1774_v14  ;;  %2146 = vmatpush.msrb.mxu2 %v2125_v42 }
 0x5c3   : > { %2147 = vmatpush.msrb.mxu2 %v2124_v61 }
 0x5c4   : > { %2957 = vmatmul.msk.f32.gmra.mxu3 %vm959_vm1, %v1986_v45 }
 0x5c5   : > { %2961 = vmatpush.xpose.msk.msra.mxu1 %vm959_vm1, %v1771_v27 }
 0x629   : > { %v1897_v50 = vpop.f32.mrf.mxu0 }
 0x62a   : > { %v1898_v46 = vadd.f32 %v1897_v50, %v3817_v48 }
 0x62c   : > { %v1903_v59 = vsel %vm1847_vm9, %v1898_v46, -inf }
 0x62d   : > { %1904 = vmax.xlane.f32.xlu2 %v1903_v59 }
 0x62f   : > { %v1841_v44 = vpop.f32.mrf.mxu3 }
 0x630   : > { %v1842_v58 = vadd.f32 %v1841_v44, %v3817_v48 }
 0x631   : > { %v1900_v55 = vpop.f32.mrf.mxu0 }
 0x632   : > { %v1901_v56 = vadd.f32 %v1900_v55, %v3824_v52  ;;  %v1848_v60 = vsel %vm1847_vm9, %v1842_v58, -inf }
 0x634   : > { %v1906_v41 = vsel %vm1847_vm9, %v1901_v56, -inf }
 0x635   : > { %1907 = vmax.xlane.f32.xlu0 %v1906_v41 }
 0x637   : > { %v1844_v57 = vpop.f32.mrf.mxu3 }
 0x638   : > { %v1845_v13 = vadd.f32 %v1844_v57, %v3824_v52 }
 0x63a   : > { %v1851_v23 = vsel %vm1847_vm9, %v1845_v13, -inf }
 0x63d   : > { %1849 = vmax.xlane.f32.xlu0 %v1848_v60 }
 0x63f   : > { %v2010_v43 = vpop.f32.mrf.mxu3 }
 0x640   : > { %v2011_v62 = vadd.f32 %v2010_v43, %v3817_v48 }
 0x642   : > { %v2016_v2 = vsel %vm1847_vm9, %v2011_v62, -inf }
 0x645   : > { %2017 = vmax.xlane.f32.xlu0 %v2016_v2 }
 0x647   : > { %v2013_v50 = vpop.f32.mrf.mxu3 }
 0x648   : > { %v2014_v53 = vadd.f32 %v2013_v50, %v3824_v52 }
 0x64a   : > { %v2019_v44 = vsel %vm1847_vm9, %v2014_v53, -inf }
 0x6a0   : > { %v1905_v47 = vpop.xlane.xlu2 %1904 }
 0x6a1   : > { %v1909_v4 = vsub.f32 %v1898_v46, %v1905_v47 }
 0x6a3   : > { %v1911_v51 = vmul.f32 1.442695, %v1909_v4 }
 0x6a5   : > { %3061 = vpow2.f32 %v1911_v51 }
 0x6a8   : > { %v1908_v6 = vpop.xlane.xlu0 %1907 }
 0x6a9   : > { %v1910_v0 = vsub.f32 %v1901_v56, %v1908_v6 }
 0x6ab   : > { %v3062_v1 = vpop.eup %3061  ;;  %v1913_v10 = vmul.f32 1.442695, %v1910_v0 }
 0x6ac   : > { %v1915_v11 = vsel %vm1847_vm9, %v3062_v1, 0.0 }
 0x6ad   : > { %3063 = vpow2.f32 %v1913_v10  ;;  %1916 = vadd.xlane.f32.xlu1 %v1915_v11 }
 0x6b0   : > { %v1850_v16 = vpop.xlane.xlu0 %1849 }
 0x6b1   : > { %v1854_v17 = vsub.f32 %v1842_v58, %v1850_v16 }
 0x6b3   : > { %v3064_v19 = vpop.eup %3063  ;;  %v1856_v21 = vmul.f32 1.442695, %v1854_v17  ;;  %v901_v17 = vld [vmem:[%s3230_s20 + $0xf8] sm:$0xff] }
 0x6b4   : > { %v1918_v22 = vsel %vm1847_vm9, %v3064_v19, 0.0  ;;  %2176 = vmatpush.msra.mxu3 %v901_v17 }
 0x6b5   : > { %3065 = vpow2.f32 %v1856_v21  ;;  %1919 = vadd.xlane.f32.xlu2 %v1918_v22  ;;  %1852 = vmax.xlane.f32.xlu1 %v1851_v23 }
 0x6b8   : > { %v2018_v24 = vpop.xlane.xlu0 %2017 }
 0x6b9   : > { %v2022_v25 = vsub.f32 %v2011_v62, %v2018_v24 }
 0x6bb   : > { %v3066_v26 = vpop.eup %3065  ;;  %v2024_v20 = vmul.f32 1.442695, %v2022_v25 }
 0x6bc   : > { %v1860_v14 = vsel %vm1847_vm9, %v3066_v26, 0.0 }
 0x6bd   : > { %3067 = vpow2.f32 %v2024_v20  ;;  %1861 = vadd.xlane.f32.xlu0 %v1860_v14 }
 0x6c3   : > { %v3068_v27 = vpop.eup %3067 }
 0x6c4   : > { %v2028_v28 = vsel %vm1847_vm9, %v3068_v27, 0.0 }
 0x6c5   : > { %2029 = vadd.xlane.f32.xlu0 %v2028_v28  ;;  %v899_v28 = vld [vmem:[%s3230_s20 + $0xe8] sm:$0xff] }
 0x720   : > { %v1917_v29 = vpop.xlane.xlu1 %1916 }
 0x721   : > { %3069 = vrcp.f32 %v1917_v29  ;;  %v898_v29 = vld [vmem:[%s3230_s20 + $0xe0] sm:$0xff] }
 0x727   : > { %v3070_v15 = vpop.eup %3069 }
 0x728   : > { %v1923_v12 = vmul.f32 %v3070_v15, %v3062_v1  ;;  %v1920_v31 = vpop.xlane.xlu2 %1919  ;;  %v1853_v54 = vpop.xlane.xlu1 %1852 }
 0x729   : > { %3071 = vrcp.f32 %v1920_v31  ;;  %v1855_v61 = vsub.f32 %v1845_v13, %v1853_v54 }
 0x72a   : > { %2950 = vmatmul.msk.f32.vlgmr.msrb.gmra.mxu1 %vm1847_vm9, %v1923_v12 }
 0x72b   : > { %v1858_v46 = vmul.f32 1.442695, %v1855_v61 }
 0x72f   : > { %v3072_v32 = vpop.eup %3071 }
 0x730   : > { %v1862_v33 = vpop.xlane.xlu0 %1861  ;;  %v1924_v7 = vmul.f32 %v3072_v32, %v3064_v19  ;;  %v900_v19 = vld [vmem:[%s3230_s20 + $0xf0] sm:$0xff] }
 0x731   : > { %3073 = vrcp.f32 %v1862_v33  ;;  %2177 = vmatpush.msra.mxu3 %v900_v19 }
 0x732   : > { %2951 = vmatmul.msk.f32.gmra.mxu1 %vm1847_vm9, %v1924_v7 }
 0x733   : > { %2178 = vmatpush.msra.mxu3 %v899_v28 }
 0x735   : > { %2179 = vmatpush.msra.mxu3 %v898_v29 }
 0x737   : > { %v3074_v34 = vpop.eup %3073 }
 0x738   : > { %v1868_v5 = vmul.f32 %v3074_v34, %v3066_v26  ;;  %v2030_v36 = vpop.xlane.xlu0 %2029 }
 0x739   : > { %3075 = vrcp.f32 %v2030_v36 }
 0x73a   : > { %2952 = vmatmul.msk.f32.vlgmr.msra.gmra.mxu2 %vm1847_vm9, %v1868_v5  ;;  %2962 = vmatmul.msk.f32.vlgmr.msra.gmra.mxu1 %vm959_vm1, %v2071_v35  ;;  %3077 = vpow2.f32 %v1858_v46 }
 0x73f   : > { %v3076_v37 = vpop.eup %3075 }
 0x740   : > { %v2036_v3 = vmul.f32 %v3076_v37, %v3068_v27  ;;  %v3078_v56 = vpop.eup %3077 }
 0x742   : > { %2958 = vmatmul.msk.f32.vlgmr.msra.gmra.mxu0 %vm1847_vm9, %v2036_v3  ;;  %2963 = vmatmul.msk.f32.gmra.mxu1 %vm959_vm1, %v2072_v38  ;;  %v2157_v38 = vperm.slane %v3789_v9, 1 }
 0x7a7   : > { %v3848_v39 = vpop.f32.mrf.mxu1 }
 0x7af   : > { %v3850_v63 = vpop.f32.mrf.mxu1 }
 0x7b7   : > { %v2096_v40 = vpop.f32.mrf.mxu1 }
 0x7b8   : > { %v2097_v42 = vadd.f32 %v2096_v40, %v3817_v48  ;;  %v1863_v48 = vsel %vm1847_vm9, %v3078_v56, 0.0 }
 0x7ba   : > { %v2102_v45 = vsel %vm1847_vm9, %v2097_v42, -inf }
 0x7bb   : > { %2103 = vmax.xlane.f32.xlu2 %v2102_v45 }
 0x7bd   : > { %v1979_v15 = vpop.f32.mrf.mxu2 }
 0x7be   : > { %v1980_v31 = vadd.f32 %v1979_v15, %v3848_v39 }
 0x7bf   : > { %v2099_v30 = vpop.f32.mrf.mxu1  ;;  %v2063_v32 = vpop.f32.mrf.mxu0 }
 0x7c0   : > { %v2100_v59 = vadd.f32 %v2099_v30, %v3824_v52  ;;  %v2069_v33 = vadd.f32 %v2063_v32, %v1980_v31 }
 0x7c2   : > { %v2105_v55 = vsel %vm1847_vm9, %v2100_v59, -inf }
 0x7c3   : > { %2020 = vmax.xlane.f32.xlu2 %v2019_v44  ;;  %2106 = vmax.xlane.f32.xlu1 %v2105_v55 }
 0x7cb   : > { %1864 = vadd.xlane.f32.xlu1 %v1863_v48 }
 0x82e   : > { %v2104_v41 = vpop.xlane.xlu2 %2103 }
 0x82f   : > { %v2108_v57 = vsub.f32 %v2097_v42, %v2104_v41  ;;  %v913_v41 = vld [vmem:[%s3235_s17 + $0x18] sm:$0xff] }
 0x830   : > { %2258 = vmatpush.msrb.mxu0 %v913_v41 }
 0x831   : > { %v2110_v58 = vmul.f32 1.442695, %v2108_v57  ;;  %v912_v57 = vld [vmem:[%s3235_s17 + $0x10] sm:$0xff] }
 0x832   : > { %2259 = vmatpush.msrb.mxu0 %v912_v57 }
 0x833   : > { %3079 = vpow2.f32 %v2110_v58 }
 0x836   : > { %v2021_v60 = vpop.xlane.xlu2 %2020  ;;  %v2107_v43 = vpop.xlane.xlu1 %2106 }
 0x837   : > { %v2023_v62 = vsub.f32 %v2014_v53, %v2021_v60  ;;  %v2109_v2 = vsub.f32 %v2100_v59, %v2107_v43  ;;  %v911_v60 = vld [vmem:[%s3235_s17 + $0x8] sm:$0xff] }
 0x838   : > { %2260 = vmatpush.msrb.mxu0 %v911_v60 }
 0x839   : > { %v3080_v52 = vpop.eup %3079  ;;  %v2026_v47 = vmul.f32 1.442695, %v2023_v62  ;;  %v2112_v4 = vmul.f32 1.442695, %v2109_v2  ;;  %v910_v62 = vld [vmem:[%s3235_s17] sm:$0xff] }
 0x83a   : > { %v2114_v51 = vsel %vm1847_vm9, %v3080_v52, 0.0  ;;  %2261 = vmatpush.msrb.mxu0 %v910_v62 }
 0x83b   : > { %3081 = vpow2.f32 %v2026_v47  ;;  %2115 = vadd.xlane.f32.xlu2 %v2114_v51  ;;  %v908_v47 = vld [vmem:[%s3230_s20 + $0x130] sm:$0xff] }
 0x83c   : > { %3083 = vpow2.f32 %v2112_v4  ;;  %v907_v4 = vld [vmem:[%s3230_s20 + $0x128] sm:$0xff] }
 0x83e   : > { %v1865_v6 = vpop.xlane.xlu1 %1864 }
 0x83f   : > { %3085 = vrcp.f32 %v1865_v6 }
 0x841   : > { %v3082_v0 = vpop.eup %3081 }
 0x842   : > { %v3084_v1 = vpop.eup %3083  ;;  %v2031_v10 = vsel %vm1847_vm9, %v3082_v0, 0.0 }
 0x843   : > { %2032 = vadd.xlane.f32.xlu2 %v2031_v10  ;;  %v2117_v11 = vsel %vm1847_vm9, %v3084_v1, 0.0 }
 0x844   : > { %2118 = vadd.xlane.f32.xlu1 %v2117_v11 }
 0x845   : > { %v3086_v13 = vpop.eup %3085 }
 0x846   : > { %v1869_v16 = vmul.f32 %v3086_v13, %v3078_v56  ;;  %v905_v13 = vld [vmem:[%s3230_s20 + $0x118] sm:$0xff] }
 0x848   : > { %2953 = vmatmul.msk.f32.gmra.mxu2 %vm1847_vm9, %v1869_v16 }
 0x8ae   : > { %v2116_v21 = vpop.xlane.xlu2 %2115 }
 0x8af   : > { %3087 = vrcp.f32 %v2116_v21 }
 0x8b5   : > { %v3088_v22 = vpop.eup %3087 }
 0x8b6   : > { %v2122_v23 = vmul.f32 %v3088_v22, %v3080_v52  ;;  %v2033_v24 = vpop.xlane.xlu2 %2032  ;;  %v909_v52 = vld [vmem:[%s3230_s20 + $0x138] sm:$0xff] }
 0x8b7   : > { %3089 = vrcp.f32 %v2033_v24  ;;  %v2119_v25 = vpop.xlane.xlu1 %2118  ;;  %2287 = vmatpush.msrb.mxu1 %v909_v52 }
 0x8b8   : > { %3091 = vrcp.f32 %v2119_v25  ;;  %2964 = vmatmul.msk.f32.vlgmr.msrb.gmra.mxu2 %vm1847_vm9, %v2122_v23  ;;  %v2233_v23 = vperm.slane %v3789_v9, 2 }
 0x8b9   : > { %2288 = vmatpush.msrb.mxu1 %v908_v47 }
 0x8bb   : > { %2289 = vmatpush.msrb.mxu1 %v907_v4 }
 0x8bd   : > { %v3090_v26 = vpop.eup %3089 }
 0x8be   : > { %v3092_v20 = vpop.eup %3091  ;;  %v2037_v14 = vmul.f32 %v3090_v26, %v3082_v0  ;;  %v906_v0 = vld [vmem:[%s3230_s20 + $0x120] sm:$0xff] }
 0x8bf   : > { %v2123_v27 = vmul.f32 %v3092_v20, %v3084_v1  ;;  %2290 = vmatpush.msrb.mxu1 %v906_v0 }
 0x8c0   : > { %2959 = vmatmul.msk.f32.gmra.mxu0 %vm1847_vm9, %v2037_v14  ;;  %v2236_v14 = vperm.slane %v3789_v9, 3 }
 0x8c1   : > { %2965 = vmatmul.msk.f32.gmra.mxu2 %vm1847_vm9, %v2123_v27  ;;  %2291 = vmatpush.msrb.mxu1 %v905_v13 }
 0x8cb   : > { %v1982_v12 = vpop.f32.mrf.mxu2 }
 0x8cc   : > { %v1983_v5 = vadd.f32 %v1982_v12, %v3850_v63 }
 0x93b   : > { %v2149_v7 = vpop.f32.mrf.mxu2 }
 0x93c   : > { %v2155_v34 = vadd.f32 %v2149_v7, %v2069_v33 }
 0x93d   : > { %v2066_v35 = vpop.f32.mrf.mxu0 }
 0x93e   : > { %2966 = vmatmul.msk.f32.vlgmr.msra.gmra.mxu3 %vm959_vm1, %v2155_v34  ;;  %v2070_v36 = vadd.f32 %v2066_v35, %v1983_v5  ;;  %v904_v34 = vld [vmem:[%s3230_s20 + $0x110] sm:$0xff]  ;;  %v903_v35 = vld [vmem:[%s3230_s20 + $0x108] sm:$0xff]  ;;  %v902_v5 = vld [vmem:[%s3230_s20 + $0x100] sm:$0xff] }
 0x93f   : > { %2292 = vmatpush.msrb.mxu1 %v904_v34 }
 0x941   : > { %2293 = vmatpush.msrb.mxu1 %v903_v35 }
 0x943   : > { %2294 = vmatpush.msrb.mxu1 %v902_v5 }
 0x944   : > { %v2152_v37 = vpop.f32.mrf.mxu2 }
 0x945   : > { %v2156_v3 = vadd.f32 %v2152_v37, %v2070_v36  ;;  %v914_v36 = vld [vmem:[%s3235_s17 + $0x20] sm:$0xff] }
 0x946   : > { %v2239_v37 = vperm.slane %v914_v36, 0 }
 0x947   : > { %2967 = vmatmul.msk.f32.gmra.mxu3 %vm959_vm1, %v2156_v3 }
 0x9c1   : > { %v2181_v54 = vpop.f32.mrf.mxu3 }
 0x9c2   : > { %v2182_v40 = vadd.f32 %v2181_v54, %v2157_v38 }
 0x9c4   : > { %v2187_v39 = vadd.f32 %v2182_v40, %v3749_v8 }
 0x9c6   : > { %v2189_v42 = vsel %vm959_vm1, %v2187_v39, 0.0 }
 0x9c7   : > { %2190 = vadd.xlane.f32.xlu0 %v2189_v42 }
 0x9ca   : > { %v2184_v61 = vpop.f32.mrf.mxu3 }
 0x9cb   : > { %v2185_v45 = vadd.f32 %v2184_v61, %v2157_v38  ;;  %v2271_v61 = vperm.slane %v3789_v9, 4 }
 0x9cd   : > { %v2188_v50 = vadd.f32 %v2185_v45, %v3758_v18 }
 0x9cf   : > { %v2192_v63 = vsel %vm959_vm1, %v2188_v50, 0.0 }
 0x9d0   : > { %2193 = vadd.xlane.f32.xlu1 %v2192_v63 }
 0xa3a   : > { %v2191_v46 = vpop.xlane.xlu0 %2190 }
 0xa3b   : > { %v2195_v53 = vmul.f32 %v2191_v46, %v3723_v49 }
 0xa3d   : > { %v2197_v30 = vsub.f32 %v2187_v39, %v2195_v53 }
 0xa3f   : > { %v2199_v59 = vmul.f32 %v2197_v30, %v2197_v30 }
 0xa41   : > { %v2201_v8 = vsel %vm959_vm1, %v2199_v59, 0.0 }
 0xa42   : > { %2202 = vadd.xlane.f32.xlu2 %v2201_v8 }
 0xa43   : > { %v2194_v44 = vpop.xlane.xlu1 %2193 }
 0xa44   : > { %v2196_v55 = vmul.f32 %v2194_v44, %v3723_v49 }
 0xa46   : > { %v2198_v56 = vsub.f32 %v2188_v50, %v2196_v55 }
 0xa48   : > { %v2200_v18 = vmul.f32 %v2198_v56, %v2198_v56 }
 0xa4a   : > { %v2204_v48 = vsel %vm959_vm1, %v2200_v18, 0.0 }
 0xa4b   : > { %2205 = vadd.xlane.f32.xlu0 %v2204_v48 }
 0xab5   : > { %v2203_v58 = vpop.xlane.xlu2 %2202 }
 0xab6   : > { %v2207_v43 = vmul.f32 %v2203_v58, %v3723_v49 }
 0xab8   : > { %v2209_v2 = vadd.f32 1e-05, %v2207_v43 }
 0xaba   : > { %3093 = vrsqrt.f32 %v2209_v2  ;;  %vm2217_vm11 = vweird.f32 %v2209_v2 }
 0xabe   : > { %v2206_v51 = vpop.xlane.xlu0 %2205 }
 0xabf   : > { %v2208_v6 = vmul.f32 %v2206_v51, %v3723_v49 }
 0xac0   : > { %v3094_v1 = vpop.eup %3093 }
 0xac1   : > { %v2212_v10 = vmul.f32 %v3094_v1, %v2209_v2  ;;  %v2210_v11 = vadd.f32 1e-05, %v2208_v6  ;;  %vm2218_vm10 = vweird.f32 %v3094_v1 }
 0xac2   : > { %vm2219_vm12 = vmor %vm2217_vm11, %vm2218_vm10 }
 0xac3   : > { %v2213_v16 = vmul.f32 %v3094_v1, %v2212_v10  ;;  %3095 = vrsqrt.f32 %v2210_v11  ;;  %vm2227_vm14 = vweird.f32 %v2210_v11 }
 0xac5   : > { %v2214_v17 = vmul.f32 0.5, %v2213_v16 }
 0xac7   : > { %v2215_v19 = vsub.f32 1.5, %v2214_v17  ;;  %v2348_v17 = vperm.slane %v3789_v9, 5 }
 0xac9   : > { %v3096_v21 = vpop.eup %3095  ;;  %v2216_v22 = vmul.f32 %v3094_v1, %v2215_v19 }
 0xaca   : > { %v2222_v24 = vmul.f32 %v3096_v21, %v2210_v11  ;;  %vm2228_vm13 = vweird.f32 %v3096_v21 }
 0xacb   : > { %v2220_v25 = vsel %vm2219_vm12, %v3094_v1, %v2216_v22  ;;  %vm2229_vm15 = vmor %vm2227_vm14, %vm2228_vm13  ;;  %v2351_v22 = vperm.slane %v3789_v9, 6 }
 0xacc   : > { %v2231_v26 = vmul.f32 %v2220_v25, %v2197_v30  ;;  %v2223_v20 = vmul.f32 %v3096_v21, %v2222_v24 }
 0xace   : > { %v2234_v27 = vmul.f32 %v2233_v23, %v2231_v26  ;;  %v2224_v28 = vmul.f32 0.5, %v2223_v20 }
 0xad0   : > { %v2225_v29 = vsub.f32 1.5, %v2224_v28  ;;  %v2237_v15 = vadd.f32 %v2236_v14, %v2234_v27 }
 0xad2   : > { %v2226_v12 = vmul.f32 %v3096_v21, %v2225_v29  ;;  %2968 = vmatmul.msk.f32.vlgmr.msrb.gmra.mxu0 %vm959_vm1, %v2237_v15 }
 0xad4   : > { %v2230_v31 = vsel %vm2229_vm15, %v3096_v21, %v2226_v12 }
 0xad5   : > { %v2232_v32 = vmul.f32 %v2230_v31, %v2198_v56 }
 0xad7   : > { %v2235_v33 = vmul.f32 %v2233_v23, %v2232_v32 }
 0xad9   : > { %v2238_v7 = vadd.f32 %v2236_v14, %v2235_v33 }
 0xadb   : > { %2969 = vmatmul.msk.f32.gmra.mxu0 %vm959_vm1, %v2238_v7 }
 0xb4f   : > { %v2263_v3 = vpop.f32.mrf.mxu0 }
 0xb50   : > { %v2264_v38 = vadd.f32 %v2263_v3, %v2239_v37 }
 0xb52   : > { %v2269_v54 = vmax.f32 %v2264_v38, 0.0 }
 0xb54   : > { %2970 = vmatmul.msk.f32.vlgmr.msrb.gmra.mxu1 %vm2272_vm0, %v2269_v54 }
 0xb58   : > { %v2266_v40 = vpop.f32.mrf.mxu0 }
 0xb59   : > { %v2267_v39 = vadd.f32 %v2266_v40, %v2239_v37 }
 0xb5b   : > { %v2270_v42 = vmax.f32 %v2267_v39, 0.0 }
 0xb5d   : > { %2971 = vmatmul.msk.f32.gmra.mxu1 %vm2272_vm0, %v2270_v42 }
 0xbd1   : > { %v2296_v45 = vpop.f32.mrf.mxu1 }
 0xbd2   : > { %v2297_v50 = vadd.f32 %v2296_v45, %v2271_v61 }
 0xbd4   : > { %v2302_v63 = vadd.f32 %v2297_v50, %v2237_v15 }
 0xbd6   : > { %v2304_v46 = vsel %vm959_vm1, %v2302_v63, 0.0 }
 0xbd7   : > { %2305 = vadd.xlane.f32.xlu1 %v2304_v46 }
 0xbda   : > { %v2299_v53 = vpop.f32.mrf.mxu1 }
 0xbdb   : > { %v2300_v30 = vadd.f32 %v2299_v53, %v2271_v61 }
 0xbdd   : > { %v2303_v59 = vadd.f32 %v2300_v30, %v2238_v7 }
 0xbdf   : > { %v2307_v8 = vsel %vm959_vm1, %v2303_v59, 0.0 }
 0xbe0   : > { %2308 = vadd.xlane.f32.xlu2 %v2307_v8 }
 0xc4a   : > { %v2306_v44 = vpop.xlane.xlu1 %2305 }
 0xc4b   : > { %v2310_v55 = vmul.f32 %v2306_v44, %v3723_v49 }
 0xc4d   : > { %v2312_v56 = vsub.f32 %v2302_v63, %v2310_v55 }
 0xc4f   : > { %v2314_v18 = vmul.f32 %v2312_v56, %v2312_v56 }
 0xc51   : > { %v2316_v48 = vsel %vm959_vm1, %v2314_v18, 0.0 }
 0xc52   : > { %2317 = vadd.xlane.f32.xlu0 %v2316_v48 }
 0xc53   : > { %v2309_v41 = vpop.xlane.xlu2 %2308 }
 0xc54   : > { %v2311_v57 = vmul.f32 %v2309_v41, %v3723_v49 }
 0xc56   : > { %v2313_v58 = vsub.f32 %v2303_v59, %v2311_v57 }
 0xc58   : > { %v2315_v60 = vmul.f32 %v2313_v58, %v2313_v58 }
 0xc5a   : > { %v2319_v43 = vsel %vm959_vm1, %v2315_v60, 0.0 }
 0xc5b   : > { %2320 = vadd.xlane.f32.xlu1 %v2319_v43 }
 0xcc5   : > { %v2318_v62 = vpop.xlane.xlu0 %2317 }
 0xcc6   : > { %v2322_v2 = vmul.f32 %v2318_v62, %v3723_v49 }
 0xcc8   : > { %v2324_v52 = vadd.f32 1e-05, %v2322_v2 }
 0xcca   : > { %3097 = vrsqrt.f32 %v2324_v52  ;;  %vm2332_vm3 = vweird.f32 %v2324_v52 }
 0xcce   : > { %v2321_v47 = vpop.xlane.xlu1 %2320 }
 0xccf   : > { %v2323_v4 = vmul.f32 %v2321_v47, %v3723_v49 }
 0xcd0   : > { %v3098_v51 = vpop.eup %3097 }
 0xcd1   : > { %v2327_v6 = vmul.f32 %v3098_v51, %v2324_v52  ;;  %v2325_v0 = vadd.f32 1e-05, %v2323_v4  ;;  %vm2333_vm2 = vweird.f32 %v3098_v51 }
 0xcd2   : > { %vm2334_vm4 = vmor %vm2332_vm3, %vm2333_vm2 }
 0xcd3   : > { %v2328_v1 = vmul.f32 %v3098_v51, %v2327_v6  ;;  %3099 = vrsqrt.f32 %v2325_v0  ;;  %vm2342_vm6 = vweird.f32 %v2325_v0 }
 0xcd5   : > { %v2329_v10 = vmul.f32 0.5, %v2328_v1 }
 0xcd7   : > { %v2330_v11 = vsub.f32 1.5, %v2329_v10 }
 0xcd9   : > { %v3100_v13 = vpop.eup %3099  ;;  %v2331_v16 = vmul.f32 %v3098_v51, %v2330_v11 }
 0xcda   : > { %v2337_v19 = vmul.f32 %v3100_v13, %v2325_v0  ;;  %vm2343_vm5 = vweird.f32 %v3100_v13 }
 0xcdb   : > { %v2335_v21 = vsel %vm2334_vm4, %v3098_v51, %v2331_v16  ;;  %vm2344_vm7 = vmor %vm2342_vm6, %vm2343_vm5 }
 0xcdc   : > { %v2346_v23 = vmul.f32 %v2335_v21, %v2312_v56  ;;  %v2338_v49 = vmul.f32 %v3100_v13, %v2337_v19 }
 0xcde   : > { %v2349_v24 = vmul.f32 %v2348_v17, %v2346_v23  ;;  %v2339_v25 = vmul.f32 0.5, %v2338_v49 }
 0xce0   : > { %v2352_v26 = vadd.f32 %v2351_v22, %v2349_v24  ;;  %v2340_v20 = vsub.f32 1.5, %v2339_v25 }
 0xce2   : > { %2354 = vst.msk [vmem:[#allocation2] sm:$0xff] %vm959_vm1, %v2352_v26  ;;  %v2341_v14 = vmul.f32 %v3100_v13, %v2340_v20 }
 0xce4   : > { %v2345_v27 = vsel %vm2344_vm7, %v3100_v13, %v2341_v14 }
 0xce5   : > { %v2347_v28 = vmul.f32 %v2345_v27, %v2313_v58 }
 0xce7   : > { %v2350_v29 = vmul.f32 %v2348_v17, %v2347_v28 }
 0xce9   : > { %v2353_v15 = vadd.f32 %v2351_v22, %v2350_v29 }
 0xceb   : > { %2355 = vst.msk [vmem:[#allocation2 + $0x8] sm:$0xff] %vm959_vm1, %v2353_v15 }
 0xcec PF: > { %v2356_v9 = vld [vmem:[#allocation2] sm:$0xff]  ;;  %vm2359_vm8 = vcmask 261120   ;;  %v3118_v33 = vmov 32.0   ;;  %v2420_v46 = vld [vmem:[%s4060_s11 + $0x18] sm:$0xff]  ;;  %v2419_v30 = vld [vmem:[%s4060_s11 + $0x10] sm:$0xff]  ;;  %s4071_s13 = sld [smem:[#allocation4_spill]] }
 0xced   : > { %v2360_v12 = vsel %vm2359_vm8, %v2356_v9, 0.0  ;;  %3103 = vrcp.f32 %v3118_v33  ;;  %v2457_v53 = vld [vmem:[%s4059_s10 + $0x18] sm:$0xff]  ;;  %2441 = vmatpush.msra.mxu0 %v2420_v46  ;;  %v2456_v59 = vld [vmem:[%s4059_s10 + $0x10] sm:$0xff]  ;;  %v2418_v8 = vld [vmem:[%s4060_s11 + $0x8] sm:$0xff] }
 0xcee   : > { %2361 = vadd.xlane.f32.xlu0 %v2360_v12  ;;  %2479 = vmatpush.msra.mxu1 %v2457_v53  ;;  %v2455_v44 = vld [vmem:[%s4059_s10 + $0x8] sm:$0xff]  ;;  %v2417_v55 = vld [vmem:[%s4060_s11] sm:$0xff]  ;;  %v2461_v57 = vld [vmem:[%s4059_s10 + $0x38] sm:$0xff] }
 0xcef   : > { %2442 = vmatpush.msra.mxu0 %v2419_v30  ;;  %v2454_v56 = vld [vmem:[%s4059_s10] sm:$0xff]  ;;  %2511 = vmatpush.msra.mxu2 %v2461_v57  ;;  %v2460_v14 = vld [vmem:[%s4059_s10 + $0x30] sm:$0xff]  ;;  %v2459_v27 = vld [vmem:[%s4059_s10 + $0x28] sm:$0xff] }
 0xcf0   : > { %2480 = vmatpush.msra.mxu1 %v2456_v59  ;;  %v3949_v51 = vld [vmem:[%s4061_s12] sm:$0xff]  ;;  %v2465_v29 = vld [vmem:[%s4059_s10 + $0x58] sm:$0xff] }
 0xcf1   : > { %2443 = vmatpush.msra.mxu0 %v2418_v8  ;;  %v2411_v10 = vperm.slane %v3949_v51, 0  ;;  %v2414_v17 = vperm.slane %v3949_v51, 1  ;;  %2512 = vmatpush.msra.mxu2 %v2460_v14  ;;  %v2458_v28 = vld [vmem:[%s4059_s10 + $0x20] sm:$0xff]  ;;  %v2466_v12 = vperm.slane %v3949_v51, 2  ;;  %v2492_v30 = vperm.slane %v3949_v51, 3 }
 0xcf2   : > { %v2357_v31 = vld [vmem:[#allocation2 + $0x8] sm:$0xff]  ;;  %2481 = vmatpush.msra.mxu1 %v2455_v44  ;;  %2543 = vmatpush.msra.mxu3 %v2465_v29  ;;  %v2421_v15 = vld [vmem:[%s4060_s11 + $0x20] sm:$0xff] }
 0xcf3   : > { %v2363_v32 = vsel %vm2359_vm8, %v2357_v31, 0.0  ;;  %v3104_v7 = vpop.eup %3103  ;;  %2444 = vmatpush.msra.mxu0 %v2417_v55  ;;  %2513 = vmatpush.msra.mxu2 %v2459_v27  ;;  %v2986_v46 = vld [vmem:[%s4071_s13 + $0x60] sm:$0xff]  ;;  %v2987_v53 = vld [vmem:[%s4071_s13 + $0x68] sm:$0xff] }
 0xcf4   : > { %v2367_v34 = vmul.f32 32.0, %v3104_v7  ;;  %vm2371_vm9 = vweird.f32 %v3104_v7  ;;  %2482 = vmatpush.msra.mxu1 %v2454_v56  ;;  %v2554_v57 = vld [vmem:[%s4071_s13] sm:$0xff] }
 0xcf5   : > { %2514 = vmatpush.msra.mxu2 %v2458_v28 }
 0xcf6   : > { %2364 = vadd.xlane.f32.xlu0 %v2363_v32  ;;  %v2368_v35 = vsub.f32 1.0, %v2367_v34 }
 0xcf8   : > { %v2369_v5 = vmul.f32 %v3104_v7, %v2368_v35 }
 0xcfa   : > { %v2370_v36 = vadd.f32 %v3104_v7, %v2369_v5 }
 0xcfc   : > { %v2372_v37 = vsel %vm2371_vm9, %v3104_v7, %v2370_v36 }
 0xd61   : > { %v2362_v3 = vpop.xlane.xlu0 %2361 }
 0xd62   : > { %v2373_v38 = vmul.f32 %v2372_v37, %v2362_v3 }
 0xd64   : > { %v2375_v54 = vsub.f32 %v2356_v9, %v2373_v38  ;;  %v2422_v9 = vperm.slane %v2421_v15, 0  ;;  %v2464_v38 = vld [vmem:[%s4059_s10 + $0x50] sm:$0xff] }
 0xd65   : > { %2544 = vmatpush.msra.mxu3 %v2464_v38 }
 0xd66   : > { %v2377_v40 = vmul.f32 %v2375_v54, %v2375_v54 }
 0xd68   : > { %v2379_v39 = vsel %vm2359_vm8, %v2377_v40, 0.0  ;;  %v2462_v40 = vld [vmem:[%s4059_s10 + $0x40] sm:$0xff] }
 0xd69   : > { %2380 = vadd.xlane.f32.xlu1 %v2379_v39  ;;  %v2365_v42 = vpop.xlane.xlu0 %2364  ;;  %v2988_v39 = vld [vmem:[%s4071_s13 + $0x70] sm:$0xff] }
 0xd6a   : > { %v2374_v61 = vmul.f32 %v2372_v37, %v2365_v42  ;;  %v2989_v42 = vld [vmem:[%s4071_s13 + $0x78] sm:$0xff]  ;;  %2631 = vmatpush.msrb.mxu2 %v2988_v39 }
 0xd6c   : > { %v2376_v45 = vsub.f32 %v2357_v31, %v2374_v61  ;;  %v2560_v61 = vld [vmem:[%s4071_s13 + $0x30] sm:$0xff]  ;;  %2632 = vmatpush.msrb.mxu2 %v2986_v46 }
 0xd6d   : > { %2577 = vmatpush.msrb.mxu0 %v2560_v61 }
 0xd6e   : > { %v2378_v50 = vmul.f32 %v2376_v45, %v2376_v45 }
 0xd70   : > { %v2382_v63 = vsel %vm2359_vm8, %v2378_v50, 0.0  ;;  %v2558_v50 = vld [vmem:[%s4071_s13 + $0x20] sm:$0xff] }
 0xd71   : > { %2383 = vadd.xlane.f32.xlu1 %v2382_v63  ;;  %v2559_v63 = vld [vmem:[%s4071_s13 + $0x28] sm:$0xff]  ;;  %2578 = vmatpush.msrb.mxu0 %v2558_v50 }
 0xddc   : > { %v2381_v18 = vpop.xlane.xlu1 %2380 }
 0xddd   : > { %v2385_v48 = vmul.f32 %v2381_v18, %v2372_v37 }
 0xddf   : > { %v2387_v41 = vadd.f32 1e-05, %v2385_v48  ;;  %v2556_v48 = vld [vmem:[%s4071_s13 + $0x10] sm:$0xff] }
 0xde0   : > { %2579 = vmatpush.msrb.mxu0 %v2556_v48 }
 0xde1   : > { %3105 = vrsqrt.f32 %v2387_v41  ;;  %vm2395_vm10 = vweird.f32 %v2387_v41 }
 0xde2   : > { %2580 = vmatpush.msrb.mxu0 %v2554_v57 }
 0xde4   : > { %v2384_v58 = vpop.xlane.xlu1 %2383 }
 0xde5   : > { %v2386_v60 = vmul.f32 %v2384_v58, %v2372_v37  ;;  %v2555_v58 = vld [vmem:[%s4071_s13 + $0x8] sm:$0xff] }
 0xde7   : > { %v3106_v43 = vpop.eup %3105  ;;  %v2388_v62 = vadd.f32 1e-05, %v2386_v60  ;;  %v2984_v60 = vld [vmem:[%s4071_s13 + $0x50] sm:$0xff] }
 0xde8   : > { %v2390_v2 = vmul.f32 %v3106_v43, %v2387_v41  ;;  %vm2396_vm1 = vweird.f32 %v3106_v43  ;;  %v2557_v41 = vld [vmem:[%s4071_s13 + $0x18] sm:$0xff]  ;;  %2633 = vmatpush.msrb.mxu2 %v2984_v60 }
 0xde9   : > { %3107 = vrsqrt.f32 %v2388_v62  ;;  %vm2397_vm11 = vmor %vm2395_vm10, %vm2396_vm1  ;;  %vm2405_vm13 = vweird.f32 %v2388_v62 }
 0xdea   : > { %v2391_v52 = vmul.f32 %v3106_v43, %v2390_v2  ;;  %v2983_v2 = vld [vmem:[%s4071_s13 + $0x48] sm:$0xff] }
 0xdec   : > { %v2392_v47 = vmul.f32 0.5, %v2391_v52  ;;  %v2524_v52 = vperm.slane %v3949_v51, 4 }
 0xdee   : > { %v2393_v4 = vsub.f32 1.5, %v2392_v47 }
 0xdef   : > { %v3108_v6 = vpop.eup %3107 }
 0xdf0   : > { %v2394_v0 = vmul.f32 %v3106_v43, %v2393_v4  ;;  %v2400_v1 = vmul.f32 %v3108_v6, %v2388_v62  ;;  %vm2406_vm12 = vweird.f32 %v3108_v6  ;;  %v2982_v62 = vld [vmem:[%s4071_s13 + $0x40] sm:$0xff] }
 0xdf1   : > { %vm2407_vm14 = vmor %vm2405_vm13, %vm2406_vm12  ;;  %2634 = vmatpush.msrb.mxu2 %v2982_v62 }
 0xdf2   : > { %v2398_v11 = vsel %vm2397_vm11, %v3106_v43, %v2394_v0  ;;  %v2401_v13 = vmul.f32 %v3108_v6, %v2400_v1  ;;  %v2985_v43 = vld [vmem:[%s4071_s13 + $0x58] sm:$0xff] }
 0xdf3   : > { %v2409_v16 = vmul.f32 %v2398_v11, %v2375_v54  ;;  %v2463_v54 = vld [vmem:[%s4059_s10 + $0x48] sm:$0xff] }
 0xdf4   : > { %v2402_v19 = vmul.f32 0.5, %v2401_v13  ;;  %2545 = vmatpush.msra.mxu3 %v2463_v54 }
 0xdf5   : > { %v2412_v21 = vmul.f32 %v2411_v10, %v2409_v16 }
 0xdf6   : > { %v2403_v22 = vsub.f32 1.5, %v2402_v19  ;;  %2546 = vmatpush.msra.mxu3 %v2462_v40 }
 0xdf7   : > { %v2415_v23 = vadd.f32 %v2414_v17, %v2412_v21 }
 0xdf8   : > { %v2404_v49 = vmul.f32 %v3108_v6, %v2403_v22  ;;  %2651 = vmatpush.msrb.mxu3 %v2989_v42 }
 0xdf9   : > { %2972 = vmatmul.msk.f32.vlgmr.msra.gmra.mxu0 %vm2359_vm8, %v2415_v23  ;;  %2974 = vmatmul.msk.f32.vlgmr.msra.gmra.mxu1 %vm2359_vm8, %v2415_v23 }
 0xdfa   : > { %v2408_v24 = vsel %vm2407_vm14, %v3108_v6, %v2404_v49  ;;  %2652 = vmatpush.msrb.mxu3 %v2987_v53 }
 0xdfb   : > { %v2410_v25 = vmul.f32 %v2408_v24, %v2376_v45  ;;  %v2561_v45 = vld [vmem:[%s4071_s13 + $0x38] sm:$0xff] }
 0xdfc   : > { %2597 = vmatpush.msrb.mxu1 %v2561_v45  ;;  %2653 = vmatpush.msrb.mxu3 %v2985_v43 }
 0xdfd   : > { %v2413_v26 = vmul.f32 %v2411_v10, %v2410_v25 }
 0xdfe   : > { %2598 = vmatpush.msrb.mxu1 %v2559_v63  ;;  %2654 = vmatpush.msrb.mxu3 %v2983_v2 }
 0xdff   : > { %v2416_v20 = vadd.f32 %v2414_v17, %v2413_v26 }
 0xe00   : > { %2599 = vmatpush.msrb.mxu1 %v2557_v41 }
 0xe01   : > { %2973 = vmatmul.msk.f32.gmra.mxu0 %vm2359_vm8, %v2416_v20  ;;  %2975 = vmatmul.msk.f32.gmra.mxu1 %vm2359_vm8, %v2416_v20 }
 0xe02   : > { %2600 = vmatpush.msrb.mxu1 %v2555_v58 }
 0xe76   : > { %v2446_v31 = vpop.f32.mrf.mxu0  ;;  %v2484_v32 = vpop.f32.mrf.mxu1 }
 0xe77   : > { %v2447_v33 = vadd.f32 %v2446_v31, %v2422_v9  ;;  %v2485_v7 = vadd.f32 %v2484_v32, %v2466_v12 }
 0xe79   : > { %2452 = vst [vmem:[%s3215_s28] sm:$0xff] %v2447_v33  ;;  %v2490_v34 = vmax.f32 %v2485_v7, 0.0 }
 0xe7b   : > { %2976 = vmatmul.msk.f32.vlgmr.msra.gmra.mxu2 %vm2359_vm8, %v2490_v34 }
 0xe7e   : > { %v2449_v35 = vpop.f32.mrf.mxu0  ;;  %v2487_v5 = vpop.f32.mrf.mxu1 }
 0xe7f   : > { %v2450_v36 = vadd.f32 %v2449_v35, %v2422_v9  ;;  %v2488_v37 = vadd.f32 %v2487_v5, %v2466_v12 }
 0xe81   : > { %2453 = vst [vmem:[%s3215_s28 + $0x8] sm:$0xff] %v2450_v36  ;;  %v2491_v3 = vmax.f32 %v2488_v37, 0.0 }
 0xe83   : > { %2977 = vmatmul.msk.f32.gmra.mxu2 %vm2359_vm8, %v2491_v3 }
 0xefe   : > { %v2516_v59 = vpop.f32.mrf.mxu2 }
 0xeff   : > { %v2517_v8 = vadd.f32 %v2516_v59, %v2492_v30 }
 0xf01   : > { %v2522_v44 = vmax.f32 %v2517_v8, 0.0 }
 0xf03   : > { %2978 = vmatmul.msk.f32.vlgmr.msra.gmra.mxu3 %vm2359_vm8, %v2522_v44 }
 0xf06   : > { %v2519_v55 = vpop.f32.mrf.mxu2 }
 0xf07   : > { %v2520_v56 = vadd.f32 %v2519_v55, %v2492_v30 }
 0xf09   : > { %v2523_v18 = vmax.f32 %v2520_v56, 0.0 }
 0xf0b   : > { %2979 = vmatmul.msk.f32.gmra.mxu3 %vm2359_vm8, %v2523_v18 }
 0xf86   : > { %v2548_v47 = vpop.f32.mrf.mxu3 }
 0xf87   : > { %v2549_v4 = vadd.f32 %v2548_v47, %v2524_v52 }
 0xf89   : > { %2980 = vmatmul.msk.f32.vlgmr.msrb.gmra.mxu0 %vm2359_vm8, %v2549_v4  ;;  %2981 = vmatmul.msk.f32.vlgmr.msrb.gmra.mxu1 %vm2359_vm8, %v2549_v4 }
 0xf8e   : > { %v2551_v6 = vpop.f32.mrf.mxu3 }
 0xf8f   : > { %v2552_v0 = vadd.f32 %v2551_v6, %v2524_v52 }
 0xf91   : > { %2990 = vmatmul.msk.f32.vlgmr.msrb.gmra.mxu2 %vm2359_vm8, %v2552_v0  ;;  %2991 = vmatmul.msk.f32.vlgmr.msrb.gmra.mxu3 %vm2359_vm8, %v2552_v0 }
0x1006   : > { %v2582_v1 = vpop.f32.mrf.mxu0  ;;  %v2602_v10 = vpop.f32.mrf.mxu1 }
0x1007   : > { %2605 = vst [vmem:[%s3220_s16] sm:$0xff] %v2582_v1 }
0x1008   : > { %2606 = vst [vmem:[%s3220_s16 + $0x8] sm:$0xff] %v2602_v10 }
0x1014   : > { %v2636_v11 = vpop.f32.mrf.mxu2  ;;  %v2656_v13 = vpop.f32.mrf.mxu3 }
0x1015   : > { %2992 = vst [vmem:[%s3220_s16 + $0x10] sm:$0xff] %v2636_v11 }
0x1016   : > { %2993 = vst [vmem:[%s3220_s16 + $0x18] sm:$0xff] %v2656_v13 }
0x1017 PF: > { %s4072_s27 = sld [smem:[#allocation3_spill]] }
0x101d   : > { %s26_s18 = sadd.s32 1, %s4072_s27  }
0x101e   : > { %p23_p11 = scmp.ge.s32.totalorder %s26_s18, 6  }
0x1020   :  { %25 = sbr.rel (!%p23_p11) target bundleno = 3 (0x3), region = 137 }

</bundles_post_ra>
